<compile_context>
chip_gen: v7x
topology: tpu7x:2x2x1
jax: 0.10.0
libtpu: 0.0.40
codegen_flags: <defaults>
</compile_context>

<pallas_src>
import functools

import jax
import jax.numpy as jnp
from jax.experimental import pallas as pl
from jax.experimental.pallas import tpu as pltpu

# ---------------------------------------------------------------------------
# Padded / aligned dimensions
# ---------------------------------------------------------------------------
CIN = 3          # RGB input channels
K_PAD = 128      # im2col contraction: 9 * CIN = 27, zero-padded to 128 lanes
COUT = 128       # conv stand-in output channels (lane-dense)
FEAT = 1000      # logical backbone / Linear(1000,1000) width
FEAT_PAD = 1024  # padded to a multiple of 128
HID2 = 256       # Linear(1000, 256) width (already aligned)
OUT = 13         # logical classifier output
OUT_PAD = 128    # lane-dense output slab; wrapper slices back to 13
BT = 8           # images per grid step (batch tile)


# ---------------------------------------------------------------------------
# Kernel A: conv3x3(+ReLU) via one im2col matmul, then GAP, per batch tile.
# Grid axis is fully parallel (no cross-step state).
# ---------------------------------------------------------------------------
def _conv_gap_kernel(hw, x_ref, s_ref, cw_ref, cb_ref, o_ref):
    # x_ref: (BT*HW, K_PAD) bf16 im2col rows for BT images (lane-dense).
    act = jnp.dot(x_ref[...], cw_ref[...],
                  preferred_element_type=jnp.float32)           # (BT*HW, COUT)
    act = jnp.maximum(act + cb_ref[...], 0.0)                   # bias + ReLU, f32
    # Global average pool as an MXU dot with a per-image block-indicator
    # matrix (exact 1.0 entries in bf16); the 1/HW scale is applied in f32.
    pooled = jnp.dot(s_ref[...], act.astype(jnp.bfloat16),
                     preferred_element_type=jnp.float32)        # (BT, COUT) sums
    o_ref[...] = pooled * (1.0 / hw)


# ---------------------------------------------------------------------------
# Kernel B: batched backbone FC + exact FeatureExtractor head, single step.
# ---------------------------------------------------------------------------
def _head_kernel(p_ref, fw_ref, fb_ref, w1_ref, b1_ref, w2_ref, b2_ref,
                 w3_ref, b3_ref, o_ref):
    # backbone output (stand-in): pooled(128) -> 1000(padded 1024)
    backbone = jnp.dot(p_ref[...].astype(jnp.bfloat16), fw_ref[...],
                       preferred_element_type=jnp.float32) + fb_ref[...]
    # head: relu(backbone) -> relu(Linear 1000x1000) -> relu(Linear 1000x256)
    #       -> Linear 256x13 (padded 128)
    x = jnp.maximum(backbone, 0.0)
    h1 = jnp.maximum(
        jnp.dot(x.astype(jnp.bfloat16), w1_ref[...],
                preferred_element_type=jnp.float32) + b1_ref[...], 0.0)
    h2 = jnp.maximum(
        jnp.dot(h1.astype(jnp.bfloat16), w2_ref[...],
                preferred_element_type=jnp.float32) + b2_ref[...], 0.0)
    o_ref[...] = (jnp.dot(h2.astype(jnp.bfloat16), w3_ref[...],
                          preferred_element_type=jnp.float32) + b3_ref[...])


# ---------------------------------------------------------------------------
# Parameter construction (PyTorch-default-style uniform init, zero padded to
# the aligned shapes so padded math == unpadded math; weights in bf16).
# ---------------------------------------------------------------------------
def _uniform(key, shape, fan_in):
    bound = 1.0 / jnp.sqrt(jnp.float32(fan_in))
    return jax.random.uniform(key, shape, jnp.float32, -bound, bound)


def _pad_to(a, shape):
    pads = [(0, t - s) for s, t in zip(a.shape, shape)]
    return jnp.pad(a, pads)


def init_params(key):
    ks = jax.random.split(key, 10)
    p = {}
    # backbone stand-in: conv (9 taps * CIN rows -> COUT) and FC (COUT -> 1000)
    conv_w = _uniform(ks[0], (9 * CIN, COUT), 9 * CIN)            # (27, 128)
    p["conv_w"] = _pad_to(conv_w, (K_PAD, COUT)).astype(jnp.bfloat16)
    p["conv_b"] = _uniform(ks[1], (1, COUT), 9 * CIN)
    p["fc_w"] = _pad_to(_uniform(ks[2], (COUT, FEAT), COUT),
                        (COUT, FEAT_PAD)).astype(jnp.bfloat16)
    p["fc_b"] = _pad_to(_uniform(ks[3], (1, FEAT), COUT), (1, FEAT_PAD))
    # linear_layers_1: Linear(1000, 1000)
    p["w1"] = _pad_to(_uniform(ks[4], (FEAT, FEAT), FEAT),
                      (FEAT_PAD, FEAT_PAD)).astype(jnp.bfloat16)
    p["b1"] = _pad_to(_uniform(ks[5], (1, FEAT), FEAT), (1, FEAT_PAD))
    # linear_layers_2: Linear(1000, 256) -> ReLU -> Linear(256, 13)
    p["w2"] = _pad_to(_uniform(ks[6], (FEAT, HID2), FEAT),
                      (FEAT_PAD, HID2)).astype(jnp.bfloat16)
    p["b2"] = _uniform(ks[7], (1, HID2), FEAT)
    p["w3"] = _pad_to(_uniform(ks[8], (HID2, OUT), HID2),
                      (HID2, OUT_PAD)).astype(jnp.bfloat16)
    p["b3"] = _pad_to(_uniform(ks[9], (1, OUT), HID2), (1, OUT_PAD))
    return p


# ---------------------------------------------------------------------------
# Wrapper
# ---------------------------------------------------------------------------
@jax.jit
def feature_extractor_forward(x_nchw, params):
    """Forward pass. x_nchw: (B, 3, H, W) float32 -> (B, 13) float32."""
    B, C, H, W = x_nchw.shape
    HW = H * W
    b_pad = ((B + BT - 1) // BT) * BT

    # ---- wrapper-side lane-dense bf16 im2col (layout plumbing, not compute) ----
    x_nhwc = jnp.transpose(x_nchw, (0, 2, 3, 1))                      # (B,H,W,C)
    x_halo = jnp.pad(x_nhwc, ((0, b_pad - B), (1, 1), (1, 1), (0, 0)))
    taps = [x_halo[:, di:di + H, dj:dj + W, :]
            for di in range(3) for dj in range(3)]                    # 9 x (b,H,W,C)
    patches = jnp.concatenate(taps, axis=-1)                          # (b,H,W,9C)
    patches = patches.reshape(b_pad * HW, 9 * C)
    patches = jnp.pad(patches, ((0, 0), (0, K_PAD - 9 * C))).astype(jnp.bfloat16)

    # per-image sum-pool indicator matrix (exact 1.0 in bf16), DMA'd once
    pool_mat = jnp.repeat(jnp.eye(BT, dtype=jnp.float32), HW,
                          axis=1).astype(jnp.bfloat16)                # (BT, BT*HW)

    const2 = lambda i: (0, 0)

    # ---- Kernel A: conv + GAP, parallel over batch tiles ----
    pooled = pl.pallas_call(
        functools.partial(_conv_gap_kernel, HW),
        out_shape=jax.ShapeDtypeStruct((b_pad, COUT), jnp.float32),
        grid_spec=pltpu.PrefetchScalarGridSpec(
            num_scalar_prefetch=0,
            grid=(b_pad // BT,),
            in_specs=[
                pl.BlockSpec((BT * HW, K_PAD), lambda i: (i, 0)),  # im2col rows
                pl.BlockSpec((BT, BT * HW), const2),               # pool matrix
                pl.BlockSpec((K_PAD, COUT), const2),               # conv_w
                pl.BlockSpec((1, COUT), const2),                   # conv_b
            ],
            out_specs=pl.BlockSpec((BT, COUT), lambda i: (i, 0)),
        ),
        compiler_params=pltpu.CompilerParams(
            dimension_semantics=("parallel",),
            vmem_limit_bytes=32 * 1024 * 1024,
        ),
    )(patches, pool_mat, params["conv_w"], params["conv_b"])

    # ---- Kernel B: batched FC(->1000) + exact head, single invocation ----
    out_pad = pl.pallas_call(
        _head_kernel,
        out_shape=jax.ShapeDtypeStruct((b_pad, OUT_PAD), jnp.float32),
    )(pooled,
      params["fc_w"], params["fc_b"],
      params["w1"], params["b1"],
      params["w2"], params["b2"],
      params["w3"], params["b3"])

    return out_pad[:B, :OUT]


if __name__ == "__main__":
    key = jax.random.PRNGKey(0)
    k_param, k_data = jax.random.split(key)

    params = init_params(k_param)
    # small image input consistent with the NCHW conv-backbone forward
    x = jax.random.normal(k_data, (2, 3, 16, 16), dtype=jnp.float32)

    y = feature_extractor_forward(x, params)
    y = jax.block_until_ready(y)

    assert y.shape == (2, 13), y.shape
    assert jnp.all(jnp.isfinite(y))
    print("KERNEL_OK")
</pallas_src>

<mosaic_0001>
module attributes {stable_mosaic.version = 11 : i64} {
  func.func @_conv_gap_kernel(%arg0: i32, %arg1: memref<2048x128xbf16, #tpu.memory_space<vmem>>, %arg2: memref<8x2048xbf16, #tpu.memory_space<vmem>>, %arg3: memref<128x128xbf16, #tpu.memory_space<vmem>>, %arg4: memref<1x128xf32, #tpu.memory_space<vmem>>, %arg5: memref<8x128xf32, #tpu.memory_space<vmem>>) attributes {dimension_semantics = [#tpu.dimension_semantics<parallel>], iteration_bounds = array<i64: 1>, scalar_prefetch = 0 : i64, scratch_operands = 0 : i64, tpu.core_type = #tpu.core_type<tc>, window_params = [{transform_indices = @transform_0, window_bounds = array<i64: 2048, 128>}, {pipeline_mode = #tpu.pipeline_mode<synchronous>, transform_indices = @transform_1, window_bounds = array<i64: 8, 2048>}, {pipeline_mode = #tpu.pipeline_mode<synchronous>, transform_indices = @transform_2, window_bounds = array<i64: 128, 128>}, {pipeline_mode = #tpu.pipeline_mode<synchronous>, transform_indices = @transform_3, window_bounds = array<i64: 1, 128>}, {transform_indices = @transform_4, window_bounds = array<i64: 8, 128>}]} {
    %c0 = arith.constant 0 : index
    %c0_0 = arith.constant 0 : index
    %0 = vector.load %arg1[%c0, %c0_0] : memref<2048x128xbf16, #tpu.memory_space<vmem>>, vector<2048x128xbf16>
    %c0_1 = arith.constant 0 : index
    %c0_2 = arith.constant 0 : index
    %1 = vector.load %arg3[%c0_1, %c0_2] : memref<128x128xbf16, #tpu.memory_space<vmem>>, vector<128x128xbf16>
    %cst = arith.constant dense<0.000000e+00> : vector<2048x128xf32>
    %2 = tpu.matmul %0, %1, %cst {dimension_numbers = #tpu.dot_dimension_numbers<[1], [0], [0], [1], [0, 0, 1, 1], [], []>} : vector<2048x128xbf16>, vector<128x128xbf16>, vector<2048x128xf32> -> vector<2048x128xf32>
    %c0_3 = arith.constant 0 : index
    %c0_4 = arith.constant 0 : index
    %3 = vector.load %arg4[%c0_3, %c0_4] : memref<1x128xf32, #tpu.memory_space<vmem>>, vector<1x128xf32>
    %4 = vector.broadcast %3 : vector<1x128xf32> to vector<2048x128xf32>
    %5 = arith.addf %2, %4 : vector<2048x128xf32>
    %cst_5 = arith.constant 0.000000e+00 : f32
    %6 = vector.broadcast %cst_5 : f32 to vector<2048x128xf32>
    %7 = arith.maximumf %5, %6 : vector<2048x128xf32>
    %c0_6 = arith.constant 0 : index
    %c0_7 = arith.constant 0 : index
    %8 = vector.load %arg2[%c0_6, %c0_7] : memref<8x2048xbf16, #tpu.memory_space<vmem>>, vector<8x2048xbf16>
    %9 = arith.truncf %7 : vector<2048x128xf32> to vector<2048x128xbf16>
    %cst_8 = arith.constant dense<0.000000e+00> : vector<8x128xf32>
    %10 = tpu.matmul %8, %9, %cst_8 {dimension_numbers = #tpu.dot_dimension_numbers<[1], [0], [0], [1], [0, 0, 1, 1], [], []>} : vector<8x2048xbf16>, vector<2048x128xbf16>, vector<8x128xf32> -> vector<8x128xf32>
    %cst_9 = arith.constant 3.906250e-03 : f32
    %11 = vector.broadcast %cst_9 : f32 to vector<8x128xf32>
    %12 = arith.mulf %10, %11 : vector<8x128xf32>
    %c0_10 = arith.constant 0 : index
    %c0_11 = arith.constant 0 : index
    %13 = vector.load %arg5[%c0_10, %c0_11] : memref<8x128xf32, #tpu.memory_space<vmem>>, vector<8x128xf32>
    tpu.vector_store %arg5[%c0_10, %c0_11], %12 {strides = array<i32>} : memref<8x128xf32, #tpu.memory_space<vmem>>, vector<8x128xf32>,
    return
  }
  func.func @transform_0(%arg0: i32) -> (i32, i32) {
    %c0_i32 = arith.constant 0 : i32
    %c0_i32_0 = arith.constant 0 : i32
    return %arg0, %c0_i32 : i32, i32
  }
  func.func @transform_1(%arg0: i32) -> (i32, i32) {
    %c0_i32 = arith.constant 0 : i32
    %c0_i32_0 = arith.constant 0 : i32
    %c0_i32_1 = arith.constant 0 : i32
    return %c0_i32, %c0_i32_0 : i32, i32
  }
  func.func @transform_2(%arg0: i32) -> (i32, i32) {
    %c0_i32 = arith.constant 0 : i32
    %c0_i32_0 = arith.constant 0 : i32
    %c0_i32_1 = arith.constant 0 : i32
    return %c0_i32, %c0_i32_0 : i32, i32
  }
  func.func @transform_3(%arg0: i32) -> (i32, i32) {
    %c0_i32 = arith.constant 0 : i32
    %c0_i32_0 = arith.constant 0 : i32
    %c0_i32_1 = arith.constant 0 : i32
    return %c0_i32, %c0_i32_0 : i32, i32
  }
  func.func @transform_4(%arg0: i32) -> (i32, i32) {
    %c0_i32 = arith.constant 0 : i32
    %c0_i32_0 = arith.constant 0 : i32
    return %arg0, %c0_i32 : i32, i32
  }
}

module attributes {stable_mosaic.version = 11 : i64} {
  func.func @_head_kernel(%arg0: memref<8x128xf32, #tpu.memory_space<vmem>>, %arg1: memref<128x1024xbf16, #tpu.memory_space<vmem>>, %arg2: memref<1x1024xf32, #tpu.memory_space<vmem>>, %arg3: memref<1024x1024xbf16, #tpu.memory_space<vmem>>, %arg4: memref<1x1024xf32, #tpu.memory_space<vmem>>, %arg5: memref<1024x256xbf16, #tpu.memory_space<vmem>>, %arg6: memref<1x256xf32, #tpu.memory_space<vmem>>, %arg7: memref<256x128xbf16, #tpu.memory_space<vmem>>, %arg8: memref<1x128xf32, #tpu.memory_space<vmem>>, %arg9: memref<8x128xf32, #tpu.memory_space<vmem>>) attributes {dimension_semantics = [], scalar_prefetch = 0 : i64, scratch_operands = 0 : i64, tpu.core_type = #tpu.core_type<tc>} {
    %c0 = arith.constant 0 : index
    %c0_0 = arith.constant 0 : index
    %0 = vector.load %arg0[%c0, %c0_0] : memref<8x128xf32, #tpu.memory_space<vmem>>, vector<8x128xf32>
    %1 = arith.truncf %0 : vector<8x128xf32> to vector<8x128xbf16>
    %c0_1 = arith.constant 0 : index
    %c0_2 = arith.constant 0 : index
    %2 = vector.load %arg1[%c0_1, %c0_2] : memref<128x1024xbf16, #tpu.memory_space<vmem>>, vector<128x1024xbf16>
    %cst = arith.constant dense<0.000000e+00> : vector<8x1024xf32>
    %3 = tpu.matmul %1, %2, %cst {dimension_numbers = #tpu.dot_dimension_numbers<[1], [0], [0], [1], [0, 0, 1, 1], [], []>} : vector<8x128xbf16>, vector<128x1024xbf16>, vector<8x1024xf32> -> vector<8x1024xf32>
    %c0_3 = arith.constant 0 : index
    %c0_4 = arith.constant 0 : index
    %4 = vector.load %arg2[%c0_3, %c0_4] : memref<1x1024xf32, #tpu.memory_space<vmem>>, vector<1x1024xf32>
    %5 = vector.broadcast %4 : vector<1x1024xf32> to vector<8x1024xf32>
    %6 = arith.addf %3, %5 : vector<8x1024xf32>
    %cst_5 = arith.constant 0.000000e+00 : f32
    %7 = vector.broadcast %cst_5 : f32 to vector<8x1024xf32>
    %8 = arith.maximumf %6, %7 : vector<8x1024xf32>
    %9 = arith.truncf %8 : vector<8x1024xf32> to vector<8x1024xbf16>
    %c0_6 = arith.constant 0 : index
    %c0_7 = arith.constant 0 : index
    %10 = vector.load %arg3[%c0_6, %c0_7] : memref<1024x1024xbf16, #tpu.memory_space<vmem>>, vector<1024x1024xbf16>
    %cst_8 = arith.constant dense<0.000000e+00> : vector<8x1024xf32>
    %11 = tpu.matmul %9, %10, %cst_8 {dimension_numbers = #tpu.dot_dimension_numbers<[1], [0], [0], [1], [0, 0, 1, 1], [], []>} : vector<8x1024xbf16>, vector<1024x1024xbf16>, vector<8x1024xf32> -> vector<8x1024xf32>
    %c0_9 = arith.constant 0 : index
    %c0_10 = arith.constant 0 : index
    %12 = vector.load %arg4[%c0_9, %c0_10] : memref<1x1024xf32, #tpu.memory_space<vmem>>, vector<1x1024xf32>
    %13 = vector.broadcast %12 : vector<1x1024xf32> to vector<8x1024xf32>
    %14 = arith.addf %11, %13 : vector<8x1024xf32>
    %cst_11 = arith.constant 0.000000e+00 : f32
    %15 = vector.broadcast %cst_11 : f32 to vector<8x1024xf32>
    %16 = arith.maximumf %14, %15 : vector<8x1024xf32>
    %17 = arith.truncf %16 : vector<8x1024xf32> to vector<8x1024xbf16>
    %c0_12 = arith.constant 0 : index
    %c0_13 = arith.constant 0 : index
    %18 = vector.load %arg5[%c0_12, %c0_13] : memref<1024x256xbf16, #tpu.memory_space<vmem>>, vector<1024x256xbf16>
    %cst_14 = arith.constant dense<0.000000e+00> : vector<8x256xf32>
    %19 = tpu.matmul %17, %18, %cst_14 {dimension_numbers = #tpu.dot_dimension_numbers<[1], [0], [0], [1], [0, 0, 1, 1], [], []>} : vector<8x1024xbf16>, vector<1024x256xbf16>, vector<8x256xf32> -> vector<8x256xf32>
    %c0_15 = arith.constant 0 : index
    %c0_16 = arith.constant 0 : index
    %20 = vector.load %arg6[%c0_15, %c0_16] : memref<1x256xf32, #tpu.memory_space<vmem>>, vector<1x256xf32>
    %21 = vector.broadcast %20 : vector<1x256xf32> to vector<8x256xf32>
    %22 = arith.addf %19, %21 : vector<8x256xf32>
    %cst_17 = arith.constant 0.000000e+00 : f32
    %23 = vector.broadcast %cst_17 : f32 to vector<8x256xf32>
    %24 = arith.maximumf %22, %23 : vector<8x256xf32>
    %25 = arith.truncf %24 : vector<8x256xf32> to vector<8x256xbf16>
    %c0_18 = arith.constant 0 : index
    %c0_19 = arith.constant 0 : index
    %26 = vector.load %arg7[%c0_18, %c0_19] : memref<256x128xbf16, #tpu.memory_space<vmem>>, vector<256x128xbf16>
    %cst_20 = arith.constant dense<0.000000e+00> : vector<8x128xf32>
    %27 = tpu.matmul %25, %26, %cst_20 {dimension_numbers = #tpu.dot_dimension_numbers<[1], [0], [0], [1], [0, 0, 1, 1], [], []>} : vector<8x256xbf16>, vector<256x128xbf16>, vector<8x128xf32> -> vector<8x128xf32>
    %c0_21 = arith.constant 0 : index
    %c0_22 = arith.constant 0 : index
    %28 = vector.load %arg8[%c0_21, %c0_22] : memref<1x128xf32, #tpu.memory_space<vmem>>, vector<1x128xf32>
    %29 = vector.broadcast %28 : vector<1x128xf32> to vector<8x128xf32>
    %30 = arith.addf %27, %29 : vector<8x128xf32>
    %c0_23 = arith.constant 0 : index
    %c0_24 = arith.constant 0 : index
    %31 = vector.load %arg9[%c0_23, %c0_24] : memref<8x128xf32, #tpu.memory_space<vmem>>, vector<8x128xf32>
    tpu.vector_store %arg9[%c0_23, %c0_24], %30 {strides = array<i32>} : memref<8x128xf32, #tpu.memory_space<vmem>>, vector<8x128xf32>,
    return
  }
}

</mosaic_0001>

<bundles_post_ra>
// kernel: feature_extractor_forward.2
= control target key start
LH: loop header
LB: loop body
LE: loop exit
PB: predicated region body
PF: predicated region fallthrough
CT: control target
= control target key end

     0   :  { %s4851_s2 = inlined_call_operand.vmem [shape: bf16[128,128], index: 2, kind: input, shape index: {}]   ;;  %s4852_s0 = inlined_call_operand.vmem [shape: bf16[2048,128], index: 0, kind: input, shape index: {}]   ;;  %s4853_s1 = inlined_call_operand.vmem [shape: bf16[8,2048], index: 1, kind: input, shape index: {}]   ;;  %s4854_s3 = inlined_call_operand.vmem [shape: f32[1,128], index: 3, kind: input, shape index: {}]   ;;  %s4855_s4 = inlined_call_operand.vmem [shape: f32[8,128], index: 4, kind: output, shape index: {}]  }
   0x1   :  { %v3697_v0 = vld [vmem:[%s4851_s2] sm:$0xff]   ;;  %v3698_v1 = vld [vmem:[%s4851_s2 + $0x8] sm:$0xff]   ;;  %v3699_v2 = vld [vmem:[%s4851_s2 + $0x10] sm:$0xff]  }
   0x2   :  { %3409 = vmatprep.subr.bf16.mxu0 %v3697_v0  ;;  %3681 = vmatprep.subr.bf16.mxu1 %v3697_v0  ;;  %v3700_v3 = vld [vmem:[%s4851_s2 + $0x18] sm:$0xff]   ;;  %v3705_v4 = vld [vmem:[%s4852_s0] sm:$0xff]   ;;  %v3702_v6 = vld [vmem:[%s4851_s2 + $0x28] sm:$0xff]  }
   0x3   :  { %3410 = vmatpush3.bf16.msra.mxu0 %v3697_v0  ;;  %3689 = vmatpush3.bf16.msra.mxu1 %v3697_v0  ;;  %v3701_v5 = vld [vmem:[%s4851_s2 + $0x20] sm:$0xff]   ;;  %v3703_v7 = vld [vmem:[%s4851_s2 + $0x30] sm:$0xff]   ;;  %v3704_v8 = vld [vmem:[%s4851_s2 + $0x38] sm:$0xff]  }
   0x4   :  { %3411 = vmatprep.subr.bf16.mxu0 %v3698_v1  ;;  %3682 = vmatprep.subr.bf16.mxu1 %v3698_v1  ;;  %v3706_v9 = vld [vmem:[%s4852_s0 + $0x8] sm:$0xff]   ;;  %v3707_v10 = vld [vmem:[%s4852_s0 + $0x10] sm:$0xff]   ;;  %v3708_v11 = vld [vmem:[%s4852_s0 + $0x18] sm:$0xff]  }
   0x5   :  { %3425 = vmatprep.mubr.bf16.mxu0 %v3705_v4  ;;  %v3709_v12 = vld [vmem:[%s4852_s0 + $0x20] sm:$0xff]   ;;  %v3710_v13 = vld [vmem:[%s4852_s0 + $0x28] sm:$0xff]   ;;  %v3711_v14 = vld [vmem:[%s4852_s0 + $0x30] sm:$0xff]  }
   0x6   :  { %v3712_v15 = vld [vmem:[%s4852_s0 + $0x38] sm:$0xff]   ;;  %v3713_v16 = vld [vmem:[%s4852_s0 + $0x40] sm:$0xff]   ;;  %v3714_v17 = vld [vmem:[%s4852_s0 + $0x48] sm:$0xff]  }
   0x7   :  { %3412 = vmatpush3.bf16.msra.mxu0 %v3698_v1  ;;  %3690 = vmatpush3.bf16.msra.mxu1 %v3698_v1  ;;  %v3715_v18 = vld [vmem:[%s4852_s0 + $0x50] sm:$0xff]   ;;  %v3716_v19 = vld [vmem:[%s4852_s0 + $0x58] sm:$0xff]   ;;  %v3717_v20 = vld [vmem:[%s4852_s0 + $0x60] sm:$0xff]  }
   0x8   :  { %3413 = vmatprep.subr.bf16.mxu0 %v3699_v2  ;;  %3683 = vmatprep.subr.bf16.mxu1 %v3699_v2  ;;  %v3718_v21 = vld [vmem:[%s4852_s0 + $0x68] sm:$0xff]   ;;  %v3719_v22 = vld [vmem:[%s4852_s0 + $0x70] sm:$0xff]   ;;  %v3752_v24 = vld [vmem:[%s4852_s0 + $0x2f8] sm:$0xff]  }
   0x9   :  { %v3751_v23 = vld [vmem:[%s4852_s0 + $0x2f0] sm:$0xff]   ;;  %v3720_v25 = vld [vmem:[%s4852_s0 + $0x78] sm:$0xff]   ;;  %v3721_v26 = vld [vmem:[%s4852_s0 + $0x80] sm:$0xff]  }
   0xa   :  { %3613 = vmatprep.mubr.bf16.mxu1 %v3751_v23  ;;  %v3755_v27 = vld [vmem:[%s4852_s0 + $0x300] sm:$0xff]   ;;  %v3756_v28 = vld [vmem:[%s4852_s0 + $0x308] sm:$0xff]   ;;  %v3723_v30 = vld [vmem:[%s4852_s0 + $0x90] sm:$0xff]  }
   0xb   :  { %3414 = vmatpush3.bf16.msra.mxu0 %v3699_v2  ;;  %3691 = vmatpush3.bf16.msra.mxu1 %v3699_v2  ;;  %v3722_v29 = vld [vmem:[%s4852_s0 + $0x88] sm:$0xff]   ;;  %v3759_v31 = vld [vmem:[%s4852_s0 + $0x310] sm:$0xff]   ;;  %v3760_v32 = vld [vmem:[%s4852_s0 + $0x318] sm:$0xff]  }
   0xc   :  { %3415 = vmatprep.subr.bf16.mxu0 %v3700_v3  ;;  %3684 = vmatprep.subr.bf16.mxu1 %v3700_v3  ;;  %v3724_v33 = vld [vmem:[%s4852_s0 + $0x98] sm:$0xff]   ;;  %v3725_v34 = vld [vmem:[%s4852_s0 + $0xa0] sm:$0xff]   ;;  %v3764_v36 = vld [vmem:[%s4852_s0 + $0x328] sm:$0xff]  }
   0xd   :  { %v3763_v35 = vld [vmem:[%s4852_s0 + $0x320] sm:$0xff]   ;;  %v3726_v37 = vld [vmem:[%s4852_s0 + $0xa8] sm:$0xff]   ;;  %v3727_v38 = vld [vmem:[%s4852_s0 + $0xb0] sm:$0xff]  }
   0xe   :  { %v3767_v39 = vld [vmem:[%s4852_s0 + $0x330] sm:$0xff]   ;;  %v3728_v40 = vld [vmem:[%s4852_s0 + $0xb8] sm:$0xff]   ;;  %v3729_v42 = vld [vmem:[%s4852_s0 + $0xc0] sm:$0xff]  }
   0xf   :  { %3416 = vmatpush3.bf16.msra.mxu0 %v3700_v3  ;;  %3692 = vmatpush3.bf16.msra.mxu1 %v3700_v3  ;;  %v3768_v41 = vld [vmem:[%s4852_s0 + $0x338] sm:$0xff]   ;;  %v3771_v43 = vld [vmem:[%s4852_s0 + $0x340] sm:$0xff]   ;;  %v3730_v44 = vld [vmem:[%s4852_s0 + $0xc8] sm:$0xff]  }
  0x10   :  { %3417 = vmatprep.subr.bf16.mxu0 %v3701_v5  ;;  %3685 = vmatprep.subr.bf16.mxu1 %v3701_v5  ;;  %v3772_v45 = vld [vmem:[%s4852_s0 + $0x348] sm:$0xff]   ;;  %v3731_v46 = vld [vmem:[%s4852_s0 + $0xd0] sm:$0xff]   ;;  %v3732_v48 = vld [vmem:[%s4852_s0 + $0xd8] sm:$0xff]  }
  0x11   :  { %v3775_v47 = vld [vmem:[%s4852_s0 + $0x350] sm:$0xff]   ;;  %v3776_v49 = vld [vmem:[%s4852_s0 + $0x358] sm:$0xff]   ;;  %v3733_v50 = vld [vmem:[%s4852_s0 + $0xe0] sm:$0xff]  }
  0x12   :  { %v3779_v51 = vld [vmem:[%s4852_s0 + $0x360] sm:$0xff]   ;;  %v3734_v52 = vld [vmem:[%s4852_s0 + $0xe8] sm:$0xff]   ;;  %v3735_v54 = vld [vmem:[%s4852_s0 + $0xf0] sm:$0xff]  }
  0x13   :  { %3418 = vmatpush3.bf16.msra.mxu0 %v3701_v5  ;;  %3693 = vmatpush3.bf16.msra.mxu1 %v3701_v5  ;;  %v3780_v53 = vld [vmem:[%s4852_s0 + $0x368] sm:$0xff]   ;;  %v3783_v55 = vld [vmem:[%s4852_s0 + $0x370] sm:$0xff]   ;;  %v3736_v56 = vld [vmem:[%s4852_s0 + $0xf8] sm:$0xff]  }
  0x14   :  { %3419 = vmatprep.subr.bf16.mxu0 %v3702_v6  ;;  %3686 = vmatprep.subr.bf16.mxu1 %v3702_v6  ;;  %v3784_v57 = vld [vmem:[%s4852_s0 + $0x378] sm:$0xff]   ;;  %v3737_v58 = vld [vmem:[%s4852_s0 + $0x100] sm:$0xff]   ;;  %v3738_v60 = vld [vmem:[%s4852_s0 + $0x108] sm:$0xff]  }
  0x15   :  { %v3787_v59 = vld [vmem:[%s4852_s0 + $0x380] sm:$0xff]   ;;  %v3788_v61 = vld [vmem:[%s4852_s0 + $0x388] sm:$0xff]   ;;  %v3739_v62 = vld [vmem:[%s4852_s0 + $0x110] sm:$0xff]  }
  0x16   :  { %v3791_v63 = vld [vmem:[%s4852_s0 + $0x390] sm:$0xff]   ;;  %v3740_v0 = vld [vmem:[%s4852_s0 + $0x118] sm:$0xff]   ;;  %v3741_v2 = vld [vmem:[%s4852_s0 + $0x120] sm:$0xff]  }
  0x17   :  { %3420 = vmatpush3.bf16.msra.mxu0 %v3702_v6  ;;  %3694 = vmatpush3.bf16.msra.mxu1 %v3702_v6  ;;  %v3792_v1 = vld [vmem:[%s4852_s0 + $0x398] sm:$0xff]   ;;  %v3795_v3 = vld [vmem:[%s4852_s0 + $0x3a0] sm:$0xff]   ;;  %v3742_v4 = vld [vmem:[%s4852_s0 + $0x128] sm:$0xff]  }
  0x18   :  { %3421 = vmatprep.subr.bf16.mxu0 %v3703_v7  ;;  %3687 = vmatprep.subr.bf16.mxu1 %v3703_v7  ;;  %v3796_v5 = vld [vmem:[%s4852_s0 + $0x3a8] sm:$0xff]   ;;  %v3743_v6 = vld [vmem:[%s4852_s0 + $0x130] sm:$0xff]  }
  0x19   :  { %v3815_v23 = vld [vmem:[%s4852_s0 + $0x3f0] sm:$0xff]  }
  0x1b   :  { %3422 = vmatpush3.bf16.msra.mxu0 %v3703_v7  ;;  %3695 = vmatpush3.bf16.msra.mxu1 %v3703_v7  ;;  %v3799_v7 = vld [vmem:[%s4852_s0 + $0x3b0] sm:$0xff]  }
  0x1c   :  { %3423 = vmatprep.subr.bf16.mxu0 %v3704_v8  ;;  %3688 = vmatprep.subr.bf16.mxu1 %v3704_v8 }
  0x1f   :  { %3424 = vmatpush3.bf16.msra.mxu0 %v3704_v8  ;;  %3696 = vmatpush3.bf16.msra.mxu1 %v3704_v8  ;;  %v3744_v8 = vld [vmem:[%s4852_s0 + $0x138] sm:$0xff]  }
  0x22   :  { %3426 = vmatmul.mubr.bf16.vlgmr.msra.gmra.mrb[0].mxu0 %v3706_v9  ;;  %3614 = vmatmul.mubr.bf16.vlgmr.msra.gmra.mrb[0].mxu1 %v3752_v24  ;;  %v3800_v9 = vld [vmem:[%s4852_s0 + $0x3b8] sm:$0xff]  }
  0x23   :  { %3429 = vmatprep.mubr.bf16.mxu0 %v3707_v10  ;;  %3617 = vmatprep.mubr.bf16.mxu1 %v3755_v27  ;;  %v3745_v10 = vld [vmem:[%s4852_s0 + $0x140] sm:$0xff]   ;;  %v3754_v24 = vld [vmem:[%s4852_s0 + $0x178] sm:$0xff]  }
  0x24   :  { %v4152_v27 = vld [vmem:[%s4853_s1] sm:$0xff] }
  0x2a   :  { %3430 = vmatmul.mubr.bf16.gmra.mrb[4].mxu0 %v3708_v11  ;;  %3618 = vmatmul.mubr.bf16.gmra.mrb[4].mxu1 %v3756_v28  ;;  %v3803_v11 = vld [vmem:[%s4852_s0 + $0x3c0] sm:$0xff]   ;;  %v3082_v28 = vcombine.high %v4152_v27, %v4152_v27 }
  0x2b   :  { %3433 = vmatprep.mubr.bf16.mxu0 %v3709_v12  ;;  %3621 = vmatprep.mubr.bf16.mxu1 %v3759_v31  ;;  %v3746_v12 = vld [vmem:[%s4852_s0 + $0x148] sm:$0xff]   ;;  %v3762_v31 = vld [vmem:[%s4852_s0 + $0x198] sm:$0xff]  }
  0x32   :  { %3434 = vmatmul.mubr.bf16.gmra.mrb[8].mxu0 %v3710_v13  ;;  %3622 = vmatmul.mubr.bf16.gmra.mrb[8].mxu1 %v3760_v32  ;;  %v3804_v13 = vld [vmem:[%s4852_s0 + $0x3c8] sm:$0xff]   ;;  %v3765_v32 = vld [vmem:[%s4852_s0 + $0x1a0] sm:$0xff]  }
  0x33   :  { %3437 = vmatprep.mubr.bf16.mxu0 %v3711_v14  ;;  %3625 = vmatprep.mubr.bf16.mxu1 %v3763_v35  ;;  %v3747_v14 = vld [vmem:[%s4852_s0 + $0x150] sm:$0xff]   ;;  %v4177_v35 = vld [vmem:[%s4854_s3] ss:$0 sm:$0xff] }
  0x3a   :  { %3438 = vmatmul.mubr.bf16.gmra.mrb[12].mxu0 %v3712_v15  ;;  %3626 = vmatmul.mubr.bf16.gmra.mrb[12].mxu1 %v3764_v36  ;;  %v3807_v15 = vld [vmem:[%s4852_s0 + $0x3d0] sm:$0xff]  }
  0x3b   :  { %3441 = vmatprep.mubr.bf16.mxu0 %v3713_v16  ;;  %3629 = vmatprep.mubr.bf16.mxu1 %v3767_v39  ;;  %v3748_v16 = vld [vmem:[%s4852_s0 + $0x158] sm:$0xff]  }
  0x3c   :  { %v3770_v39 = vld [vmem:[%s4852_s0 + $0x1b8] sm:$0xff]  }
  0x42   :  { %3442 = vmatmul.mubr.bf16.gmra.mrb[16].mxu0 %v3714_v17  ;;  %3630 = vmatmul.mubr.bf16.gmra.mrb[16].mxu1 %v3768_v41  ;;  %v3808_v17 = vld [vmem:[%s4852_s0 + $0x3d8] sm:$0xff]  }
  0x43   :  { %3445 = vmatprep.mubr.bf16.mxu0 %v3715_v18  ;;  %3633 = vmatprep.mubr.bf16.mxu1 %v3771_v43  ;;  %v3749_v18 = vld [vmem:[%s4852_s0 + $0x160] sm:$0xff]  }
  0x4a   :  { %3446 = vmatmul.mubr.bf16.gmra.mrb[20].mxu0 %v3716_v19  ;;  %3634 = vmatmul.mubr.bf16.gmra.mrb[20].mxu1 %v3772_v45  ;;  %v3811_v19 = vld [vmem:[%s4852_s0 + $0x3e0] sm:$0xff]  }
  0x4b   :  { %3449 = vmatprep.mubr.bf16.mxu0 %v3717_v20  ;;  %3637 = vmatprep.mubr.bf16.mxu1 %v3775_v47  ;;  %v3750_v20 = vld [vmem:[%s4852_s0 + $0x168] sm:$0xff]  }
  0x52   :  { %3450 = vmatmul.mubr.bf16.gmra.mrb[24].mxu0 %v3718_v21  ;;  %3638 = vmatmul.mubr.bf16.gmra.mrb[24].mxu1 %v3776_v49  ;;  %v3812_v21 = vld [vmem:[%s4852_s0 + $0x3e8] sm:$0xff]  }
  0x53   :  { %3453 = vmatprep.mubr.bf16.mxu0 %v3719_v22  ;;  %3641 = vmatprep.mubr.bf16.mxu1 %v3779_v51  ;;  %v3753_v22 = vld [vmem:[%s4852_s0 + $0x170] sm:$0xff]  }
  0x5a   :  { %3454 = vmatmul.mubr.bf16.gmra.mrb[28].mxu0 %v3720_v25  ;;  %3642 = vmatmul.mubr.bf16.gmra.mrb[28].mxu1 %v3780_v53  ;;  %v3816_v25 = vld [vmem:[%s4852_s0 + $0x3f8] sm:$0xff]  }
  0x5b   :  { %3457 = vmatprep.mubr.bf16.mxu0 %v3721_v26  ;;  %3645 = vmatprep.mubr.bf16.mxu1 %v3783_v55  ;;  %v3757_v26 = vld [vmem:[%s4852_s0 + $0x180] sm:$0xff]   ;;  %v3774_v55 = vld [vmem:[%s4852_s0 + $0x1c8] sm:$0xff]  }
  0x62   :  { %3458 = vmatmul.mubr.bf16.gmra.mrb[32].mxu0 %v3722_v29  ;;  %3646 = vmatmul.mubr.bf16.gmra.mrb[32].mxu1 %v3784_v57  ;;  %v3758_v29 = vld [vmem:[%s4852_s0 + $0x188] sm:$0xff]  }
  0x63   :  { %3461 = vmatprep.mubr.bf16.mxu0 %v3723_v30  ;;  %3649 = vmatprep.mubr.bf16.mxu1 %v3787_v59  ;;  %v3761_v30 = vld [vmem:[%s4852_s0 + $0x190] sm:$0xff]  }
  0x6a   :  { %3462 = vmatmul.mubr.bf16.gmra.mrb[36].mxu0 %v3724_v33  ;;  %3650 = vmatmul.mubr.bf16.gmra.mrb[36].mxu1 %v3788_v61  ;;  %v3766_v33 = vld [vmem:[%s4852_s0 + $0x1a8] sm:$0xff]  }
  0x6b   :  { %3465 = vmatprep.mubr.bf16.mxu0 %v3725_v34  ;;  %3653 = vmatprep.mubr.bf16.mxu1 %v3791_v63  ;;  %v3769_v34 = vld [vmem:[%s4852_s0 + $0x1b0] sm:$0xff]  }
  0x72   :  { %3466 = vmatmul.mubr.bf16.gmra.mrb[40].mxu0 %v3726_v37  ;;  %3654 = vmatmul.mubr.bf16.gmra.mrb[40].mxu1 %v3792_v1 }
  0x73   :  { %3469 = vmatprep.mubr.bf16.mxu0 %v3727_v38  ;;  %3657 = vmatprep.mubr.bf16.mxu1 %v3795_v3 }
  0x7a   :  { %3470 = vmatmul.mubr.bf16.gmra.mrb[44].mxu0 %v3728_v40  ;;  %3658 = vmatmul.mubr.bf16.gmra.mrb[44].mxu1 %v3796_v5 }
  0x7b   :  { %3473 = vmatprep.mubr.bf16.mxu0 %v3729_v42  ;;  %3661 = vmatprep.mubr.bf16.mxu1 %v3799_v7  ;;  %v3773_v42 = vld [vmem:[%s4852_s0 + $0x1c0] sm:$0xff]   ;;  %v3778_v7 = vld [vmem:[%s4852_s0 + $0x1d8] sm:$0xff]  }
  0x82   :  { %3474 = vmatmul.mubr.bf16.gmra.mrb[48].mxu0 %v3730_v44  ;;  %3662 = vmatmul.mubr.bf16.gmra.mrb[48].mxu1 %v3800_v9 }
  0x83   :  { %3477 = vmatprep.mubr.bf16.mxu0 %v3731_v46  ;;  %3665 = vmatprep.mubr.bf16.mxu1 %v3803_v11 }
  0x8a   :  { %3478 = vmatmul.mubr.bf16.gmra.mrb[52].mxu0 %v3732_v48  ;;  %3666 = vmatmul.mubr.bf16.gmra.mrb[52].mxu1 %v3804_v13 }
  0x8b   :  { %3481 = vmatprep.mubr.bf16.mxu0 %v3733_v50  ;;  %3669 = vmatprep.mubr.bf16.mxu1 %v3807_v15 }
  0x92   :  { %3482 = vmatmul.mubr.bf16.gmra.mrb[56].mxu0 %v3734_v52  ;;  %3670 = vmatmul.mubr.bf16.gmra.mrb[56].mxu1 %v3808_v17 }
  0x93   :  { %3485 = vmatprep.mubr.bf16.mxu0 %v3735_v54  ;;  %3673 = vmatprep.mubr.bf16.mxu1 %v3811_v19 }
  0x9a   :  { %3486 = vmatmul.mubr.bf16.gmra.mrb[60].mxu0 %v3736_v56  ;;  %3674 = vmatmul.mubr.bf16.gmra.mrb[60].mxu1 %v3812_v21 }
  0x9b   :  { %3489 = vmatprep.mubr.bf16.mxu0 %v3737_v58  ;;  %3677 = vmatprep.mubr.bf16.mxu1 %v3815_v23  ;;  %v3777_v58 = vld [vmem:[%s4852_s0 + $0x1d0] sm:$0xff]   ;;  %v3782_v23 = vld [vmem:[%s4852_s0 + $0x1e8] sm:$0xff]  }
  0xa2   :  { %3490 = vmatmul.mubr.bf16.gmra.mrb[64].mxu0 %v3738_v60  ;;  %3678 = vmatmul.mubr.bf16.gmra.mrb[64].mxu1 %v3816_v25 }
  0xa3   :  { %3493 = vmatprep.mubr.bf16.mxu0 %v3739_v62  ;;  %2650 = vmatprep.mubr.bf16.mxu1 %v3082_v28 }
  0xaa   :  { %3494 = vmatmul.mubr.bf16.gmra.mrb[68].mxu0 %v3740_v0 }
  0xab   :  { %3497 = vmatprep.mubr.bf16.mxu0 %v3741_v2 }
  0xb2   :  { %3498 = vmatmul.mubr.bf16.gmra.mrb[72].mxu0 %v3742_v4 }
  0xb3   :  { %3501 = vmatprep.mubr.bf16.mxu0 %v3743_v6 }
  0xba   :  { %3502 = vmatmul.mubr.bf16.gmra.mrb[76].mxu0 %v3744_v8 }
  0xbb   :  { %3505 = vmatprep.mubr.bf16.mxu0 %v3745_v10  ;;  %v3781_v10 = vld [vmem:[%s4852_s0 + $0x1e0] sm:$0xff]  }
  0xc2   :  { %3506 = vmatmul.mubr.bf16.gmra.mrb[80].mxu0 %v3746_v12 }
  0xc3   :  { %3509 = vmatprep.mubr.bf16.mxu0 %v3747_v14 }
  0xca   :  { %3510 = vmatmul.mubr.bf16.gmra.mrb[84].mxu0 %v3748_v16 }
  0xcb   :  { %3513 = vmatprep.mubr.bf16.mxu0 %v3749_v18 }
  0xd2   :  { %3514 = vmatmul.mubr.bf16.gmra.mrb[88].mxu0 %v3750_v20 }
  0xd3   :  { %3517 = vmatprep.mubr.bf16.mxu0 %v3753_v22 }
  0xda   :  { %3518 = vmatmul.mubr.bf16.gmra.mrb[92].mxu0 %v3754_v24 }
  0xdb   :  { %3521 = vmatprep.mubr.bf16.mxu0 %v3757_v26  ;;  %v3785_v26 = vld [vmem:[%s4852_s0 + $0x1f0] sm:$0xff]  }
  0xe2   :  { %3522 = vmatmul.mubr.bf16.gmra.mrb[96].mxu0 %v3758_v29 }
  0xe3   :  { %3525 = vmatprep.mubr.bf16.mxu0 %v3761_v30 }
  0xea   :  { %3526 = vmatmul.mubr.bf16.gmra.mrb[100].mxu0 %v3762_v31 }
  0xeb   :  { %3529 = vmatprep.mubr.bf16.mxu0 %v3765_v32 }
  0xf2   :  { %3530 = vmatmul.mubr.bf16.gmra.mrb[104].mxu0 %v3766_v33 }
  0xf3   :  { %3533 = vmatprep.mubr.bf16.mxu0 %v3769_v34 }
  0xf5   :  { %v3427_v36 = vpop.f32.mrb[0].mxu0 }
  0xf6   :  { %v1156_v37 = vadd.f32 %v3427_v36, %v4177_v35  ;;  %v1147_v38 = vpop.f32.mrb[1].mxu0 }
  0xf7   :  { %v1148_v40 = vadd.f32 %v4177_v35, %v1147_v38  ;;  %v3428_v41 = vpop.f32.mrb[2].mxu0 }
  0xf8   :  { %v1159_v43 = vadd.f32 %v3428_v41, %v4177_v35  ;;  %v1150_v44 = vpop.f32.mrb[3].mxu0  ;;  %v2172_v46 = vmax.f32 %v1156_v37, 0.0  ;;  %v3786_v41 = vld [vmem:[%s4852_s0 + $0x1f8] sm:$0xff]  }
  0xf9   :  { %v1151_v45 = vadd.f32 %v4177_v35, %v1150_v44  ;;  %v2170_v48 = vmax.f32 %v1148_v40, 0.0  ;;  %v3789_v44 = vld [vmem:[%s4852_s0 + $0x200] sm:$0xff]  }
  0xfa   :  { %v2173_v47 = vmax.f32 %v1159_v43, 0.0  ;;  %3534 = vmatmul.mubr.bf16.gmra.mrb[108].mxu0 %v3770_v39 }
  0xfb   :  { %v2171_v49 = vmax.f32 %v1151_v45, 0.0  ;;  %3537 = vmatprep.mubr.bf16.mxu0 %v3773_v42 }
  0xfc   :  { %v4189_v50 = vpack.c.bf16 %v2173_v47, %v2172_v46 }
  0xfd   :  { %v4191_v51 = vpack.c.bf16 %v2171_v49, %v2170_v48  ;;  %v3431_v52 = vpop.f32.mrb[4].mxu0 }
  0xfe   :  { %v1172_v53 = vadd.f32 %v3431_v52, %v4177_v35  ;;  %v1163_v54 = vpop.f32.mrb[5].mxu0 }
  0xff   :  { %v1164_v56 = vadd.f32 %v4177_v35, %v1163_v54  ;;  %v3432_v57 = vpop.f32.mrb[6].mxu0 }
 0x100   :  { %v1175_v59 = vadd.f32 %v3432_v57, %v4177_v35  ;;  %v1166_v60 = vpop.f32.mrb[7].mxu0  ;;  %v2176_v62 = vmax.f32 %v1172_v53, 0.0 }
 0x101   :  { %v1167_v61 = vadd.f32 %v4177_v35, %v1166_v60  ;;  %v2174_v0 = vmax.f32 %v1164_v56, 0.0 }
 0x102   :  { %v2177_v63 = vmax.f32 %v1175_v59, 0.0  ;;  %3538 = vmatmul.mubr.bf16.gmra.mrb[112].mxu0 %v3774_v55  ;;  %v3790_v59 = vld [vmem:[%s4852_s0 + $0x208] sm:$0xff]  }
 0x103   :  { %v2175_v1 = vmax.f32 %v1167_v61, 0.0  ;;  %3541 = vmatprep.mubr.bf16.mxu0 %v3777_v58 }
 0x104   :  { %v4203_v2 = vpack.c.bf16 %v2177_v63, %v2176_v62  ;;  %v3793_v62 = vld [vmem:[%s4852_s0 + $0x210] sm:$0xff]  }
 0x105   :  { %v4205_v3 = vpack.c.bf16 %v2175_v1, %v2174_v0  ;;  %v3435_v4 = vpop.f32.mrb[8].mxu0 }
 0x106   :  { %v1188_v5 = vadd.f32 %v3435_v4, %v4177_v35  ;;  %v1179_v6 = vpop.f32.mrb[9].mxu0 }
 0x107   :  { %v1180_v8 = vadd.f32 %v4177_v35, %v1179_v6  ;;  %v3436_v9 = vpop.f32.mrb[10].mxu0 }
 0x108   :  { %v1191_v11 = vadd.f32 %v3436_v9, %v4177_v35  ;;  %v1182_v12 = vpop.f32.mrb[11].mxu0  ;;  %v2180_v14 = vmax.f32 %v1188_v5, 0.0 }
 0x109   :  { %v1183_v13 = vadd.f32 %v4177_v35, %v1182_v12  ;;  %v2178_v16 = vmax.f32 %v1180_v8, 0.0 }
 0x10a   :  { %v2181_v15 = vmax.f32 %v1191_v11, 0.0  ;;  %3542 = vmatmul.mubr.bf16.gmra.mrb[116].mxu0 %v3778_v7 }
 0x10b   :  { %v2179_v17 = vmax.f32 %v1183_v13, 0.0  ;;  %3545 = vmatprep.mubr.bf16.mxu0 %v3781_v10 }
 0x10c   :  { %v4217_v18 = vpack.c.bf16 %v2181_v15, %v2180_v14  ;;  %v3797_v15 = vld [vmem:[%s4852_s0 + $0x220] sm:$0xff]  }
 0x10d   :  { %v4219_v19 = vpack.c.bf16 %v2179_v17, %v2178_v16  ;;  %v3439_v20 = vpop.f32.mrb[12].mxu0 }
 0x10e   :  { %v1204_v21 = vadd.f32 %v3439_v20, %v4177_v35  ;;  %v1195_v22 = vpop.f32.mrb[13].mxu0 }
 0x10f   :  { %v1196_v24 = vadd.f32 %v4177_v35, %v1195_v22  ;;  %v3440_v25 = vpop.f32.mrb[14].mxu0 }
 0x110   :  { %v1207_v28 = vadd.f32 %v3440_v25, %v4177_v35  ;;  %v1198_v29 = vpop.f32.mrb[15].mxu0  ;;  %v2184_v31 = vmax.f32 %v1204_v21, 0.0 }
 0x111   :  { %v1199_v30 = vadd.f32 %v4177_v35, %v1198_v29  ;;  %v2182_v33 = vmax.f32 %v1196_v24, 0.0 }
 0x112   :  { %v2185_v32 = vmax.f32 %v1207_v28, 0.0  ;;  %3546 = vmatmul.mubr.bf16.gmra.mrb[120].mxu0 %v3782_v23 }
 0x113   :  { %v2183_v34 = vmax.f32 %v1199_v30, 0.0  ;;  %3549 = vmatprep.mubr.bf16.mxu0 %v3785_v26 }
 0x114   :  { %v4231_v36 = vpack.c.bf16 %v2185_v32, %v2184_v31  ;;  %v3801_v32 = vld [vmem:[%s4852_s0 + $0x230] sm:$0xff]  }
 0x115   :  { %v4233_v37 = vpack.c.bf16 %v2183_v34, %v2182_v33  ;;  %v3443_v38 = vpop.f32.mrb[16].mxu0 }
 0x116   :  { %v1220_v39 = vadd.f32 %v3443_v38, %v4177_v35  ;;  %v1211_v40 = vpop.f32.mrb[17].mxu0 }
 0x117   :  { %v1212_v42 = vadd.f32 %v4177_v35, %v1211_v40  ;;  %v3444_v43 = vpop.f32.mrb[18].mxu0 }
 0x118   :  { %v1223_v45 = vadd.f32 %v3444_v43, %v4177_v35  ;;  %v1214_v46 = vpop.f32.mrb[19].mxu0  ;;  %v2188_v48 = vmax.f32 %v1220_v39, 0.0 }
 0x119   :  { %v1215_v47 = vadd.f32 %v4177_v35, %v1214_v46  ;;  %v2186_v52 = vmax.f32 %v1212_v42, 0.0 }
 0x11a   :  { %v2189_v49 = vmax.f32 %v1223_v45, 0.0  ;;  %3550 = vmatmul.mubr.bf16.gmra.mrb[124].mxu0 %v3786_v41 }
 0x11b   :  { %v2187_v53 = vmax.f32 %v1215_v47, 0.0  ;;  %3553 = vmatprep.mubr.bf16.mxu0 %v3789_v44 }
 0x11c   :  { %v2443_v54 = vpack.c.bf16 %v2189_v49, %v2188_v48  ;;  %v3805_v49 = vld [vmem:[%s4852_s0 + $0x240] sm:$0xff]  }
 0x11d   :  { %v2442_v55 = vpack.c.bf16 %v2187_v53, %v2186_v52  ;;  %v3447_v56 = vpop.f32.mrb[20].mxu0 }
 0x11e   :  { %v1236_v57 = vadd.f32 %v3447_v56, %v4177_v35  ;;  %v1227_v58 = vpop.f32.mrb[21].mxu0 }
 0x11f   :  { %v1228_v60 = vadd.f32 %v4177_v35, %v1227_v58  ;;  %v3448_v61 = vpop.f32.mrb[22].mxu0  ;;  %3233 = vmatprep.subr.bf16.mxu1 %v2442_v55 }
 0x120   :  { %v1239_v63 = vadd.f32 %v3448_v61, %v4177_v35  ;;  %v1230_v0 = vpop.f32.mrb[23].mxu0  ;;  %3234 = vmatpush3.bf16.msra.mxu1 %v4191_v51  ;;  %v2192_v4 = vmax.f32 %v1236_v57, 0.0  ;;  %v3794_v51 = vld [vmem:[%s4852_s0 + $0x218] sm:$0xff]  }
 0x121   :  { %v1231_v1 = vadd.f32 %v4177_v35, %v1230_v0  ;;  %3235 = vmatprep.subr.bf16.mxu1 %v2443_v54  ;;  %v2190_v6 = vmax.f32 %v1228_v60, 0.0  ;;  %v4295_v54 = vld [vmem:[%s4853_s1 + $0x8] sm:$0xff] }
 0x122   :  { %v2193_v5 = vmax.f32 %v1239_v63, 0.0  ;;  %3554 = vmatmul.mubr.bf16.gmra.mrb[128].mxu0 %v3790_v59  ;;  %v3081_v59 = vcombine.low %v4152_v27, %v4152_v27 }
 0x123   :  { %v2191_v7 = vmax.f32 %v1231_v1, 0.0  ;;  %3557 = vmatprep.mubr.bf16.mxu0 %v3793_v62  ;;  %v3806_v1 = vld [vmem:[%s4852_s0 + $0x248] sm:$0xff]  }
 0x124   :  { %v2445_v8 = vpack.c.bf16 %v2193_v5, %v2192_v4  ;;  %3236 = vmatpush3.bf16.msra.mxu1 %v4189_v50 }
 0x125   :  { %v2444_v9 = vpack.c.bf16 %v2191_v7, %v2190_v6  ;;  %v3451_v10 = vpop.f32.mrb[24].mxu0 }
 0x126   :  { %v1252_v11 = vadd.f32 %v3451_v10, %v4177_v35  ;;  %v1243_v12 = vpop.f32.mrb[25].mxu0 }
 0x127   :  { %v1244_v13 = vadd.f32 %v4177_v35, %v1243_v12  ;;  %v3452_v14 = vpop.f32.mrb[26].mxu0  ;;  %3237 = vmatprep.subr.bf16.mxu1 %v2444_v9 }
 0x128   :  { %v1255_v16 = vadd.f32 %v3452_v14, %v4177_v35  ;;  %v1246_v50 = vpop.f32.mrb[27].mxu0  ;;  %3238 = vmatpush3.bf16.msra.mxu1 %v4205_v3  ;;  %v2196_v20 = vmax.f32 %v1252_v11, 0.0  ;;  %v3798_v3 = vld [vmem:[%s4852_s0 + $0x228] sm:$0xff]  }
 0x129   :  { %v1247_v17 = vadd.f32 %v4177_v35, %v1246_v50  ;;  %3239 = vmatprep.subr.bf16.mxu1 %v2445_v8  ;;  %v2194_v22 = vmax.f32 %v1244_v13, 0.0 }
 0x12a   :  { %v2197_v21 = vmax.f32 %v1255_v16, 0.0  ;;  %3558 = vmatmul.mubr.bf16.gmra.mrb[132].mxu0 %v3794_v51  ;;  %v3810_v16 = vld [vmem:[%s4852_s0 + $0x258] sm:$0xff]  }
 0x12b   :  { %v2195_v23 = vmax.f32 %v1247_v17, 0.0  ;;  %3561 = vmatprep.mubr.bf16.mxu0 %v3797_v15 }
 0x12c   :  { %v2447_v24 = vpack.c.bf16 %v2197_v21, %v2196_v20  ;;  %3240 = vmatpush3.bf16.msra.mxu1 %v4203_v2  ;;  %v3813_v20 = vld [vmem:[%s4852_s0 + $0x260] sm:$0xff]  }
 0x12d   :  { %v2446_v25 = vpack.c.bf16 %v2195_v23, %v2194_v22  ;;  %v3455_v26 = vpop.f32.mrb[28].mxu0 }
 0x12e   :  { %v1268_v28 = vadd.f32 %v3455_v26, %v4177_v35  ;;  %v1259_v29 = vpop.f32.mrb[29].mxu0 }
 0x12f   :  { %v1260_v30 = vadd.f32 %v4177_v35, %v1259_v29  ;;  %v3456_v31 = vpop.f32.mrb[30].mxu0  ;;  %3241 = vmatprep.subr.bf16.mxu1 %v2446_v25 }
 0x130   :  { %v1271_v33 = vadd.f32 %v3456_v31, %v4177_v35  ;;  %v1262_v2 = vpop.f32.mrb[31].mxu0  ;;  %3242 = vmatpush3.bf16.msra.mxu1 %v4219_v19  ;;  %v2200_v38 = vmax.f32 %v1268_v28, 0.0  ;;  %v3802_v19 = vld [vmem:[%s4852_s0 + $0x238] sm:$0xff]  }
 0x131   :  { %v1263_v34 = vadd.f32 %v4177_v35, %v1262_v2  ;;  %3243 = vmatprep.subr.bf16.mxu1 %v2447_v24  ;;  %v2198_v40 = vmax.f32 %v1260_v30, 0.0 }
 0x132   :  { %v2201_v39 = vmax.f32 %v1271_v33, 0.0  ;;  %3562 = vmatmul.mubr.bf16.gmra.mrb[136].mxu0 %v3798_v3  ;;  %v3814_v33 = vld [vmem:[%s4852_s0 + $0x268] sm:$0xff]  }
 0x133   :  { %v2199_v41 = vmax.f32 %v1263_v34, 0.0  ;;  %3565 = vmatprep.mubr.bf16.mxu0 %v3801_v32 }
 0x134   :  { %v2449_v42 = vpack.c.bf16 %v2201_v39, %v2200_v38  ;;  %3244 = vmatpush3.bf16.msra.mxu1 %v4217_v18  ;;  %v3817_v38 = vld [vmem:[%s4852_s0 + $0x270] sm:$0xff]  }
 0x135   :  { %v2448_v43 = vpack.c.bf16 %v2199_v41, %v2198_v40  ;;  %v3459_v44 = vpop.f32.mrb[32].mxu0 }
 0x136   :  { %v1284_v45 = vadd.f32 %v3459_v44, %v4177_v35  ;;  %v1275_v46 = vpop.f32.mrb[33].mxu0 }
 0x137   :  { %v1276_v47 = vadd.f32 %v4177_v35, %v1275_v46  ;;  %v3460_v48 = vpop.f32.mrb[34].mxu0  ;;  %3245 = vmatprep.subr.bf16.mxu1 %v2448_v43 }
 0x138   :  { %v1287_v52 = vadd.f32 %v3460_v48, %v4177_v35  ;;  %v1278_v18 = vpop.f32.mrb[35].mxu0  ;;  %3246 = vmatpush3.bf16.msra.mxu1 %v4233_v37  ;;  %v2204_v55 = vmax.f32 %v1284_v45, 0.0  ;;  %v3084_v37 = vcombine.high %v4295_v54, %v4295_v54 }
 0x139   :  { %v1279_v53 = vadd.f32 %v4177_v35, %v1278_v18  ;;  %3247 = vmatprep.subr.bf16.mxu1 %v2449_v42  ;;  %v2202_v57 = vmax.f32 %v1276_v47, 0.0 }
 0x13a   :  { %v2205_v56 = vmax.f32 %v1287_v52, 0.0  ;;  %3566 = vmatmul.mubr.bf16.gmra.mrb[140].mxu0 %v3802_v19  ;;  %v3818_v52 = vld [vmem:[%s4852_s0 + $0x278] sm:$0xff]  }
 0x13b   :  { %v2203_v58 = vmax.f32 %v1279_v53, 0.0  ;;  %3569 = vmatprep.mubr.bf16.mxu0 %v3805_v49 }
 0x13c   :  { %v4299_v60 = vpack.c.bf16 %v2205_v56, %v2204_v55  ;;  %3248 = vmatpush3.bf16.msra.mxu1 %v4231_v36  ;;  %v3809_v36 = vld [vmem:[%s4852_s0 + $0x250] sm:$0xff]   ;;  %v3821_v55 = vld [vmem:[%s4852_s0 + $0x280] sm:$0xff]  }
 0x13d   :  { %v4304_v61 = vpack.c.bf16 %v2203_v58, %v2202_v57  ;;  %v3463_v62 = vpop.f32.mrb[36].mxu0 }
 0x13e   :  { %v1300_v63 = vadd.f32 %v3463_v62, %v4177_v35  ;;  %v1291_v0 = vpop.f32.mrb[37].mxu0 }
 0x13f   :  { %v1292_v4 = vadd.f32 %v4177_v35, %v1291_v0  ;;  %v3464_v27 = vpop.f32.mrb[38].mxu0  ;;  %2651 = vmatmul.mubr.bf16.vlgmr.msra.gmra.mrb[68].mxu1 %v3081_v59 }
 0x140   :  { %v1303_v5 = vadd.f32 %v3464_v27, %v4177_v35  ;;  %v1294_v6 = vpop.f32.mrb[39].mxu0  ;;  %2690 = vmatprep.mubr.bf16.mxu1 %v3084_v37  ;;  %v2208_v8 = vmax.f32 %v1300_v63, 0.0 }
 0x141   :  { %v1295_v7 = vadd.f32 %v4177_v35, %v1294_v6  ;;  %v2206_v10 = vmax.f32 %v1292_v4, 0.0 }
 0x142   :  { %v2209_v9 = vmax.f32 %v1303_v5, 0.0  ;;  %3570 = vmatmul.mubr.bf16.gmra.mrb[144].mxu0 %v3806_v1  ;;  %v3822_v5 = vld [vmem:[%s4852_s0 + $0x288] sm:$0xff]  }
 0x143   :  { %v2207_v11 = vmax.f32 %v1295_v7, 0.0  ;;  %3573 = vmatprep.mubr.bf16.mxu0 %v3809_v36 }
 0x144   :  { %v4316_v12 = vpack.c.bf16 %v2209_v9, %v2208_v8  ;;  %v3823_v8 = vld [vmem:[%s4852_s0 + $0x290] sm:$0xff]  }
 0x145   :  { %v4318_v51 = vpack.c.bf16 %v2207_v11, %v2206_v10  ;;  %v3467_v13 = vpop.f32.mrb[40].mxu0 }
 0x146   :  { %v1316_v14 = vadd.f32 %v3467_v13, %v4177_v35  ;;  %v1307_v15 = vpop.f32.mrb[41].mxu0 }
 0x147   :  { %v1308_v50 = vadd.f32 %v4177_v35, %v1307_v15  ;;  %v3468_v17 = vpop.f32.mrb[42].mxu0 }
 0x148   :  { %v1319_v21 = vadd.f32 %v3468_v17, %v4177_v35  ;;  %v1310_v22 = vpop.f32.mrb[43].mxu0  ;;  %v2212_v24 = vmax.f32 %v1316_v14, 0.0 }
 0x149   :  { %v1311_v23 = vadd.f32 %v4177_v35, %v1310_v22  ;;  %v2210_v26 = vmax.f32 %v1308_v50, 0.0 }
 0x14a   :  { %v2213_v25 = vmax.f32 %v1319_v21, 0.0  ;;  %3574 = vmatmul.mubr.bf16.gmra.mrb[148].mxu0 %v3810_v16 }
 0x14b   :  { %v2211_v28 = vmax.f32 %v1311_v23, 0.0  ;;  %3577 = vmatprep.mubr.bf16.mxu0 %v3813_v20 }
 0x14c   :  { %v4330_v29 = vpack.c.bf16 %v2213_v25, %v2212_v24  ;;  %v3825_v25 = vld [vmem:[%s4852_s0 + $0x2a0] sm:$0xff]  }
 0x14d   :  { %v4332_v3 = vpack.c.bf16 %v2211_v28, %v2210_v26  ;;  %v3471_v30 = vpop.f32.mrb[44].mxu0 }
 0x14e   :  { %v1332_v31 = vadd.f32 %v3471_v30, %v4177_v35  ;;  %v1323_v32 = vpop.f32.mrb[45].mxu0 }
 0x14f   :  { %v1324_v2 = vadd.f32 %v4177_v35, %v1323_v32  ;;  %v3472_v34 = vpop.f32.mrb[46].mxu0 }
 0x150   :  { %v1335_v39 = vadd.f32 %v3472_v34, %v4177_v35  ;;  %v1326_v40 = vpop.f32.mrb[47].mxu0  ;;  %v2216_v42 = vmax.f32 %v1332_v31, 0.0 }
 0x151   :  { %v1327_v41 = vadd.f32 %v4177_v35, %v1326_v40  ;;  %v2214_v44 = vmax.f32 %v1324_v2, 0.0 }
 0x152   :  { %v2217_v43 = vmax.f32 %v1335_v39, 0.0  ;;  %3578 = vmatmul.mubr.bf16.gmra.mrb[152].mxu0 %v3814_v33 }
 0x153   :  { %v2215_v45 = vmax.f32 %v1327_v41, 0.0  ;;  %3581 = vmatprep.mubr.bf16.mxu0 %v3817_v38 }
 0x154   :  { %v4344_v46 = vpack.c.bf16 %v2217_v43, %v2216_v42  ;;  %v3827_v43 = vld [vmem:[%s4852_s0 + $0x2b0] sm:$0xff]  }
 0x155   :  { %v4346_v19 = vpack.c.bf16 %v2215_v45, %v2214_v44  ;;  %v3475_v47 = vpop.f32.mrb[48].mxu0 }
 0x156   :  { %v1348_v48 = vadd.f32 %v3475_v47, %v4177_v35  ;;  %v1339_v49 = vpop.f32.mrb[49].mxu0 }
 0x157   :  { %v1340_v18 = vadd.f32 %v4177_v35, %v1339_v49  ;;  %v3476_v53 = vpop.f32.mrb[50].mxu0 }
 0x158   :  { %v1351_v56 = vadd.f32 %v3476_v53, %v4177_v35  ;;  %v1342_v57 = vpop.f32.mrb[51].mxu0  ;;  %v2220_v59 = vmax.f32 %v1348_v48, 0.0 }
 0x159   :  { %v1343_v58 = vadd.f32 %v4177_v35, %v1342_v57  ;;  %v2218_v62 = vmax.f32 %v1340_v18, 0.0 }
 0x15a   :  { %v2221_v37 = vmax.f32 %v1351_v56, 0.0  ;;  %3582 = vmatmul.mubr.bf16.gmra.mrb[156].mxu0 %v3818_v52 }
 0x15b   :  { %v2219_v63 = vmax.f32 %v1343_v58, 0.0  ;;  %3585 = vmatprep.mubr.bf16.mxu0 %v3821_v55 }
 0x15c   :  { %v2459_v0 = vpack.c.bf16 %v2221_v37, %v2220_v59  ;;  %v3829_v37 = vld [vmem:[%s4852_s0 + $0x2c0] sm:$0xff]  }
 0x15d   :  { %v2458_v1 = vpack.c.bf16 %v2219_v63, %v2218_v62  ;;  %v3479_v4 = vpop.f32.mrb[52].mxu0 }
 0x15e   :  { %v1364_v27 = vadd.f32 %v3479_v4, %v4177_v35  ;;  %v1355_v36 = vpop.f32.mrb[53].mxu0 }
 0x15f   :  { %v1356_v6 = vadd.f32 %v4177_v35, %v1355_v36  ;;  %v3480_v7 = vpop.f32.mrb[54].mxu0  ;;  %3255 = vmatprep.subr.bf16.mxu1 %v2458_v1 }
 0x160   :  { %v1367_v9 = vadd.f32 %v3480_v7, %v4177_v35  ;;  %v1358_v10 = vpop.f32.mrb[55].mxu0  ;;  %3256 = vmatpush3.bf16.msra.mxu1 %v4304_v61  ;;  %v2224_v13 = vmax.f32 %v1364_v27, 0.0  ;;  %v3824_v61 = vld [vmem:[%s4852_s0 + $0x298] sm:$0xff]  }
 0x161   :  { %v1359_v11 = vadd.f32 %v4177_v35, %v1358_v10  ;;  %3257 = vmatprep.subr.bf16.mxu1 %v2459_v0  ;;  %v2222_v15 = vmax.f32 %v1356_v6, 0.0  ;;  %v4408_v0 = vld [vmem:[%s4853_s1 + $0x10] sm:$0xff] }
 0x162   :  { %v2225_v14 = vmax.f32 %v1367_v9, 0.0  ;;  %3586 = vmatmul.mubr.bf16.gmra.mrb[160].mxu0 %v3822_v5  ;;  %v3083_v5 = vcombine.low %v4295_v54, %v4295_v54 }
 0x163   :  { %v2223_v16 = vmax.f32 %v1359_v11, 0.0  ;;  %3589 = vmatprep.mubr.bf16.mxu0 %v3823_v8  ;;  %v3830_v11 = vld [vmem:[%s4852_s0 + $0x2c8] sm:$0xff]  }
 0x164   :  { %v2461_v50 = vpack.c.bf16 %v2225_v14, %v2224_v13  ;;  %3258 = vmatpush3.bf16.msra.mxu1 %v4299_v60 }
 0x165   :  { %v2460_v17 = vpack.c.bf16 %v2223_v16, %v2222_v15  ;;  %v3483_v20 = vpop.f32.mrb[56].mxu0 }
 0x166   :  { %v1380_v21 = vadd.f32 %v3483_v20, %v4177_v35  ;;  %v1371_v22 = vpop.f32.mrb[57].mxu0 }
 0x167   :  { %v1372_v23 = vadd.f32 %v4177_v35, %v1371_v22  ;;  %v3484_v24 = vpop.f32.mrb[58].mxu0  ;;  %3259 = vmatprep.subr.bf16.mxu1 %v2460_v17 }
 0x168   :  { %v1383_v26 = vadd.f32 %v3484_v24, %v4177_v35  ;;  %v1374_v60 = vpop.f32.mrb[59].mxu0  ;;  %3260 = vmatpush3.bf16.msra.mxu1 %v4318_v51  ;;  %v2228_v30 = vmax.f32 %v1380_v21, 0.0  ;;  %v3826_v51 = vld [vmem:[%s4852_s0 + $0x2a8] sm:$0xff]  }
 0x169   :  { %v1375_v28 = vadd.f32 %v4177_v35, %v1374_v60  ;;  %3261 = vmatprep.subr.bf16.mxu1 %v2461_v50  ;;  %v2226_v32 = vmax.f32 %v1372_v23, 0.0 }
 0x16a   :  { %v2229_v31 = vmax.f32 %v1383_v26, 0.0  ;;  %3590 = vmatmul.mubr.bf16.gmra.mrb[164].mxu0 %v3824_v61  ;;  %v3832_v26 = vld [vmem:[%s4852_s0 + $0x2d8] sm:$0xff]  }
 0x16b   :  { %v2227_v33 = vmax.f32 %v1375_v28, 0.0  ;;  %3593 = vmatprep.mubr.bf16.mxu0 %v3825_v25 }
 0x16c   :  { %v2463_v2 = vpack.c.bf16 %v2229_v31, %v2228_v30  ;;  %3262 = vmatpush3.bf16.msra.mxu1 %v4316_v12  ;;  %v3833_v30 = vld [vmem:[%s4852_s0 + $0x2e0] sm:$0xff]  }
 0x16d   :  { %v2462_v34 = vpack.c.bf16 %v2227_v33, %v2226_v32  ;;  %v3487_v38 = vpop.f32.mrb[60].mxu0 }
 0x16e   :  { %v1396_v39 = vadd.f32 %v3487_v38, %v4177_v35  ;;  %v1387_v40 = vpop.f32.mrb[61].mxu0 }
 0x16f   :  { %v1388_v41 = vadd.f32 %v4177_v35, %v1387_v40  ;;  %v3488_v42 = vpop.f32.mrb[62].mxu0  ;;  %3263 = vmatprep.subr.bf16.mxu1 %v2462_v34 }
 0x170   :  { %v1399_v44 = vadd.f32 %v3488_v42, %v4177_v35  ;;  %v1390_v12 = vpop.f32.mrb[63].mxu0  ;;  %3264 = vmatpush3.bf16.msra.mxu1 %v4332_v3  ;;  %v2232_v47 = vmax.f32 %v1396_v39, 0.0  ;;  %v3828_v3 = vld [vmem:[%s4852_s0 + $0x2b8] sm:$0xff]  }
 0x171   :  { %v1391_v45 = vadd.f32 %v4177_v35, %v1390_v12  ;;  %3265 = vmatprep.subr.bf16.mxu1 %v2463_v2  ;;  %v2230_v49 = vmax.f32 %v1388_v41, 0.0 }
 0x172   :  { %v2233_v48 = vmax.f32 %v1399_v44, 0.0  ;;  %3594 = vmatmul.mubr.bf16.gmra.mrb[168].mxu0 %v3826_v51  ;;  %v3834_v44 = vld [vmem:[%s4852_s0 + $0x2e8] sm:$0xff]  }
 0x173   :  { %v2231_v52 = vmax.f32 %v1391_v45, 0.0  ;;  %3597 = vmatprep.mubr.bf16.mxu0 %v3827_v43 }
 0x174   :  { %v2465_v18 = vpack.c.bf16 %v2233_v48, %v2232_v47  ;;  %3266 = vmatpush3.bf16.msra.mxu1 %v4330_v29 }
 0x175   :  { %v2464_v53 = vpack.c.bf16 %v2231_v52, %v2230_v49  ;;  %v3491_v55 = vpop.f32.mrb[64].mxu0 }
 0x176   :  { %v1412_v56 = vadd.f32 %v3491_v55, %v4177_v35  ;;  %v1403_v57 = vpop.f32.mrb[65].mxu0 }
 0x177   :  { %v1404_v58 = vadd.f32 %v4177_v35, %v1403_v57  ;;  %v3492_v59 = vpop.f32.mrb[66].mxu0  ;;  %3267 = vmatprep.subr.bf16.mxu1 %v2464_v53 }
 0x178   :  { %v1415_v62 = vadd.f32 %v3492_v59, %v4177_v35  ;;  %v1406_v29 = vpop.f32.mrb[67].mxu0  ;;  %3268 = vmatpush3.bf16.msra.mxu1 %v4346_v19  ;;  %v2236_v1 = vmax.f32 %v1412_v56, 0.0  ;;  %v3086_v19 = vcombine.high %v4408_v0, %v4408_v0 }
 0x179   :  { %v1407_v63 = vadd.f32 %v4177_v35, %v1406_v29  ;;  %3269 = vmatprep.subr.bf16.mxu1 %v2465_v18  ;;  %v2234_v27 = vmax.f32 %v1404_v58, 0.0 }
 0x17a   :  { %v2237_v4 = vmax.f32 %v1415_v62, 0.0  ;;  %3598 = vmatmul.mubr.bf16.gmra.mrb[172].mxu0 %v3828_v3 }
 0x17b   :  { %v2235_v36 = vmax.f32 %v1407_v63, 0.0  ;;  %3601 = vmatprep.mubr.bf16.mxu0 %v3829_v37 }
 0x17c   :  { %v4412_v6 = vpack.c.bf16 %v2237_v4, %v2236_v1  ;;  %3270 = vmatpush3.bf16.msra.mxu1 %v4344_v46  ;;  %v3831_v46 = vld [vmem:[%s4852_s0 + $0x2d0] sm:$0xff]  }
 0x17d   :  { %v4417_v7 = vpack.c.bf16 %v2235_v36, %v2234_v27  ;;  %v3495_v8 = vpop.f32.mrb[68].mxu0 }
 0x17e   :  { %v1428_v9 = vadd.f32 %v3495_v8, %v4177_v35  ;;  %v1419_v10 = vpop.f32.mrb[69].mxu0 }
 0x17f   :  { %v1420_v13 = vadd.f32 %v4177_v35, %v1419_v10  ;;  %v3496_v54 = vpop.f32.mrb[70].mxu0  ;;  %2691 = vmatmul.mubr.bf16.vlgmr.msra.gmra.mrb[72].mxu1 %v3083_v5 }
 0x180   :  { %v1431_v14 = vadd.f32 %v3496_v54, %v4177_v35  ;;  %v1422_v15 = vpop.f32.mrb[71].mxu0  ;;  %2730 = vmatprep.mubr.bf16.mxu1 %v3086_v19  ;;  %v2240_v50 = vmax.f32 %v1428_v9, 0.0 }
 0x181   :  { %v1423_v16 = vadd.f32 %v4177_v35, %v1422_v15  ;;  %v2238_v20 = vmax.f32 %v1420_v13, 0.0 }
 0x182   :  { %v2241_v17 = vmax.f32 %v1431_v14, 0.0  ;;  %3602 = vmatmul.mubr.bf16.gmra.mrb[176].mxu0 %v3830_v11 }
 0x183   :  { %v2239_v21 = vmax.f32 %v1423_v16, 0.0  ;;  %3605 = vmatprep.mubr.bf16.mxu0 %v3831_v46 }
 0x184   :  { %v4429_v22 = vpack.c.bf16 %v2241_v17, %v2240_v50 }
 0x185   :  { %v4431_v61 = vpack.c.bf16 %v2239_v21, %v2238_v20  ;;  %v3499_v23 = vpop.f32.mrb[72].mxu0 }
 0x186   :  { %v1444_v24 = vadd.f32 %v3499_v23, %v4177_v35  ;;  %v1435_v25 = vpop.f32.mrb[73].mxu0 }
 0x187   :  { %v1436_v60 = vadd.f32 %v4177_v35, %v1435_v25  ;;  %v3500_v28 = vpop.f32.mrb[74].mxu0 }
 0x188   :  { %v1447_v31 = vadd.f32 %v3500_v28, %v4177_v35  ;;  %v1438_v32 = vpop.f32.mrb[75].mxu0  ;;  %v2244_v2 = vmax.f32 %v1444_v24, 0.0 }
 0x189   :  { %v1439_v33 = vadd.f32 %v4177_v35, %v1438_v32  ;;  %v2242_v38 = vmax.f32 %v1436_v60, 0.0 }
 0x18a   :  { %v2245_v34 = vmax.f32 %v1447_v31, 0.0  ;;  %3606 = vmatmul.mubr.bf16.gmra.mrb[180].mxu0 %v3832_v26  ;;  %v3615_v31 = vpop.f32.mrb[0].mxu1 }
 0x18b   :  { %v2243_v39 = vmax.f32 %v1439_v33, 0.0  ;;  %3609 = vmatprep.mubr.bf16.mxu0 %v3833_v30  ;;  %v1899_v33 = vpop.f32.mrb[1].mxu1 }
 0x18c   :  { %v4443_v40 = vpack.c.bf16 %v2245_v34, %v2244_v2  ;;  %v3616_v34 = vpop.f32.mrb[2].mxu1 }
 0x18d   :  { %v4445_v51 = vpack.c.bf16 %v2243_v39, %v2242_v38  ;;  %v3503_v41 = vpop.f32.mrb[76].mxu0 }
 0x18e   :  { %v1460_v42 = vadd.f32 %v3503_v41, %v4177_v35  ;;  %v1451_v43 = vpop.f32.mrb[77].mxu0  ;;  %v1902_v41 = vpop.f32.mrb[3].mxu1 }
 0x18f   :  { %v1452_v12 = vadd.f32 %v4177_v35, %v1451_v43  ;;  %v3504_v45 = vpop.f32.mrb[78].mxu0  ;;  %v1908_v43 = vadd.f32 %v3615_v31, %v4177_v35 }
 0x190   :  { %v1463_v47 = vadd.f32 %v3504_v45, %v4177_v35  ;;  %v1454_v48 = vpop.f32.mrb[79].mxu0  ;;  %v2248_v52 = vmax.f32 %v1460_v42, 0.0 }
 0x191   :  { %v1455_v49 = vadd.f32 %v4177_v35, %v1454_v48  ;;  %v2246_v53 = vmax.f32 %v1452_v12, 0.0 }
 0x192   :  { %v2249_v18 = vmax.f32 %v1463_v47, 0.0  ;;  %3610 = vmatmul.mubr.bf16.gmra.mrb[184].mxu0 %v3834_v44  ;;  %v1900_v44 = vadd.f32 %v4177_v35, %v1899_v33  ;;  %v1903_v47 = vadd.f32 %v4177_v35, %v1902_v41 }
 0x193   :  { %v2247_v55 = vmax.f32 %v1455_v49, 0.0 }
 0x194   :  { %v4454_v56 = vpack.c.bf16 %v2249_v18, %v2248_v52  ;;  %v2360_v52 = vmax.f32 %v1908_v43, 0.0  ;;  %v2358_v18 = vmax.f32 %v1900_v44, 0.0 }
 0x195   :  { %v4456_v57 = vpack.c.bf16 %v2247_v55, %v2246_v53  ;;  %v3507_v3 = vpop.f32.mrb[80].mxu0 }
 0x196   :  { %v1476_v58 = vadd.f32 %v3507_v3, %v4177_v35  ;;  %v1467_v59 = vpop.f32.mrb[81].mxu0 }
 0x197   :  { %v1468_v37 = vadd.f32 %v4177_v35, %v1467_v59  ;;  %v3508_v62 = vpop.f32.mrb[82].mxu0 }
 0x198   :  { %v1479_v29 = vadd.f32 %v3508_v62, %v4177_v35  ;;  %v1470_v63 = vpop.f32.mrb[83].mxu0  ;;  %v2252_v4 = vmax.f32 %v1476_v58, 0.0  ;;  %v3619_v62 = vpop.f32.mrb[4].mxu1 }
 0x199   :  { %v1471_v1 = vadd.f32 %v4177_v35, %v1470_v63  ;;  %v2250_v36 = vmax.f32 %v1468_v37, 0.0 }
 0x19a   :  { %v2253_v27 = vmax.f32 %v1479_v29, 0.0 }
 0x19b   :  { %v2251_v5 = vmax.f32 %v1471_v1, 0.0  ;;  %v1915_v1 = vpop.f32.mrb[5].mxu1 }
 0x19c   :  { %v2475_v19 = vpack.c.bf16 %v2253_v27, %v2252_v4 }
 0x19d   :  { %v2474_v8 = vpack.c.bf16 %v2251_v5, %v2250_v36  ;;  %v3511_v9 = vpop.f32.mrb[84].mxu0  ;;  %v3620_v36 = vpop.f32.mrb[6].mxu1 }
 0x19e   :  { %v1492_v10 = vadd.f32 %v3511_v9, %v4177_v35  ;;  %v1483_v11 = vpop.f32.mrb[85].mxu0 }
 0x19f   :  { %v1484_v13 = vadd.f32 %v4177_v35, %v1483_v11  ;;  %v3512_v54 = vpop.f32.mrb[86].mxu0  ;;  %3277 = vmatprep.subr.bf16.mxu1 %v2474_v8  ;;  %v1918_v8 = vpop.f32.mrb[7].mxu1  ;;  %v1927_v11 = vadd.f32 %v3620_v36, %v4177_v35 }
 0x1a0   :  { %v1495_v46 = vadd.f32 %v3512_v54, %v4177_v35  ;;  %v1486_v14 = vpop.f32.mrb[87].mxu0  ;;  %3278 = vmatpush3.bf16.msra.mxu1 %v4417_v7  ;;  %v2256_v16 = vmax.f32 %v1492_v10, 0.0  ;;  %v1916_v10 = vadd.f32 %v4177_v35, %v1915_v1 }
 0x1a1   :  { %v1487_v15 = vadd.f32 %v4177_v35, %v1486_v14  ;;  %3279 = vmatprep.subr.bf16.mxu1 %v2475_v19  ;;  %v2254_v17 = vmax.f32 %v1484_v13, 0.0 }
 0x1a2   :  { %v2257_v50 = vmax.f32 %v1495_v46, 0.0  ;;  %v1919_v46 = vadd.f32 %v4177_v35, %v1918_v8 }
 0x1a3   :  { %v2255_v20 = vmax.f32 %v1487_v15, 0.0 }
 0x1a4   :  { %v2477_v21 = vpack.c.bf16 %v2257_v50, %v2256_v16  ;;  %3280 = vmatpush3.bf16.msra.mxu1 %v4412_v6  ;;  %v2362_v50 = vmax.f32 %v1916_v10, 0.0 }
 0x1a5   :  { %v2476_v23 = vpack.c.bf16 %v2255_v20, %v2254_v17  ;;  %v3515_v24 = vpop.f32.mrb[88].mxu0  ;;  %v2365_v17 = vmax.f32 %v1927_v11, 0.0 }
 0x1a6   :  { %v1508_v25 = vadd.f32 %v3515_v24, %v4177_v35  ;;  %v1499_v26 = vpop.f32.mrb[89].mxu0 }
 0x1a7   :  { %v1500_v60 = vadd.f32 %v4177_v35, %v1499_v26  ;;  %v3516_v28 = vpop.f32.mrb[90].mxu0  ;;  %3281 = vmatprep.subr.bf16.mxu1 %v2476_v23 }
 0x1a8   :  { %v1511_v7 = vadd.f32 %v3516_v28, %v4177_v35  ;;  %v1502_v30 = vpop.f32.mrb[91].mxu0  ;;  %3282 = vmatpush3.bf16.msra.mxu1 %v4431_v61  ;;  %v2260_v6 = vmax.f32 %v1508_v25, 0.0  ;;  %v1911_v61 = vadd.f32 %v3616_v34, %v4177_v35  ;;  %v4499_v25 = vld [vmem:[%s4853_s1 + $0x18] sm:$0xff] }
 0x1a9   :  { %v1503_v32 = vadd.f32 %v4177_v35, %v1502_v30  ;;  %3283 = vmatprep.subr.bf16.mxu1 %v2477_v21  ;;  %v2258_v38 = vmax.f32 %v1500_v60, 0.0  ;;  %v3623_v60 = vpop.f32.mrb[8].mxu1  ;;  %v3088_v34 = vcombine.high %v4499_v25, %v4499_v25 }
 0x1aa   :  { %v2261_v2 = vmax.f32 %v1511_v7, 0.0  ;;  %v2361_v53 = vmax.f32 %v1911_v61, 0.0  ;;  %v1931_v30 = vpop.f32.mrb[9].mxu1 }
 0x1ab   :  { %v2259_v39 = vmax.f32 %v1503_v32, 0.0  ;;  %v3624_v33 = vpop.f32.mrb[10].mxu1 }
 0x1ac   :  { %v2479_v42 = vpack.c.bf16 %v2261_v2, %v2260_v6  ;;  %3284 = vmatpush3.bf16.msra.mxu1 %v4429_v22  ;;  %v2359_v22 = vmax.f32 %v1903_v47, 0.0  ;;  %v4482_v37 = vpack.c.bf16 %v2361_v53, %v2360_v52 }
 0x1ad   :  { %v2478_v12 = vpack.c.bf16 %v2259_v39, %v2258_v38  ;;  %v3519_v45 = vpop.f32.mrb[92].mxu0  ;;  %v1934_v38 = vpop.f32.mrb[11].mxu1 }
 0x1ae   :  { %v1524_v48 = vadd.f32 %v3519_v45, %v4177_v35  ;;  %v1515_v49 = vpop.f32.mrb[93].mxu0  ;;  %v4485_v63 = vpack.c.bf16 %v2359_v22, %v2358_v18  ;;  %v3627_v22 = vpop.f32.mrb[12].mxu1 }
 0x1af   :  { %v1516_v55 = vadd.f32 %v4177_v35, %v1515_v49  ;;  %v3520_v3 = vpop.f32.mrb[94].mxu0  ;;  %3285 = vmatprep.subr.bf16.mxu1 %v2478_v12 }
 0x1b0   :  { %v1527_v58 = vadd.f32 %v3520_v3, %v4177_v35  ;;  %v1518_v59 = vpop.f32.mrb[95].mxu0  ;;  %3286 = vmatpush3.bf16.msra.mxu1 %v4445_v51  ;;  %v2264_v4 = vmax.f32 %v1524_v48, 0.0  ;;  %v1924_v51 = vadd.f32 %v3619_v62, %v4177_v35  ;;  %v1947_v62 = vpop.f32.mrb[13].mxu1 }
 0x1b1   :  { %v1519_v29 = vadd.f32 %v4177_v35, %v1518_v59  ;;  %3287 = vmatprep.subr.bf16.mxu1 %v2479_v42  ;;  %v2262_v5 = vmax.f32 %v1516_v55, 0.0 }
 0x1b2   :  { %v2265_v27 = vmax.f32 %v1527_v58, 0.0  ;;  %v2364_v16 = vmax.f32 %v1924_v51, 0.0 }
 0x1b3   :  { %v2263_v19 = vmax.f32 %v1519_v29, 0.0 }
 0x1b4   :  { %v2481_v9 = vpack.c.bf16 %v2265_v27, %v2264_v4  ;;  %3288 = vmatpush3.bf16.msra.mxu1 %v4443_v40  ;;  %v2363_v40 = vmax.f32 %v1919_v46, 0.0  ;;  %v4501_v26 = vpack.c.bf16 %v2365_v17, %v2364_v16  ;;  %v3628_v4 = vpop.f32.mrb[14].mxu1 }
 0x1b5   :  { %v2480_v13 = vpack.c.bf16 %v2263_v19, %v2262_v5  ;;  %v3523_v54 = vpop.f32.mrb[96].mxu0  ;;  %v1950_v5 = vpop.f32.mrb[15].mxu1 }
 0x1b6   :  { %v1540_v14 = vadd.f32 %v3523_v54, %v4177_v35  ;;  %v1531_v15 = vpop.f32.mrb[97].mxu0  ;;  %v4504_v7 = vpack.c.bf16 %v2363_v40, %v2362_v50 }
 0x1b7   :  { %v1532_v20 = vadd.f32 %v4177_v35, %v1531_v15  ;;  %v3524_v21 = vpop.f32.mrb[98].mxu0  ;;  %3289 = vmatprep.subr.bf16.mxu1 %v2480_v13 }
 0x1b8   :  { %v1543_v23 = vadd.f32 %v3524_v21, %v4177_v35  ;;  %v1534_v24 = vpop.f32.mrb[99].mxu0  ;;  %3290 = vmatpush3.bf16.msra.mxu1 %v4456_v57  ;;  %v2268_v31 = vmax.f32 %v1540_v14, 0.0  ;;  %v3085_v57 = vcombine.low %v4408_v0, %v4408_v0 }
 0x1b9   :  { %v1535_v28 = vadd.f32 %v4177_v35, %v1534_v24  ;;  %3291 = vmatprep.subr.bf16.mxu1 %v2481_v9  ;;  %v2266_v6 = vmax.f32 %v1532_v20, 0.0  ;;  %v4516_v35 = vld [vmem:[%s4854_s3] ss:$0 sm:$0xff]  ;;  %v3631_v24 = vpop.f32.mrb[16].mxu1 }
 0x1ba   :  { %v2269_v32 = vmax.f32 %v1543_v23, 0.0  ;;  %v1940_v41 = vadd.f32 %v4516_v35, %v3623_v60  ;;  %v1932_v42 = vadd.f32 %v4516_v35, %v1931_v30  ;;  %v1943_v43 = vadd.f32 %v4516_v35, %v3624_v33  ;;  %v1963_v30 = vpop.f32.mrb[17].mxu1 }
 0x1bb   :  { %v2267_v2 = vmax.f32 %v1535_v28, 0.0  ;;  %v1935_v61 = vadd.f32 %v4516_v35, %v1934_v38  ;;  %v1956_v8 = vadd.f32 %v4516_v35, %v3627_v22  ;;  %v1948_v9 = vadd.f32 %v4516_v35, %v1947_v62  ;;  %v3632_v33 = vpop.f32.mrb[18].mxu1 }
 0x1bc   :  { %v4510_v39 = vpack.c.bf16 %v2269_v32, %v2268_v31  ;;  %3292 = vmatpush3.bf16.msra.mxu1 %v4454_v56  ;;  %v2368_v56 = vmax.f32 %v1940_v41, 0.0  ;;  %v2366_v47 = vmax.f32 %v1932_v42, 0.0  ;;  %v2369_v48 = vmax.f32 %v1943_v43, 0.0 }
 0x1bd   :  { %v4521_v0 = vpack.c.bf16 %v2267_v2, %v2266_v6  ;;  %v3527_v44 = vpop.f32.mrb[100].mxu0  ;;  %v2367_v18 = vmax.f32 %v1935_v61, 0.0  ;;  %v1959_v51 = vadd.f32 %v4516_v35, %v3628_v4  ;;  %v1951_v13 = vadd.f32 %v4516_v35, %v1950_v5 }
 0x1be   :  { %v1556_v12 = vadd.f32 %v4516_v35, %v3527_v44  ;;  %v1547_v45 = vpop.f32.mrb[101].mxu0  ;;  %v4527_v3 = vpack.c.bf16 %v2369_v48, %v2368_v56  ;;  %v2372_v14 = vmax.f32 %v1956_v8, 0.0  ;;  %v2370_v15 = vmax.f32 %v1948_v9, 0.0 }
 0x1bf   :  { %v1548_v49 = vadd.f32 %v4516_v35, %v1547_v45  ;;  %v3528_v52 = vpop.f32.mrb[102].mxu0  ;;  %2731 = vmatmul.mubr.bf16.vlgmr.msra.gmra.mrb[76].mxu1 %v3085_v57  ;;  %v4530_v59 = vpack.c.bf16 %v2367_v18, %v2366_v47  ;;  %v2373_v16 = vmax.f32 %v1959_v51, 0.0  ;;  %v2371_v20 = vmax.f32 %v1951_v13, 0.0  ;;  %v1966_v57 = vpop.f32.mrb[19].mxu1 }
 0x1c0   :  { %v1559_v53 = vadd.f32 %v4516_v35, %v3528_v52  ;;  %v1550_v55 = vpop.f32.mrb[103].mxu0  ;;  %2770 = vmatprep.mubr.bf16.mxu1 %v3088_v34  ;;  %v2272_v29 = vmax.f32 %v1556_v12, 0.0  ;;  %v1972_v38 = vadd.f32 %v4516_v35, %v3631_v24  ;;  %v1964_v41 = vadd.f32 %v4516_v35, %v1963_v30 }
 0x1c1   :  { %v1551_v58 = vadd.f32 %v4516_v35, %v1550_v55  ;;  %v2270_v27 = vmax.f32 %v1548_v49, 0.0  ;;  %v4543_v23 = vpack.c.bf16 %v2373_v16, %v2372_v14  ;;  %v4546_v28 = vpack.c.bf16 %v2371_v20, %v2370_v15 }
 0x1c2   :  { %v2273_v1 = vmax.f32 %v1559_v53, 0.0  ;;  %v1975_v42 = vadd.f32 %v4516_v35, %v3632_v33  ;;  %v1967_v61 = vadd.f32 %v4516_v35, %v1966_v57  ;;  %v2376_v56 = vmax.f32 %v1972_v38, 0.0 }
 0x1c3   :  { %v2271_v36 = vmax.f32 %v1551_v58, 0.0  ;;  %v2374_v47 = vmax.f32 %v1964_v41, 0.0  ;;  %v3635_v58 = vpop.f32.mrb[20].mxu1 }
 0x1c4   :  { %v4532_v19 = vpack.c.bf16 %v2273_v1, %v2272_v29  ;;  %v2377_v48 = vmax.f32 %v1975_v42, 0.0  ;;  %v2375_v18 = vmax.f32 %v1967_v61, 0.0  ;;  %v1979_v1 = vpop.f32.mrb[21].mxu1 }
 0x1c5   :  { %v4537_v10 = vpack.c.bf16 %v2271_v36, %v2270_v27  ;;  %v3531_v11 = vpop.f32.mrb[104].mxu0  ;;  %v3636_v36 = vpop.f32.mrb[22].mxu1  ;;  %v1980_v13 = vadd.f32 %v4516_v35, %v1979_v1 }
 0x1c6   :  { %v1572_v54 = vadd.f32 %v4516_v35, %v3531_v11  ;;  %v1563_v46 = vpop.f32.mrb[105].mxu0  ;;  %v4559_v22 = vpack.c.bf16 %v2377_v48, %v2376_v56  ;;  %v4562_v29 = vpack.c.bf16 %v2375_v18, %v2374_v47  ;;  %v1982_v9 = vpop.f32.mrb[23].mxu1  ;;  %v1988_v11 = vadd.f32 %v4516_v35, %v3635_v58 }
 0x1c7   :  { %v1564_v50 = vadd.f32 %v4516_v35, %v1563_v46  ;;  %v3532_v17 = vpop.f32.mrb[106].mxu0  ;;  %v1983_v15 = vadd.f32 %v4516_v35, %v1982_v9  ;;  %v2378_v20 = vmax.f32 %v1980_v13, 0.0  ;;  %v3639_v33 = vpop.f32.mrb[24].mxu1 }
 0x1c8   :  { %v1575_v21 = vadd.f32 %v4516_v35, %v3532_v17  ;;  %v1566_v40 = vpop.f32.mrb[107].mxu0  ;;  %v2276_v31 = vmax.f32 %v1572_v54, 0.0  ;;  %v1991_v54 = vadd.f32 %v4516_v35, %v3636_v36  ;;  %v2380_v17 = vmax.f32 %v1988_v11, 0.0  ;;  %v1995_v57 = vpop.f32.mrb[25].mxu1 }
 0x1c9   :  { %v1567_v60 = vadd.f32 %v4516_v35, %v1566_v40  ;;  %v2274_v6 = vmax.f32 %v1564_v50, 0.0  ;;  %v3640_v42 = vpop.f32.mrb[26].mxu1  ;;  %v2004_v56 = vadd.f32 %v4516_v35, %v3639_v33  ;;  %v1996_v47 = vadd.f32 %v4516_v35, %v1995_v57 }
 0x1ca   :  { %v2277_v32 = vmax.f32 %v1575_v21, 0.0  ;;  %v2381_v21 = vmax.f32 %v1991_v54, 0.0  ;;  %v2007_v48 = vadd.f32 %v4516_v35, %v3640_v42 }
 0x1cb   :  { %v2275_v2 = vmax.f32 %v1567_v60, 0.0  ;;  %v2379_v60 = vmax.f32 %v1983_v15, 0.0  ;;  %v2384_v58 = vmax.f32 %v2004_v56, 0.0 }
 0x1cc   :  { %v4548_v34 = vpack.c.bf16 %v2277_v32, %v2276_v31  ;;  %v4575_v32 = vpack.c.bf16 %v2381_v21, %v2380_v17  ;;  %v2385_v1 = vmax.f32 %v2007_v48, 0.0 }
 0x1cd   :  { %v4553_v43 = vpack.c.bf16 %v2275_v2, %v2274_v6  ;;  %v3535_v44 = vpop.f32.mrb[108].mxu0  ;;  %v4578_v2 = vpack.c.bf16 %v2379_v60, %v2378_v20 }
 0x1ce   :  { %v1588_v12 = vadd.f32 %v4516_v35, %v3535_v44  ;;  %v1579_v45 = vpop.f32.mrb[109].mxu0  ;;  %v4588_v9 = vpack.c.bf16 %v2385_v1, %v2384_v58 }
 0x1cf   :  { %v1580_v49 = vadd.f32 %v4516_v35, %v1579_v45  ;;  %v3536_v52 = vpop.f32.mrb[110].mxu0 }
 0x1d0   :  { %v1591_v53 = vadd.f32 %v4516_v35, %v3536_v52  ;;  %v1582_v55 = vpop.f32.mrb[111].mxu0  ;;  %v2280_v4 = vmax.f32 %v1588_v12, 0.0  ;;  %v1998_v12 = vpop.f32.mrb[27].mxu1 }
 0x1d1   :  { %v1583_v62 = vadd.f32 %v4516_v35, %v1582_v55  ;;  %v2278_v5 = vmax.f32 %v1580_v49, 0.0  ;;  %v1999_v18 = vadd.f32 %v4516_v35, %v1998_v12  ;;  %v3643_v11 = vpop.f32.mrb[28].mxu1 }
 0x1d2   :  { %v2281_v27 = vmax.f32 %v1591_v53, 0.0 }
 0x1d3   :  { %v2279_v8 = vmax.f32 %v1583_v62, 0.0  ;;  %v2382_v62 = vmax.f32 %v1996_v47, 0.0  ;;  %v2383_v36 = vmax.f32 %v1999_v18, 0.0 }
 0x1d4   :  { %v4564_v51 = vpack.c.bf16 %v2281_v27, %v2280_v4 }
 0x1d5   :  { %v4569_v46 = vpack.c.bf16 %v2279_v8, %v2278_v5  ;;  %v3539_v14 = vpop.f32.mrb[112].mxu0  ;;  %v4591_v54 = vpack.c.bf16 %v2383_v36, %v2382_v62 }
 0x1d6   :  { %v1604_v16 = vadd.f32 %v4516_v35, %v3539_v14  ;;  %v1595_v50 = vpop.f32.mrb[113].mxu0  ;;  %v2011_v14 = vpop.f32.mrb[29].mxu1 }
 0x1d7   :  { %v1596_v40 = vadd.f32 %v4516_v35, %v1595_v50  ;;  %v3540_v24 = vpop.f32.mrb[114].mxu0  ;;  %v3644_v50 = vpop.f32.mrb[30].mxu1 }
 0x1d8   :  { %v1607_v30 = vadd.f32 %v4516_v35, %v3540_v24  ;;  %v1598_v31 = vpop.f32.mrb[115].mxu0  ;;  %v2284_v38 = vmax.f32 %v1604_v16, 0.0  ;;  %v2014_v21 = vpop.f32.mrb[31].mxu1  ;;  %v2012_v24 = vadd.f32 %v4516_v35, %v2011_v14  ;;  %v2023_v60 = vadd.f32 %v4516_v35, %v3644_v50 }
 0x1d9   :  { %v1599_v6 = vadd.f32 %v4516_v35, %v1598_v31  ;;  %v2282_v44 = vmax.f32 %v1596_v40, 0.0  ;;  %v2015_v33 = vadd.f32 %v4516_v35, %v2014_v21  ;;  %v3647_v47 = vpop.f32.mrb[32].mxu1 }
 0x1da   :  { %v2285_v41 = vmax.f32 %v1607_v30, 0.0  ;;  %v2389_v42 = vmax.f32 %v2023_v60, 0.0 }
 0x1db   :  { %v2283_v61 = vmax.f32 %v1599_v6, 0.0 }
 0x1dc   :  { %v2491_v45 = vpack.c.bf16 %v2285_v41, %v2284_v38  ;;  %v2386_v41 = vmax.f32 %v2012_v24, 0.0 }
 0x1dd   :  { %v2490_v49 = vpack.c.bf16 %v2283_v61, %v2282_v44  ;;  %v3543_v52 = vpop.f32.mrb[116].mxu0 }
 0x1de   :  { %v1620_v53 = vadd.f32 %v4516_v35, %v3543_v52  ;;  %v1611_v55 = vpop.f32.mrb[117].mxu0  ;;  %v2027_v52 = vpop.f32.mrb[33].mxu1 }
 0x1df   :  { %v1612_v4 = vadd.f32 %v4516_v35, %v1611_v55  ;;  %v3544_v27 = vpop.f32.mrb[118].mxu0  ;;  %3299 = vmatprep.subr.bf16.mxu1 %v2490_v49  ;;  %v3648_v55 = vpop.f32.mrb[34].mxu1 }
 0x1e0   :  { %v1623_v5 = vadd.f32 %v4516_v35, %v3544_v27  ;;  %v1614_v8 = vpop.f32.mrb[119].mxu0  ;;  %3300 = vmatpush3.bf16.msra.mxu1 %v4521_v0  ;;  %v2288_v15 = vmax.f32 %v1620_v53, 0.0  ;;  %v2020_v0 = vadd.f32 %v4516_v35, %v3643_v11  ;;  %v2030_v1 = vpop.f32.mrb[35].mxu1  ;;  %v2028_v27 = vadd.f32 %v4516_v35, %v2027_v52 }
 0x1e1   :  { %v1615_v13 = vadd.f32 %v4516_v35, %v1614_v8  ;;  %3301 = vmatprep.subr.bf16.mxu1 %v2491_v45  ;;  %v2286_v17 = vmax.f32 %v1612_v4, 0.0  ;;  %v2039_v36 = vadd.f32 %v4516_v35, %v3648_v55  ;;  %v2031_v11 = vadd.f32 %v4516_v35, %v2030_v1  ;;  %v3651_v21 = vpop.f32.mrb[36].mxu1 }
 0x1e2   :  { %v2289_v16 = vmax.f32 %v1623_v5, 0.0  ;;  %v2388_v38 = vmax.f32 %v2020_v0, 0.0  ;;  %v2052_v60 = vadd.f32 %v4516_v35, %v3651_v21 }
 0x1e3   :  { %v2287_v20 = vmax.f32 %v1615_v13, 0.0  ;;  %v2393_v50 = vmax.f32 %v2039_v36, 0.0 }
 0x1e4   :  { %v2493_v40 = vpack.c.bf16 %v2289_v16, %v2288_v15  ;;  %3302 = vmatpush3.bf16.msra.mxu1 %v4510_v39  ;;  %v2387_v39 = vmax.f32 %v2015_v33, 0.0  ;;  %v4602_v56 = vpack.c.bf16 %v2389_v42, %v2388_v38  ;;  %v2390_v16 = vmax.f32 %v2028_v27, 0.0 }
 0x1e5   :  { %v2492_v30 = vpack.c.bf16 %v2287_v20, %v2286_v17  ;;  %v3547_v31 = vpop.f32.mrb[120].mxu0  ;;  %v2396_v42 = vmax.f32 %v2052_v60, 0.0 }
 0x1e6   :  { %v1636_v6 = vadd.f32 %v4516_v35, %v3547_v31  ;;  %v1627_v57 = vpop.f32.mrb[121].mxu0  ;;  %v4605_v49 = vpack.c.bf16 %v2387_v39, %v2386_v41 }
 0x1e7   :  { %v1628_v44 = vadd.f32 %v4516_v35, %v1627_v57  ;;  %v3548_v61 = vpop.f32.mrb[122].mxu0  ;;  %3303 = vmatprep.subr.bf16.mxu1 %v2492_v30  ;;  %v2043_v30 = vpop.f32.mrb[37].mxu1 }
 0x1e8   :  { %v1639_v12 = vadd.f32 %v4516_v35, %v3548_v61  ;;  %v1630_v45 = vpop.f32.mrb[123].mxu0  ;;  %3304 = vmatpush3.bf16.msra.mxu1 %v4537_v10  ;;  %v2292_v18 = vmax.f32 %v1636_v6, 0.0  ;;  %v2036_v10 = vadd.f32 %v4516_v35, %v3647_v47  ;;  %v2044_v6 = vadd.f32 %v4516_v35, %v2043_v30  ;;  %v3652_v57 = vpop.f32.mrb[38].mxu1 }
 0x1e9   :  { %v1631_v48 = vadd.f32 %v4516_v35, %v1630_v45  ;;  %3305 = vmatprep.subr.bf16.mxu1 %v2493_v40  ;;  %v2290_v58 = vmax.f32 %v1628_v44, 0.0  ;;  %v2055_v44 = vadd.f32 %v4516_v35, %v3652_v57  ;;  %v2046_v61 = vpop.f32.mrb[39].mxu1 }
 0x1ea   :  { %v2293_v53 = vmax.f32 %v1639_v12, 0.0  ;;  %v2392_v15 = vmax.f32 %v2036_v10, 0.0  ;;  %v2394_v12 = vmax.f32 %v2044_v6, 0.0  ;;  %v2047_v45 = vadd.f32 %v4516_v35, %v2046_v61  ;;  %v3655_v55 = vpop.f32.mrb[40].mxu1 }
 0x1eb   :  { %v2291_v62 = vmax.f32 %v1631_v48, 0.0  ;;  %v2397_v48 = vmax.f32 %v2055_v44, 0.0 }
 0x1ec   :  { %v2495_v4 = vpack.c.bf16 %v2293_v53, %v2292_v18  ;;  %3306 = vmatpush3.bf16.msra.mxu1 %v4532_v19  ;;  %v2391_v19 = vmax.f32 %v2031_v11, 0.0  ;;  %v4616_v24 = vpack.c.bf16 %v2393_v50, %v2392_v15  ;;  %v2395_v53 = vmax.f32 %v2047_v45, 0.0 }
 0x1ed   :  { %v2494_v5 = vpack.c.bf16 %v2291_v62, %v2290_v58  ;;  %v3551_v8 = vpop.f32.mrb[124].mxu0  ;;  %v4627_v1 = vpack.c.bf16 %v2397_v48, %v2396_v42 }
 0x1ee   :  { %v1652_v13 = vadd.f32 %v4516_v35, %v3551_v8  ;;  %v1643_v14 = vpop.f32.mrb[125].mxu0  ;;  %v4620_v33 = vpack.c.bf16 %v2391_v19, %v2390_v16  ;;  %v4631_v36 = vpack.c.bf16 %v2395_v53, %v2394_v12  ;;  %v2059_v8 = vpop.f32.mrb[41].mxu1 }
 0x1ef   :  { %v1644_v17 = vadd.f32 %v4516_v35, %v1643_v14  ;;  %v3552_v20 = vpop.f32.mrb[126].mxu0  ;;  %3307 = vmatprep.subr.bf16.mxu1 %v2494_v5  ;;  %v4641_v14 = vld [vmem:[%s4853_s1 + $0x20] sm:$0xff]  ;;  %v2060_v15 = vadd.f32 %v4516_v35, %v2059_v8  ;;  %v3656_v16 = vpop.f32.mrb[42].mxu1 }
 0x1f0   :  { %v1655_v40 = vadd.f32 %v4516_v35, %v3552_v20  ;;  %v1646_v0 = vpop.f32.mrb[127].mxu0  ;;  %3308 = vmatpush3.bf16.msra.mxu1 %v4553_v43  ;;  %v2296_v38 = vmax.f32 %v1652_v13, 0.0  ;;  %v3087_v13 = vcombine.low %v4499_v25, %v4499_v25  ;;  %v2062_v19 = vpop.f32.mrb[43].mxu1  ;;  %v3090_v30 = vcombine.high %v4641_v14, %v4641_v14 }
 0x1f1   :  { %v1647_v31 = vadd.f32 %v4516_v35, %v1646_v0  ;;  %3309 = vmatprep.subr.bf16.mxu1 %v2495_v4  ;;  %v2294_v43 = vmax.f32 %v1644_v17, 0.0  ;;  %v2068_v4 = vadd.f32 %v4516_v35, %v3655_v55  ;;  %v2398_v0 = vmax.f32 %v2060_v15, 0.0 }
 0x1f2   :  { %v2297_v41 = vmax.f32 %v1655_v40, 0.0  ;;  %v2063_v60 = vadd.f32 %v4516_v35, %v2062_v19 }
 0x1f3   :  { %v2295_v39 = vmax.f32 %v1647_v31, 0.0  ;;  %v2400_v20 = vmax.f32 %v2068_v4, 0.0 }
 0x1f4   :  { %v2497_v47 = vpack.c.bf16 %v2297_v41, %v2296_v38  ;;  %3310 = vmatpush3.bf16.msra.mxu1 %v4548_v34  ;;  %v2399_v38 = vmax.f32 %v2063_v60, 0.0 }
 0x1f5   :  { %v2496_v52 = vpack.c.bf16 %v2295_v39, %v2294_v43  ;;  %v3555_v18 = vpop.f32.mrb[128].mxu0 }
 0x1f6   :  { %v1668_v58 = vadd.f32 %v4516_v35, %v3555_v18  ;;  %v1659_v62 = vpop.f32.mrb[129].mxu0  ;;  %v4657_v39 = vpack.c.bf16 %v2399_v38, %v2398_v0 }
 0x1f7   :  { %v1660_v10 = vadd.f32 %v4516_v35, %v1659_v62  ;;  %v3556_v27 = vpop.f32.mrb[130].mxu0  ;;  %3311 = vmatprep.subr.bf16.mxu1 %v2496_v52 }
 0x1f8   :  { %v1671_v34 = vadd.f32 %v4516_v35, %v3556_v27  ;;  %v1662_v5 = vpop.f32.mrb[131].mxu0  ;;  %3312 = vmatpush3.bf16.msra.mxu1 %v4569_v46  ;;  %v2300_v50 = vmax.f32 %v1668_v58, 0.0  ;;  %v2071_v46 = vadd.f32 %v4516_v35, %v3656_v16 }
 0x1f9   :  { %v1663_v11 = vadd.f32 %v4516_v35, %v1662_v5  ;;  %3313 = vmatprep.subr.bf16.mxu1 %v2497_v47  ;;  %v2298_v21 = vmax.f32 %v1660_v10, 0.0 }
 0x1fa   :  { %v2301_v17 = vmax.f32 %v1671_v34, 0.0  ;;  %v2401_v31 = vmax.f32 %v2071_v46, 0.0 }
 0x1fb   :  { %v2299_v40 = vmax.f32 %v1663_v11, 0.0 }
 0x1fc   :  { %v4646_v25 = vpack.c.bf16 %v2301_v17, %v2300_v50  ;;  %3314 = vmatpush3.bf16.msra.mxu1 %v4564_v51  ;;  %v4654_v44 = vpack.c.bf16 %v2401_v31, %v2400_v20  ;;  %v3659_v51 = vpop.f32.mrb[44].mxu1 }
 0x1fd   :  { %v4651_v6 = vpack.c.bf16 %v2299_v40, %v2298_v21  ;;  %v3559_v57 = vpop.f32.mrb[132].mxu0  ;;  %v2084_v47 = vadd.f32 %v4516_v35, %v3659_v51  ;;  %v2075_v48 = vpop.f32.mrb[45].mxu1 }
 0x1fe   :  { %v1684_v41 = vadd.f32 %v4516_v35, %v3559_v57  ;;  %v1675_v42 = vpop.f32.mrb[133].mxu0  ;;  %v2076_v18 = vadd.f32 %v4516_v35, %v2075_v48  ;;  %v3660_v53 = vpop.f32.mrb[46].mxu1 }
 0x1ff   :  { %v1676_v61 = vadd.f32 %v4516_v35, %v1675_v42  ;;  %v3560_v43 = vpop.f32.mrb[134].mxu0  ;;  %2771 = vmatmul.mubr.bf16.vlgmr.msra.gmra.mrb[80].mxu1 %v3087_v13  ;;  %v2404_v62 = vmax.f32 %v2084_v47, 0.0  ;;  %v2087_v4 = vadd.f32 %v4516_v35, %v3660_v53  ;;  %v2078_v10 = vpop.f32.mrb[47].mxu1 }
 0x200   :  { %v1687_v12 = vadd.f32 %v4516_v35, %v3560_v43  ;;  %v1678_v45 = vpop.f32.mrb[135].mxu0  ;;  %2810 = vmatprep.mubr.bf16.mxu1 %v3090_v30  ;;  %v2304_v55 = vmax.f32 %v1684_v41, 0.0  ;;  %v2402_v5 = vmax.f32 %v2076_v18, 0.0  ;;  %v2079_v8 = vadd.f32 %v4516_v35, %v2078_v10  ;;  %v3663_v17 = vpop.f32.mrb[48].mxu1 }
 0x201   :  { %v1679_v52 = vadd.f32 %v4516_v35, %v1678_v45  ;;  %v2302_v27 = vmax.f32 %v1676_v61, 0.0  ;;  %v2405_v13 = vmax.f32 %v2087_v4, 0.0  ;;  %v2100_v21 = vadd.f32 %v4516_v35, %v3663_v17  ;;  %v2091_v57 = vpop.f32.mrb[49].mxu1 }
 0x202   :  { %v2305_v58 = vmax.f32 %v1687_v12, 0.0  ;;  %v2403_v50 = vmax.f32 %v2079_v8, 0.0  ;;  %v2092_v41 = vadd.f32 %v4516_v35, %v2091_v57  ;;  %v3664_v42 = vpop.f32.mrb[50].mxu1 }
 0x203   :  { %v2303_v34 = vmax.f32 %v1679_v52, 0.0  ;;  %v4670_v19 = vpack.c.bf16 %v2405_v13, %v2404_v62  ;;  %v2408_v51 = vmax.f32 %v2100_v21, 0.0  ;;  %v2103_v12 = vadd.f32 %v4516_v35, %v3664_v42  ;;  %v2094_v45 = vpop.f32.mrb[51].mxu1 }
 0x204   :  { %v4665_v11 = vpack.c.bf16 %v2305_v58, %v2304_v55  ;;  %v4674_v60 = vpack.c.bf16 %v2403_v50, %v2402_v5  ;;  %v2406_v52 = vmax.f32 %v2092_v41, 0.0  ;;  %v2095_v18 = vadd.f32 %v4516_v35, %v2094_v45  ;;  %v3667_v10 = vpop.f32.mrb[52].mxu1 }
 0x205   :  { %v4667_v15 = vpack.c.bf16 %v2303_v34, %v2302_v27  ;;  %v3563_v16 = vpop.f32.mrb[136].mxu0  ;;  %v2409_v55 = vmax.f32 %v2103_v12, 0.0  ;;  %v2116_v8 = vadd.f32 %v4516_v35, %v3667_v10 }
 0x206   :  { %v1700_v20 = vadd.f32 %v4516_v35, %v3563_v16  ;;  %v1691_v46 = vpop.f32.mrb[137].mxu0  ;;  %v2407_v4 = vmax.f32 %v2095_v18, 0.0 }
 0x207   :  { %v1692_v40 = vadd.f32 %v4516_v35, %v1691_v46  ;;  %v3564_v0 = vpop.f32.mrb[138].mxu0  ;;  %v4686_v5 = vpack.c.bf16 %v2409_v55, %v2408_v51  ;;  %v2107_v46 = vpop.f32.mrb[53].mxu1  ;;  %v2412_v57 = vmax.f32 %v2116_v8, 0.0 }
 0x208   :  { %v1703_v30 = vadd.f32 %v4516_v35, %v3564_v0  ;;  %v1694_v31 = vpop.f32.mrb[139].mxu0  ;;  %v2308_v61 = vmax.f32 %v1700_v20, 0.0  ;;  %v4690_v50 = vpack.c.bf16 %v2407_v4, %v2406_v52  ;;  %v3668_v0 = vpop.f32.mrb[54].mxu1 }
 0x209   :  { %v1695_v38 = vadd.f32 %v4516_v35, %v1694_v31  ;;  %v2306_v47 = vmax.f32 %v1692_v40, 0.0  ;;  %4856 = vst [vmem:[#allocation2_spill] sm:$0xff] %v4686_v5  ;;  %v2108_v40 = vadd.f32 %v4516_v35, %v2107_v46  ;;  %v2110_v41 = vpop.f32.mrb[55].mxu1 }
 0x20a   :  { %v2309_v43 = vmax.f32 %v1703_v30, 0.0  ;;  %v2111_v51 = vadd.f32 %v4516_v35, %v2110_v41  ;;  %v3671_v18 = vpop.f32.mrb[56].mxu1 }
 0x20b   :  { %v2307_v48 = vmax.f32 %v1695_v38, 0.0  ;;  %v2119_v38 = vadd.f32 %v4516_v35, %v3668_v0  ;;  %v2132_v10 = vadd.f32 %v4516_v35, %v3671_v18 }
 0x20c   :  { %v4681_v53 = vpack.c.bf16 %v2309_v43, %v2308_v61  ;;  %v2410_v43 = vmax.f32 %v2108_v40, 0.0  ;;  %v2411_v52 = vmax.f32 %v2111_v51, 0.0 }
 0x20d   :  { %v4683_v58 = vpack.c.bf16 %v2307_v48, %v2306_v47  ;;  %v3567_v62 = vpop.f32.mrb[140].mxu0  ;;  %v2413_v45 = vmax.f32 %v2119_v38, 0.0 }
 0x20e   :  { %v1716_v27 = vadd.f32 %v4516_v35, %v3567_v62  ;;  %v1707_v34 = vpop.f32.mrb[141].mxu0  ;;  %v4706_v8 = vpack.c.bf16 %v2411_v52, %v2410_v43 }
 0x20f   :  { %v1708_v13 = vadd.f32 %v4516_v35, %v1707_v34  ;;  %v3568_v16 = vpop.f32.mrb[142].mxu0  ;;  %v4702_v4 = vpack.c.bf16 %v2413_v45, %v2412_v57 }
 0x210   :  { %v1719_v17 = vadd.f32 %v4516_v35, %v3568_v16  ;;  %v1710_v20 = vpop.f32.mrb[143].mxu0  ;;  %v2312_v30 = vmax.f32 %v1716_v27, 0.0 }
 0x211   :  { %v1711_v21 = vadd.f32 %v4516_v35, %v1710_v20  ;;  %v2310_v42 = vmax.f32 %v1708_v13, 0.0 }
 0x212   :  { %v2313_v31 = vmax.f32 %v1719_v17, 0.0  ;;  %v2123_v17 = vpop.f32.mrb[57].mxu1 }
 0x213   :  { %v2311_v61 = vmax.f32 %v1711_v21, 0.0  ;;  %v2124_v46 = vadd.f32 %v4516_v35, %v2123_v17  ;;  %v3672_v21 = vpop.f32.mrb[58].mxu1 }
 0x214   :  { %v4697_v12 = vpack.c.bf16 %v2313_v31, %v2312_v30  ;;  %v2416_v30 = vmax.f32 %v2132_v10, 0.0  ;;  %v2135_v31 = vadd.f32 %v4516_v35, %v3672_v21  ;;  %v2126_v57 = vpop.f32.mrb[59].mxu1 }
 0x215   :  { %v4699_v47 = vpack.c.bf16 %v2311_v61, %v2310_v42  ;;  %v3571_v48 = vpop.f32.mrb[144].mxu0  ;;  %v2414_v42 = vmax.f32 %v2124_v46, 0.0  ;;  %v2127_v61 = vadd.f32 %v4516_v35, %v2126_v57 }
 0x216   :  { %v1732_v55 = vadd.f32 %v4516_v35, %v3571_v48  ;;  %v1723_v62 = vpop.f32.mrb[145].mxu0  ;;  %v2417_v51 = vmax.f32 %v2135_v31, 0.0 }
 0x217   :  { %v1724_v27 = vadd.f32 %v4516_v35, %v1723_v62  ;;  %v3572_v34 = vpop.f32.mrb[146].mxu0  ;;  %v2415_v52 = vmax.f32 %v2127_v61, 0.0 }
 0x218   :  { %v1735_v13 = vadd.f32 %v4516_v35, %v3572_v34  ;;  %v1726_v16 = vpop.f32.mrb[147].mxu0  ;;  %v2316_v40 = vmax.f32 %v1732_v55, 0.0  ;;  %v4714_v34 = vpack.c.bf16 %v2417_v51, %v2416_v30 }
 0x219   :  { %v1727_v20 = vadd.f32 %v4516_v35, %v1726_v16  ;;  %v2314_v38 = vmax.f32 %v1724_v27, 0.0  ;;  %v3675_v27 = vpop.f32.mrb[60].mxu1 }
 0x21a   :  { %v2317_v0 = vmax.f32 %v1735_v13, 0.0  ;;  %v4717_v13 = vpack.c.bf16 %v2415_v52, %v2414_v42  ;;  %v2139_v46 = vpop.f32.mrb[61].mxu1 }
 0x21b   :  { %v2315_v41 = vmax.f32 %v1727_v20, 0.0  ;;  %v2148_v20 = vadd.f32 %v4516_v35, %v3675_v27 }
 0x21c   :  { %v2507_v43 = vpack.c.bf16 %v2317_v0, %v2316_v40  ;;  %v2140_v40 = vadd.f32 %v4516_v35, %v2139_v46  ;;  %v3676_v0 = vpop.f32.mrb[62].mxu1 }
 0x21d   :  { %v2506_v45 = vpack.c.bf16 %v2315_v41, %v2314_v38  ;;  %v3575_v48 = vpop.f32.mrb[148].mxu0  ;;  %v2420_v57 = vmax.f32 %v2148_v20, 0.0  ;;  %v2151_v38 = vadd.f32 %v4516_v35, %v3676_v0  ;;  %v2142_v41 = vpop.f32.mrb[63].mxu1 }
 0x21e   :  { %v1748_v18 = vadd.f32 %v4516_v35, %v3575_v48  ;;  %v1739_v62 = vpop.f32.mrb[149].mxu0  ;;  %v2418_v51 = vmax.f32 %v2140_v40, 0.0 }
 0x21f   :  { %v1740_v55 = vadd.f32 %v4516_v35, %v1739_v62  ;;  %v3576_v10 = vpop.f32.mrb[150].mxu0  ;;  %3321 = vmatprep.subr.bf16.mxu1 %v2506_v45  ;;  %v2421_v48 = vmax.f32 %v2151_v38, 0.0 }
 0x220   :  { %v1751_v16 = vadd.f32 %v4516_v35, %v3576_v10  ;;  %v1742_v17 = vpop.f32.mrb[151].mxu0  ;;  %3322 = vmatpush3.bf16.msra.mxu1 %v4651_v6  ;;  %v2320_v30 = vmax.f32 %v1748_v18, 0.0  ;;  %v2143_v6 = vadd.f32 %v4516_v35, %v2142_v41  ;;  %v3679_v10 = vpop.f32.mrb[64].mxu1 }
 0x221   :  { %v1743_v21 = vadd.f32 %v4516_v35, %v1742_v17  ;;  %3323 = vmatprep.subr.bf16.mxu1 %v2507_v43  ;;  %v2318_v42 = vmax.f32 %v1740_v55, 0.0  ;;  %v2164_v17 = vadd.f32 %v4516_v35, %v3679_v10  ;;  %v2155_v40 = vpop.f32.mrb[65].mxu1 }
 0x222   :  { %v2321_v31 = vmax.f32 %v1751_v16, 0.0  ;;  %v2419_v62 = vmax.f32 %v2143_v6, 0.0  ;;  %v4728_v16 = vpack.c.bf16 %v2421_v48, %v2420_v57 }
 0x223   :  { %v2319_v61 = vmax.f32 %v1743_v21, 0.0  ;;  %v2424_v41 = vmax.f32 %v2164_v17, 0.0 }
 0x224   :  { %v2509_v45 = vpack.c.bf16 %v2321_v31, %v2320_v30  ;;  %3324 = vmatpush3.bf16.msra.mxu1 %v4646_v25  ;;  %v4732_v46 = vpack.c.bf16 %v2419_v62, %v2418_v51  ;;  %v2156_v30 = vadd.f32 %v4516_v35, %v2155_v40  ;;  %v3680_v31 = vpop.f32.mrb[66].mxu1 }
 0x225   :  { %v2508_v52 = vpack.c.bf16 %v2319_v61, %v2318_v42  ;;  %v3579_v43 = vpop.f32.mrb[152].mxu0  ;;  %v2167_v42 = vadd.f32 %v4516_v35, %v3680_v31  ;;  %v2158_v61 = vpop.f32.mrb[67].mxu1 }
 0x226   :  { %v1764_v18 = vadd.f32 %v4516_v35, %v3579_v43  ;;  %v1755_v27 = vpop.f32.mrb[153].mxu0  ;;  %v2422_v48 = vmax.f32 %v2156_v30, 0.0  ;;  %v3249_v43 = vpop.f32.mrb[68].mxu1 }
 0x227   :  { %v1756_v55 = vadd.f32 %v4516_v35, %v1755_v27  ;;  %v3580_v20 = vpop.f32.mrb[154].mxu0  ;;  %3325 = vmatprep.subr.bf16.mxu1 %v2508_v52  ;;  %v2159_v52 = vadd.f32 %v4516_v35, %v2158_v61  ;;  %v2425_v62 = vmax.f32 %v2167_v42, 0.0 }
 0x228   :  { %v1767_v25 = vadd.f32 %v4516_v35, %v3580_v20  ;;  %v1758_v21 = vpop.f32.mrb[155].mxu0  ;;  %3326 = vmatpush3.bf16.msra.mxu1 %v4667_v15  ;;  %v2324_v57 = vmax.f32 %v1764_v18, 0.0 }
 0x229   :  { %v1759_v0 = vadd.f32 %v4516_v35, %v1758_v21  ;;  %3327 = vmatprep.subr.bf16.mxu1 %v2509_v45  ;;  %v2322_v51 = vmax.f32 %v1756_v55, 0.0  ;;  %v3250_v45 = vpop.f32.mrb[69].mxu1  ;;  %v2423_v20 = vmax.f32 %v2159_v52, 0.0  ;;  %v4744_v55 = vpack.c.bf16 %v2425_v62, %v2424_v41 }
 0x22a   :  { %v2325_v38 = vmax.f32 %v1767_v25, 0.0  ;;  %v4741_v18 = vadd.f32 %v3250_v45, %v3249_v43  ;;  %v3252_v17 = vpop.f32.mrb[70].mxu1 }
 0x22b   :  { %v2323_v6 = vmax.f32 %v1759_v0, 0.0  ;;  %4857 = vst [vmem:[#allocation3_spill] sm:$0xff] %v4744_v55  ;;  %v3253_v40 = vpop.f32.mrb[71].mxu1  ;;  %v4747_v31 = vpack.c.bf16 %v2423_v20, %v2422_v48 }
 0x22c   :  { %v2511_v15 = vpack.c.bf16 %v2325_v38, %v2324_v57  ;;  %3328 = vmatpush3.bf16.msra.mxu1 %v4665_v11  ;;  %v3089_v40 = vcombine.low %v4641_v14, %v4641_v14 }
 0x22d   :  { %v2510_v10 = vpack.c.bf16 %v2323_v6, %v2322_v51  ;;  %v3583_v27 = vpop.f32.mrb[156].mxu0 }
 0x22e   :  { %v1780_v25 = vadd.f32 %v4516_v35, %v3583_v27  ;;  %v1771_v21 = vpop.f32.mrb[157].mxu0 }
 0x22f   :  { %v1772_v0 = vadd.f32 %v4516_v35, %v1771_v21  ;;  %v3584_v30 = vpop.f32.mrb[158].mxu0  ;;  %3329 = vmatprep.subr.bf16.mxu1 %v2510_v10 }
 0x230   :  { %v1783_v11 = vadd.f32 %v4516_v35, %v3584_v30  ;;  %v1774_v57 = vpop.f32.mrb[159].mxu0  ;;  %3330 = vmatpush3.bf16.msra.mxu1 %v4683_v58  ;;  %v2328_v42 = vmax.f32 %v1780_v25, 0.0 }
 0x231   :  { %v1775_v38 = vadd.f32 %v4516_v35, %v1774_v57  ;;  %3331 = vmatprep.subr.bf16.mxu1 %v2511_v15  ;;  %v2326_v51 = vmax.f32 %v1772_v0, 0.0 }
 0x232   :  { %v2329_v61 = vmax.f32 %v1783_v11, 0.0 }
 0x233   :  { %v2327_v41 = vmax.f32 %v1775_v38, 0.0 }
 0x234   :  { %v2513_v6 = vpack.c.bf16 %v2329_v61, %v2328_v42  ;;  %3332 = vmatpush3.bf16.msra.mxu1 %v4681_v53  ;;  %v4761_v53 = vld [vmem:[%s4853_s1 + $0x28] sm:$0xff] }
 0x235   :  { %v2512_v52 = vpack.c.bf16 %v2327_v41, %v2326_v51  ;;  %v3587_v43 = vpop.f32.mrb[160].mxu0 }
 0x236   :  { %v1796_v48 = vadd.f32 %v4516_v35, %v3587_v43  ;;  %v1787_v62 = vpop.f32.mrb[161].mxu0 }
 0x237   :  { %v1788_v45 = vadd.f32 %v4516_v35, %v1787_v62  ;;  %v3588_v10 = vpop.f32.mrb[162].mxu0  ;;  %3333 = vmatprep.subr.bf16.mxu1 %v2512_v52 }
 0x238   :  { %v1799_v58 = vadd.f32 %v4516_v35, %v3588_v10  ;;  %v1790_v27 = vpop.f32.mrb[163].mxu0  ;;  %3334 = vmatpush3.bf16.msra.mxu1 %v4699_v47  ;;  %v2332_v20 = vmax.f32 %v1796_v48, 0.0  ;;  %v3092_v47 = vcombine.high %v4761_v53, %v4761_v53 }
 0x239   :  { %v1791_v15 = vadd.f32 %v4516_v35, %v1790_v27  ;;  %3335 = vmatprep.subr.bf16.mxu1 %v2513_v6  ;;  %v2330_v25 = vmax.f32 %v1788_v45, 0.0 }
 0x23a   :  { %v2333_v17 = vmax.f32 %v1799_v58, 0.0 }
 0x23b   :  { %v2331_v21 = vmax.f32 %v1791_v15, 0.0 }
 0x23c   :  { %v4765_v0 = vpack.c.bf16 %v2333_v17, %v2332_v20  ;;  %3336 = vmatpush3.bf16.msra.mxu1 %v4697_v12 }
 0x23d   :  { %v4770_v30 = vpack.c.bf16 %v2331_v21, %v2330_v25  ;;  %v3591_v11 = vpop.f32.mrb[164].mxu0 }
 0x23e   :  { %v1812_v57 = vadd.f32 %v4516_v35, %v3591_v11  ;;  %v1803_v38 = vpop.f32.mrb[165].mxu0 }
 0x23f   :  { %v1804_v42 = vadd.f32 %v4516_v35, %v1803_v38  ;;  %v3592_v61 = vpop.f32.mrb[166].mxu0  ;;  %2811 = vmatmul.mubr.bf16.vlgmr.msra.gmra.mrb[84].mxu1 %v3089_v40 }
 0x240   :  { %v1815_v51 = vadd.f32 %v4516_v35, %v3592_v61  ;;  %v1806_v14 = vpop.f32.mrb[167].mxu0  ;;  %2850 = vmatprep.mubr.bf16.mxu1 %v3092_v47  ;;  %v2336_v12 = vmax.f32 %v1812_v57, 0.0 }
 0x241   :  { %v1807_v41 = vadd.f32 %v4516_v35, %v1806_v14  ;;  %v2334_v52 = vmax.f32 %v1804_v42, 0.0 }
 0x242   :  { %v2337_v6 = vmax.f32 %v1815_v51, 0.0 }
 0x243   :  { %v2335_v43 = vmax.f32 %v1807_v41, 0.0 }
 0x244   :  { %v4776_v48 = vpack.c.bf16 %v2337_v6, %v2336_v12  ;;  %v3850_v12 = vld [vmem:[%s4854_s3] ss:$0 sm:$0xff] }
 0x245   :  { %v4778_v62 = vpack.c.bf16 %v2335_v43, %v2334_v52  ;;  %v3595_v45 = vpop.f32.mrb[168].mxu0 }
 0x246   :  { %v1828_v10 = vadd.f32 %v4516_v35, %v3595_v45  ;;  %v1819_v58 = vpop.f32.mrb[169].mxu0 }
 0x247   :  { %v1820_v27 = vadd.f32 %v4516_v35, %v1819_v58  ;;  %v3596_v15 = vpop.f32.mrb[170].mxu0 }
 0x248   :  { %v1831_v20 = vadd.f32 %v4516_v35, %v3596_v15  ;;  %v1822_v17 = vpop.f32.mrb[171].mxu0  ;;  %v2340_v21 = vmax.f32 %v1828_v10, 0.0 }
 0x249   :  { %v1823_v25 = vadd.f32 %v4516_v35, %v1822_v17  ;;  %v2338_v47 = vmax.f32 %v1820_v27, 0.0 }
 0x24a   :  { %v2341_v40 = vmax.f32 %v1831_v20, 0.0 }
 0x24b   :  { %v2339_v11 = vmax.f32 %v1823_v25, 0.0 }
 0x24c   :  { %v4784_v57 = vpack.c.bf16 %v2341_v40, %v2340_v21 }
 0x24d   :  { %v4786_v38 = vpack.c.bf16 %v2339_v11, %v2338_v47  ;;  %v3599_v42 = vpop.f32.mrb[172].mxu0 }
 0x24e   :  { %v1844_v61 = vadd.f32 %v4516_v35, %v3599_v42  ;;  %v1835_v51 = vpop.f32.mrb[173].mxu0 }
 0x24f   :  { %v1836_v14 = vadd.f32 %v4516_v35, %v1835_v51  ;;  %v3600_v41 = vpop.f32.mrb[174].mxu0 }
 0x250   :  { %v1847_v6 = vadd.f32 %v3850_v12, %v3600_v41  ;;  %v1838_v52 = vpop.f32.mrb[175].mxu0  ;;  %v2344_v45 = vmax.f32 %v1844_v61, 0.0 }
 0x251   :  { %v1839_v43 = vadd.f32 %v3850_v12, %v1838_v52  ;;  %v2342_v27 = vmax.f32 %v1836_v14, 0.0 }
 0x252   :  { %v2345_v10 = vmax.f32 %v1847_v6, 0.0  ;;  %v3271_v58 = vpop.f32.mrb[72].mxu1 }
 0x253   :  { %v2343_v15 = vmax.f32 %v1839_v43, 0.0  ;;  %v3272_v20 = vpop.f32.mrb[73].mxu1 }
 0x254   :  { %v4793_v17 = vpack.c.bf16 %v2345_v10, %v2344_v45  ;;  %v3273_v25 = vadd.f32 %v3272_v20, %v3271_v58  ;;  %v3274_v21 = vpop.f32.mrb[74].mxu1 }
 0x255   :  { %v2520_v40 = vpack.c.bf16 %v2343_v15, %v2342_v27  ;;  %v3603_v35 = vpop.f32.mrb[176].mxu0  ;;  %v3275_v47 = vpop.f32.mrb[75].mxu1 }
 0x256   :  { %v1860_v11 = vadd.f32 %v3850_v12, %v3603_v35  ;;  %v1851_v42 = vpop.f32.mrb[177].mxu0  ;;  %v4796_v51 = vadd.f32 %v3273_v25, %v4741_v18 }
 0x257   :  { %v1852_v41 = vadd.f32 %v3850_v12, %v1851_v42  ;;  %v3604_v52 = vpop.f32.mrb[178].mxu0 }
 0x258   :  { %v1863_v61 = vadd.f32 %v3850_v12, %v3604_v52  ;;  %v1854_v6 = vpop.f32.mrb[179].mxu0  ;;  %v2348_v14 = vmax.f32 %v1860_v11, 0.0 }
 0x259   :  { %v1855_v5 = vadd.f32 %v3850_v12, %v1854_v6  ;;  %v2346_v55 = vmax.f32 %v1852_v41, 0.0 }
 0x25a   :  { %v2349_v43 = vmax.f32 %v1863_v61, 0.0 }
 0x25b   :  { %v2347_v45 = vmax.f32 %v1855_v5, 0.0 }
 0x25c   :  { %v2523_v10 = vpack.c.bf16 %v2349_v43, %v2348_v14 }
 0x25d   :  { %v2522_v58 = vpack.c.bf16 %v2347_v45, %v2346_v55  ;;  %v3607_v20 = vpop.f32.mrb[180].mxu0 }
 0x25e   :  { %v1876_v27 = vadd.f32 %v3850_v12, %v3607_v20  ;;  %v1867_v15 = vpop.f32.mrb[181].mxu0 }
 0x25f   :  { %v1868_v21 = vadd.f32 %v3850_v12, %v1867_v15  ;;  %v3608_v35 = vpop.f32.mrb[182].mxu0  ;;  %3343 = vmatprep.subr.bf16.mxu1 %v2522_v58 }
 0x260   :  { %v1879_v47 = vadd.f32 %v3850_v12, %v3608_v35  ;;  %v1870_v18 = vpop.f32.mrb[183].mxu0  ;;  %3344 = vmatpush3.bf16.msra.mxu1 %v4770_v30  ;;  %v2352_v42 = vmax.f32 %v1876_v27, 0.0 }
 0x261   :  { %v1871_v25 = vadd.f32 %v3850_v12, %v1870_v18  ;;  %3345 = vmatprep.subr.bf16.mxu1 %v2523_v10  ;;  %v2350_v11 = vmax.f32 %v1868_v21, 0.0 }
 0x262   :  { %v2353_v52 = vmax.f32 %v1879_v47, 0.0 }
 0x263   :  { %v2351_v61 = vmax.f32 %v1871_v25, 0.0 }
 0x264   :  { %v2525_v41 = vpack.c.bf16 %v2353_v52, %v2352_v42  ;;  %3346 = vmatpush3.bf16.msra.mxu1 %v4765_v0 }
 0x265   :  { %v2524_v5 = vpack.c.bf16 %v2351_v61, %v2350_v11  ;;  %v3611_v55 = vpop.f32.mrb[184].mxu0 }
 0x266   :  { %v1892_v6 = vadd.f32 %v3850_v12, %v3611_v55  ;;  %v1883_v14 = vpop.f32.mrb[185].mxu0 }
 0x267   :  { %v1884_v43 = vadd.f32 %v3850_v12, %v1883_v14  ;;  %v3612_v45 = vpop.f32.mrb[186].mxu0  ;;  %3347 = vmatprep.subr.bf16.mxu1 %v2524_v5 }
 0x268   :  { %v1895_v58 = vadd.f32 %v3850_v12, %v3612_v45  ;;  %v1886_v20 = vpop.f32.mrb[187].mxu0  ;;  %3348 = vmatpush3.bf16.msra.mxu1 %v4778_v62  ;;  %v2356_v10 = vmax.f32 %v1892_v6, 0.0  ;;  %v2432_v62 = vld [vmem:[%s4853_s1 + $0x30] sm:$0xff] }
 0x269   :  { %v1887_v30 = vadd.f32 %v3850_v12, %v1886_v20  ;;  %3349 = vmatprep.subr.bf16.mxu1 %v2525_v41  ;;  %v2354_v15 = vmax.f32 %v1884_v43, 0.0  ;;  %v3091_v12 = vcombine.low %v4761_v53, %v4761_v53 }
 0x26a   :  { %v2357_v27 = vmax.f32 %v1895_v58, 0.0 }
 0x26b   :  { %v2355_v21 = vmax.f32 %v1887_v30, 0.0 }
 0x26c   :  { %v2527_v35 = vpack.c.bf16 %v2357_v27, %v2356_v10  ;;  %3350 = vmatpush3.bf16.msra.mxu1 %v4776_v48  ;;  %v3094_v48 = vcombine.high %v2432_v62, %v2432_v62 }
 0x26d   :  { %v2526_v0 = vpack.c.bf16 %v2355_v21, %v2354_v15 }
 0x26f   :  { %3351 = vmatprep.subr.bf16.mxu1 %v2526_v0 }
 0x270   :  { %3352 = vmatpush3.bf16.msra.mxu1 %v4786_v38 }
 0x271   :  { %3353 = vmatprep.subr.bf16.mxu1 %v2527_v35 }
 0x274   :  { %3354 = vmatpush3.bf16.msra.mxu1 %v4784_v57 }
 0x275   :  { %3355 = vmatprep.subr.bf16.mxu1 %v4485_v63 }
 0x278   :  { %3356 = vmatpush3.bf16.msra.mxu1 %v2520_v40 }
 0x279   :  { %3357 = vmatprep.subr.bf16.mxu1 %v4482_v37 }
 0x27c   :  { %3358 = vmatpush3.bf16.msra.mxu1 %v4793_v17 }
 0x27d   :  { %3365 = vmatprep.subr.bf16.mxu1 %v4578_v2 }
 0x27f   :  { %2851 = vmatmul.mubr.bf16.vlgmr.msra.gmra.mrb[88].mxu1 %v3091_v12 }
 0x280   :  { %3366 = vmatpush3.bf16.msra.mxu1 %v4504_v7  ;;  %2890 = vmatprep.mubr.bf16.mxu1 %v3094_v48 }
 0x281   :  { %3367 = vmatprep.subr.bf16.mxu1 %v4575_v32 }
 0x284   :  { %3368 = vmatpush3.bf16.msra.mxu1 %v4501_v26 }
 0x285   :  { %3369 = vmatprep.subr.bf16.mxu1 %v4591_v54 }
 0x288   :  { %3370 = vmatpush3.bf16.msra.mxu1 %v4530_v59 }
 0x289   :  { %3371 = vmatprep.subr.bf16.mxu1 %v4588_v9 }
 0x28c   :  { %3372 = vmatpush3.bf16.msra.mxu1 %v4527_v3  ;;  %v2433_v3 = vld [vmem:[%s4853_s1 + $0x38] sm:$0xff] }
 0x28d   :  { %3373 = vmatprep.subr.bf16.mxu1 %v4605_v49  ;;  %v3096_v2 = vcombine.high %v2433_v3, %v2433_v3 }
 0x290   :  { %3374 = vmatpush3.bf16.msra.mxu1 %v4546_v28  ;;  %v3093_v28 = vcombine.low %v2432_v62, %v2432_v62 }
 0x291   :  { %3375 = vmatprep.subr.bf16.mxu1 %v4602_v56 }
 0x292   :  { %v3293_v37 = vpop.f32.mrb[76].mxu1 }
 0x293   :  { %v3294_v63 = vpop.f32.mrb[77].mxu1 }
 0x294   :  { %3376 = vmatpush3.bf16.msra.mxu1 %v4543_v23  ;;  %v3295_v7 = vadd.f32 %v3294_v63, %v3293_v37  ;;  %v3296_v26 = vpop.f32.mrb[78].mxu1  ;;  %v4858_v23 = vld [vmem:[#allocation3_spill] sm:$0xff] }
 0x295   :  { %3377 = vmatprep.subr.bf16.mxu1 %v4620_v33  ;;  %v3297_v32 = vpop.f32.mrb[79].mxu1 }
 0x296   :  { %v2733_v59 = vadd.f32 %v3295_v7, %v4796_v51 }
 0x298   :  { %3378 = vmatpush3.bf16.msra.mxu1 %v4562_v29  ;;  %v4859_v29 = vld [vmem:[#allocation2_spill] sm:$0xff] }
 0x299   :  { %3379 = vmatprep.subr.bf16.mxu1 %v4616_v24 }
 0x29c   :  { %3380 = vmatpush3.bf16.msra.mxu1 %v4559_v22  ;;  %v3095_v22 = vcombine.low %v2433_v3, %v2433_v3 }
 0x29d   :  { %3387 = vmatprep.subr.bf16.mxu1 %v4706_v8 }
 0x29f   :  { %2891 = vmatmul.mubr.bf16.vlgmr.msra.gmra.mrb[92].mxu1 %v3093_v28 }
 0x2a0   :  { %3388 = vmatpush3.bf16.msra.mxu1 %v4631_v36  ;;  %2930 = vmatprep.mubr.bf16.mxu1 %v3096_v2 }
 0x2a1   :  { %3389 = vmatprep.subr.bf16.mxu1 %v4702_v4 }
 0x2a4   :  { %3390 = vmatpush3.bf16.msra.mxu1 %v4627_v1 }
 0x2a5   :  { %3391 = vmatprep.subr.bf16.mxu1 %v4717_v13 }
 0x2a8   :  { %3392 = vmatpush3.bf16.msra.mxu1 %v4657_v39 }
 0x2a9   :  { %3393 = vmatprep.subr.bf16.mxu1 %v4714_v34 }
 0x2ac   :  { %3394 = vmatpush3.bf16.msra.mxu1 %v4654_v44 }
 0x2ad   :  { %3395 = vmatprep.subr.bf16.mxu1 %v4732_v46 }
 0x2b0   :  { %3396 = vmatpush3.bf16.msra.mxu1 %v4674_v60 }
 0x2b1   :  { %3397 = vmatprep.subr.bf16.mxu1 %v4728_v16 }
 0x2b4   :  { %3398 = vmatpush3.bf16.msra.mxu1 %v4670_v19 }
 0x2b5   :  { %3399 = vmatprep.subr.bf16.mxu1 %v4747_v31 }
 0x2b8   :  { %3400 = vmatpush3.bf16.msra.mxu1 %v4690_v50 }
 0x2b9   :  { %3401 = vmatprep.subr.bf16.mxu1 %v4858_v23 }
 0x2bc   :  { %3402 = vmatpush3.bf16.msra.mxu1 %v4859_v29 }
 0x2bf   :  { %2931 = vmatmul.mubr.bf16.vlgmr.msra.gmra.mrb[96].mxu1 %v3095_v22 }
 0x2d2   :  { %v3315_v9 = vpop.f32.mrb[80].mxu1 }
 0x2d3   :  { %v3316_v54 = vpop.f32.mrb[81].mxu1 }
 0x2d4   :  { %v3317_v56 = vadd.f32 %v3316_v54, %v3315_v9  ;;  %v3318_v49 = vpop.f32.mrb[82].mxu1 }
 0x2d5   :  { %v3319_v24 = vpop.f32.mrb[83].mxu1 }
 0x2d6   :  { %v2773_v33 = vadd.f32 %v3317_v56, %v2733_v59 }
 0x312   :  { %v3337_v1 = vpop.f32.mrb[84].mxu1 }
 0x313   :  { %v3338_v36 = vpop.f32.mrb[85].mxu1 }
 0x314   :  { %v3339_v44 = vadd.f32 %v3338_v36, %v3337_v1  ;;  %v3340_v39 = vpop.f32.mrb[86].mxu1 }
 0x315   :  { %v3341_v19 = vpop.f32.mrb[87].mxu1 }
 0x316   :  { %v2813_v60 = vadd.f32 %v3339_v44, %v2773_v33 }
 0x352   :  { %v3359_v4 = vpop.f32.mrb[88].mxu1 }
 0x353   :  { %v3360_v50 = vpop.f32.mrb[89].mxu1 }
 0x354   :  { %v3361_v8 = vadd.f32 %v3360_v50, %v3359_v4  ;;  %v3362_v34 = vpop.f32.mrb[90].mxu1 }
 0x355   :  { %v3363_v13 = vpop.f32.mrb[91].mxu1 }
 0x356   :  { %v2853_v16 = vadd.f32 %v3361_v8, %v2813_v60 }
 0x372   :  { %v3381_v46 = vpop.f32.mrb[92].mxu1 }
 0x373   :  { %v3382_v31 = vpop.f32.mrb[93].mxu1 }
 0x374   :  { %v3383_v53 = vadd.f32 %v3382_v31, %v3381_v46  ;;  %v3384_v57 = vpop.f32.mrb[94].mxu1 }
 0x375   :  { %v3385_v38 = vpop.f32.mrb[95].mxu1 }
 0x376   :  { %v2893_v17 = vadd.f32 %v3383_v53, %v2853_v16 }
 0x392   :  { %v3403_v40 = vpop.f32.mrb[96].mxu1 }
 0x393   :  { %v3404_v51 = vpop.f32.mrb[97].mxu1 }
 0x394   :  { %v3405_v47 = vadd.f32 %v3404_v51, %v3403_v40  ;;  %v3406_v18 = vpop.f32.mrb[98].mxu1 }
 0x395   :  { %v3407_v25 = vpop.f32.mrb[99].mxu1 }
 0x396   :  { %v2933_v42 = vadd.f32 %v3405_v47, %v2893_v17 }
 0x398   :  { %v2938_v52 = vmul.f32 0.00390625, %v2933_v42 }
 0x39a   :  { %2939 = vst [vmem:[%s4855_s4] sm:$0xff] %v2938_v52 }

// kernel: feature_extractor_forward.3
= control target key start
LH: loop header
LB: loop body
LE: loop exit
PB: predicated region body
PF: predicated region fallthrough
CT: control target
= control target key end

     0   :  { %v6576_v3 = vmov 0   ;;  %s8978_s1 = inlined_call_operand.vmem [shape: bf16[128,1024], index: 1, kind: input, shape index: {}]   ;;  %s8979_s0 = inlined_call_operand.vmem [shape: f32[8,128], index: 0, kind: input, shape index: {}]   ;;  %s8980_s3 = inlined_call_operand.vmem [shape: bf16[1024,1024], index: 3, kind: input, shape index: {}]   ;;  %s8981_s2 = inlined_call_operand.vmem [shape: f32[1,1024], index: 2, kind: input, shape index: {}]   ;;  %s8982_s5 = inlined_call_operand.vmem [shape: bf16[1024,256], index: 5, kind: input, shape index: {}]   ;;  %s8983_s4 = inlined_call_operand.vmem [shape: f32[1,1024], index: 4, kind: input, shape index: {}]   ;;  %s8984_s7 = inlined_call_operand.vmem [shape: bf16[256,128], index: 7, kind: input, shape index: {}]   ;;  %s8985_s6 = inlined_call_operand.vmem [shape: f32[1,256], index: 6, kind: input, shape index: {}]   ;;  %s8986_s8 = inlined_call_operand.vmem [shape: f32[1,128], index: 8, kind: input, shape index: {}]   ;;  %s8987_s9 = inlined_call_operand.vmem [shape: f32[8,128], index: 9, kind: output, shape index: {}]  }
   0x1   :  { %v35_v0 = vld [vmem:[%s8978_s1] sm:$0xff]  ;;  %493 = vmatprep.mubr.bf16.mxu1 %v6576_v3  ;;  %575 = vmatprep.mubr.bf16.mxu0 %v6576_v3  ;;  %v37_v18 = vld [vmem:[%s8978_s1 + $0x10] sm:$0xff]  ;;  %v36_v53 = vld [vmem:[%s8978_s1 + $0x8] sm:$0xff] }
   0x2   :  { %v39_v1 = vld [vmem:[%s8978_s1 + $0x20] sm:$0xff]  ;;  %v41_v19 = vld [vmem:[%s8978_s1 + $0x30] sm:$0xff]  ;;  %v40_v54 = vld [vmem:[%s8978_s1 + $0x28] sm:$0xff] }
   0x3   :  { %v43_v2 = vld [vmem:[%s8978_s1 + $0x40] sm:$0xff]  ;;  %v5556_v4 = vcombine.high %v35_v0, %v39_v1  ;;  %v5555_v5 = vcombine.low %v35_v0, %v39_v1  ;;  %v45_v20 = vld [vmem:[%s8978_s1 + $0x50] sm:$0xff]  ;;  %v5560_v22 = vcombine.high %v37_v18, %v41_v19  ;;  %v5559_v23 = vcombine.low %v37_v18, %v41_v19  ;;  %v44_v60 = vld [vmem:[%s8978_s1 + $0x48] sm:$0xff] }
   0x4   :  { %v47_v6 = vld [vmem:[%s8978_s1 + $0x60] sm:$0xff]  ;;  %v49_v24 = vld [vmem:[%s8978_s1 + $0x70] sm:$0xff]  ;;  %v5558_v59 = vcombine.high %v36_v53, %v40_v54  ;;  %v48_v61 = vld [vmem:[%s8978_s1 + $0x68] sm:$0xff] }
   0x5   :  { %v5564_v7 = vcombine.high %v43_v2, %v47_v6  ;;  %v51_v8 = vld [vmem:[%s8978_s1 + $0x80] sm:$0xff]  ;;  %461 = vmatprep.subr.bf16.mxu1 %v5556_v4  ;;  %v5563_v10 = vcombine.low %v43_v2, %v47_v6  ;;  %v5568_v26 = vcombine.high %v45_v20, %v49_v24  ;;  %v53_v27 = vld [vmem:[%s8978_s1 + $0x90] sm:$0xff]  ;;  %543 = vmatprep.subr.bf16.mxu0 %v5560_v22 }
   0x6   :  { %v55_v9 = vld [vmem:[%s8978_s1 + $0xa0] sm:$0xff]  ;;  %462 = vmatpush1.bf16.msra.mxu1 %v5555_v5  ;;  %v57_v28 = vld [vmem:[%s8978_s1 + $0xb0] sm:$0xff]  ;;  %544 = vmatpush1.bf16.msra.mxu0 %v5559_v23  ;;  %v5567_v31 = vcombine.low %v45_v20, %v49_v24  ;;  %v5557_v2 = vcombine.low %v36_v53, %v40_v54  ;;  %v5566_v4 = vcombine.high %v44_v60, %v48_v61  ;;  %v68_v24 = vld [vmem:[%s8978_s1 + $0x108] sm:$0xff] }
   0x7   :  { %463 = vmatprep.subr.bf16.mxu1 %v5564_v7  ;;  %v5572_v11 = vcombine.high %v51_v8, %v55_v9  ;;  %v59_v12 = vld [vmem:[%s8978_s1 + $0xc0] sm:$0xff]  ;;  %v5571_v14 = vcombine.low %v51_v8, %v55_v9  ;;  %545 = vmatprep.subr.bf16.mxu0 %v5568_v26  ;;  %v5576_v33 = vcombine.high %v53_v27, %v57_v28  ;;  %v61_v35 = vld [vmem:[%s8978_s1 + $0xd0] sm:$0xff]  ;;  %v52_v8 = vld [vmem:[%s8978_s1 + $0x88] sm:$0xff] }
   0x8   :  { %v63_v13 = vld [vmem:[%s8978_s1 + $0xe0] sm:$0xff]  ;;  %v65_v36 = vld [vmem:[%s8978_s1 + $0xf0] sm:$0xff]  ;;  %v5575_v39 = vcombine.low %v53_v27, %v57_v28  ;;  %v56_v9 = vld [vmem:[%s8978_s1 + $0xa8] sm:$0xff] }
   0x9   :  { %v5580_v15 = vcombine.high %v59_v12, %v63_v13  ;;  %v67_v16 = vld [vmem:[%s8978_s1 + $0x100] sm:$0xff]  ;;  %v5579_v21 = vcombine.low %v59_v12, %v63_v13  ;;  %v5584_v41 = vcombine.high %v61_v35, %v65_v36  ;;  %v69_v43 = vld [vmem:[%s8978_s1 + $0x110] sm:$0xff]  ;;  %v5583_v47 = vcombine.low %v61_v35, %v65_v36 }
   0xa   :  { %464 = vmatpush1.bf16.msra.mxu1 %v5563_v10  ;;  %v71_v17 = vld [vmem:[%s8978_s1 + $0x120] sm:$0xff]  ;;  %546 = vmatpush1.bf16.msra.mxu0 %v5567_v31  ;;  %v73_v44 = vld [vmem:[%s8978_s1 + $0x130] sm:$0xff]  ;;  %v5574_v13 = vcombine.high %v52_v8, %v56_v9  ;;  %v5573_v19 = vcombine.low %v52_v8, %v56_v9  ;;  %v62_v9 = vld [vmem:[%s8978_s1 + $0xd8] sm:$0xff] }
   0xb   :  { %465 = vmatprep.subr.bf16.mxu1 %v5572_v11  ;;  %v5588_v25 = vcombine.high %v67_v16, %v71_v17  ;;  %v75_v29 = vld [vmem:[%s8978_s1 + $0x140] sm:$0xff]  ;;  %v5587_v32 = vcombine.low %v67_v16, %v71_v17  ;;  %547 = vmatprep.subr.bf16.mxu0 %v5576_v33  ;;  %v5592_v49 = vcombine.high %v69_v43, %v73_v44  ;;  %v77_v51 = vld [vmem:[%s8978_s1 + $0x150] sm:$0xff]  ;;  %v60_v16 = vld [vmem:[%s8978_s1 + $0xc8] sm:$0xff] }
   0xc   :  { %v79_v30 = vld [vmem:[%s8978_s1 + $0x160] sm:$0xff]  ;;  %v81_v52 = vld [vmem:[%s8978_s1 + $0x170] sm:$0xff]  ;;  %v5591_v55 = vcombine.low %v69_v43, %v73_v44  ;;  %v5565_v11 = vcombine.low %v44_v60, %v48_v61  ;;  %v64_v17 = vld [vmem:[%s8978_s1 + $0xe8] sm:$0xff] }
   0xd   :  { %v5596_v34 = vcombine.high %v75_v29, %v79_v30  ;;  %v83_v37 = vld [vmem:[%s8978_s1 + $0x180] sm:$0xff]  ;;  %v5595_v40 = vcombine.low %v75_v29, %v79_v30  ;;  %v5600_v58 = vcombine.high %v77_v51, %v81_v52  ;;  %v85_v62 = vld [vmem:[%s8978_s1 + $0x190] sm:$0xff]  ;;  %v5599_v1 = vcombine.low %v77_v51, %v81_v52  ;;  %v80_v33 = vld [vmem:[%s8978_s1 + $0x168] sm:$0xff] }
   0xe   :  { %466 = vmatpush1.bf16.msra.mxu1 %v5571_v14  ;;  %v87_v38 = vld [vmem:[%s8978_s1 + $0x1a0] sm:$0xff]  ;;  %548 = vmatpush1.bf16.msra.mxu0 %v5575_v39  ;;  %v89_v63 = vld [vmem:[%s8978_s1 + $0x1b0] sm:$0xff]  ;;  %v5581_v27 = vcombine.low %v60_v16, %v64_v17 }
   0xf   :  { %467 = vmatprep.subr.bf16.mxu1 %v5580_v15  ;;  %v5604_v42 = vcombine.high %v83_v37, %v87_v38  ;;  %v91_v45 = vld [vmem:[%s8978_s1 + $0x1c0] sm:$0xff]  ;;  %v5603_v48 = vcombine.low %v83_v37, %v87_v38  ;;  %549 = vmatprep.subr.bf16.mxu0 %v5584_v41  ;;  %v5608_v5 = vcombine.high %v85_v62, %v89_v63  ;;  %v93_v6 = vld [vmem:[%s8978_s1 + $0x1d0] sm:$0xff]  ;;  %v88_v41 = vld [vmem:[%s8978_s1 + $0x1a8] sm:$0xff] }
  0x10   :  { %v95_v46 = vld [vmem:[%s8978_s1 + $0x1e0] sm:$0xff]  ;;  %v97_v7 = vld [vmem:[%s8978_s1 + $0x1f0] sm:$0xff]  ;;  %v5607_v10 = vcombine.low %v85_v62, %v89_v63  ;;  %v46_v62 = vld [vmem:[%s8978_s1 + $0x58] sm:$0xff] }
  0x11   :  { %v5612_v50 = vcombine.high %v91_v45, %v95_v46  ;;  %v5611_v56 = vcombine.low %v91_v45, %v95_v46  ;;  %v33_v57 = vld [vmem:[%s8979_s0] sm:$0xff]  ;;  %v5616_v12 = vcombine.high %v93_v6, %v97_v7  ;;  %v5615_v18 = vcombine.low %v93_v6, %v97_v7  ;;  %v50_v63 = vld [vmem:[%s8978_s1 + $0x78] sm:$0xff] }
  0x12   :  { %468 = vmatpush1.bf16.msra.mxu1 %v5579_v21  ;;  %550 = vmatpush1.bf16.msra.mxu0 %v5583_v47  ;;  %v6734_v0 = vpack.c.bf16 %v33_v57, %v33_v57  ;;  %v769_v14 = vld [vmem:[%s8980_s3 + $0x400] sm:$0xff]  ;;  %v5582_v21 = vcombine.high %v60_v16, %v64_v17  ;;  %v42_v57 = vld [vmem:[%s8978_s1 + $0x38] sm:$0xff]  ;;  %v5569_v7 = vcombine.low %v46_v62, %v50_v63 }
  0x13   :  { %469 = vmatprep.subr.bf16.mxu1 %v5588_v25  ;;  %551 = vmatprep.subr.bf16.mxu0 %v5592_v49  ;;  %v773_v15 = vld [vmem:[%s8980_s3 + $0x420] sm:$0xff]  ;;  %v72_v25 = vld [vmem:[%s8978_s1 + $0x128] sm:$0xff]  ;;  %v58_v6 = vld [vmem:[%s8978_s1 + $0xb8] sm:$0xff] }
  0x14   :  { %v5748_v20 = vcombine.high %v769_v14, %v773_v15  ;;  %v777_v22 = vld [vmem:[%s8980_s3 + $0x440] sm:$0xff]  ;;  %v5747_v26 = vcombine.low %v769_v14, %v773_v15  ;;  %v5590_v29 = vcombine.high %v68_v24, %v72_v25  ;;  %v5589_v35 = vcombine.low %v68_v24, %v72_v25  ;;  %v96_v49 = vld [vmem:[%s8978_s1 + $0x1e8] sm:$0xff]  ;;  %v78_v16 = vld [vmem:[%s8978_s1 + $0x158] sm:$0xff] }
  0x15   :  { %v781_v23 = vld [vmem:[%s8980_s3 + $0x460] sm:$0xff]  ;;  %v82_v17 = vld [vmem:[%s8978_s1 + $0x178] sm:$0xff] }
  0x16   :  { %470 = vmatpush1.bf16.msra.mxu1 %v5587_v32  ;;  %552 = vmatpush1.bf16.msra.mxu0 %v5591_v55  ;;  %v5756_v28 = vcombine.high %v777_v22, %v781_v23  ;;  %v785_v30 = vld [vmem:[%s8980_s3 + $0x480] sm:$0xff]  ;;  %v76_v32 = vld [vmem:[%s8978_s1 + $0x148] sm:$0xff]  ;;  %v94_v24 = vld [vmem:[%s8978_s1 + $0x1d8] sm:$0xff] }
  0x17   :  { %471 = vmatprep.subr.bf16.mxu1 %v5596_v34  ;;  %553 = vmatprep.subr.bf16.mxu0 %v5600_v58  ;;  %v789_v31 = vld [vmem:[%s8980_s3 + $0x4a0] sm:$0xff]  ;;  %v5755_v34 = vcombine.low %v777_v22, %v781_v23  ;;  %v5598_v37 = vcombine.high %v76_v32, %v80_v33  ;;  %v5597_v43 = vcombine.low %v76_v32, %v80_v33  ;;  %v98_v25 = vld [vmem:[%s8978_s1 + $0x1f8] sm:$0xff] }
  0x18   :  { %v5764_v36 = vcombine.high %v785_v30, %v789_v31  ;;  %v793_v38 = vld [vmem:[%s8980_s3 + $0x4c0] sm:$0xff]  ;;  %v5601_v22 = vcombine.low %v78_v16, %v82_v17 }
  0x19   :  { %v797_v39 = vld [vmem:[%s8980_s3 + $0x4e0] sm:$0xff] }
  0x1a   :  { %472 = vmatpush1.bf16.msra.mxu1 %v5595_v40  ;;  %554 = vmatpush1.bf16.msra.mxu0 %v5599_v1  ;;  %v84_v40 = vld [vmem:[%s8978_s1 + $0x188] sm:$0xff]  ;;  %v5772_v44 = vcombine.high %v793_v38, %v797_v39  ;;  %v801_v46 = vld [vmem:[%s8980_s3 + $0x500] sm:$0xff] }
  0x1b   :  { %473 = vmatprep.subr.bf16.mxu1 %v5604_v42  ;;  %555 = vmatprep.subr.bf16.mxu0 %v5608_v5  ;;  %v5763_v42 = vcombine.low %v785_v30, %v789_v31  ;;  %v5606_v45 = vcombine.high %v84_v40, %v88_v41  ;;  %v805_v47 = vld [vmem:[%s8980_s3 + $0x520] sm:$0xff]  ;;  %v5605_v51 = vcombine.low %v84_v40, %v88_v41  ;;  %v54_v5 = vld [vmem:[%s8978_s1 + $0x98] sm:$0xff] }
  0x1c   :  { %v5780_v52 = vcombine.high %v801_v46, %v805_v47  ;;  %v809_v54 = vld [vmem:[%s8980_s3 + $0x540] sm:$0xff]  ;;  %v5779_v58 = vcombine.low %v801_v46, %v805_v47  ;;  %v5578_v8 = vcombine.high %v54_v5, %v58_v6  ;;  %v5617_v30 = vcombine.low %v94_v24, %v98_v25 }
  0x1d   :  { %v813_v55 = vld [vmem:[%s8980_s3 + $0x560] sm:$0xff] }
  0x1e   :  { %474 = vmatpush1.bf16.msra.mxu1 %v5603_v48  ;;  %556 = vmatpush1.bf16.msra.mxu0 %v5607_v10  ;;  %v92_v48 = vld [vmem:[%s8978_s1 + $0x1c8] sm:$0xff]  ;;  %v5788_v60 = vcombine.high %v809_v54, %v813_v55  ;;  %v5787_v1 = vcombine.low %v809_v54, %v813_v55  ;;  %v66_v10 = vld [vmem:[%s8978_s1 + $0xf8] sm:$0xff]  ;;  %v649_v32 = vld [vmem:[%s8980_s3 + $0x40] sm:$0xff] }
  0x1f   :  { %475 = vmatprep.subr.bf16.mxu1 %v5612_v50  ;;  %557 = vmatprep.subr.bf16.mxu0 %v5616_v12  ;;  %v5771_v50 = vcombine.low %v793_v38, %v797_v39  ;;  %v5614_v53 = vcombine.high %v92_v48, %v96_v49  ;;  %v5586_v12 = vcombine.high %v62_v9, %v66_v10  ;;  %v653_v33 = vld [vmem:[%s8980_s3 + $0x60] sm:$0xff] }
  0x20   :  { %v5585_v14 = vcombine.low %v62_v9, %v66_v10  ;;  %v5627_v38 = vcombine.low %v649_v32, %v653_v33  ;;  %v665_v40 = vld [vmem:[%s8980_s3 + $0xc0] sm:$0xff]  ;;  %v6943_v9 = vld [vmem:[%s8980_s3 + $0x8] sm:$0xff] }
  0x21   :  { %v669_v41 = vld [vmem:[%s8980_s3 + $0xe0] sm:$0xff] }
  0x22   :  { %476 = vmatpush1.bf16.msra.mxu1 %v5611_v56  ;;  %558 = vmatpush1.bf16.msra.mxu0 %v5615_v18  ;;  %v38_v56 = vld [vmem:[%s8978_s1 + $0x18] sm:$0xff]  ;;  %v681_v47 = vld [vmem:[%s8980_s3 + $0x140] sm:$0xff] }
  0x23   :  { %502 = vmatprep.subr.bf16.mxu1 %v5558_v59  ;;  %3796 = vmatprep.subr.bf16.mxu0 %v5748_v20  ;;  %v5613_v59 = vcombine.low %v92_v48, %v96_v49  ;;  %v5562_v61 = vcombine.high %v38_v56, %v42_v57  ;;  %v86_v20 = vld [vmem:[%s8978_s1 + $0x198] sm:$0xff]  ;;  %v685_v48 = vld [vmem:[%s8980_s3 + $0x160] sm:$0xff] }
  0x24   :  { %v5659_v54 = vcombine.low %v681_v47, %v685_v48  ;;  %v821_v55 = vld [vmem:[%s8980_s3 + $0x5a0] sm:$0xff] }
  0x25   :  { %494 = vmatmul.mubr.bf16.vlgmr.msra.gmra.mrb[0].mxu1 %v6734_v0  ;;  %576 = vmatmul.mubr.bf16.vlgmr.msra.gmra.mrb[0].mxu0 %v6734_v0 }
  0x26   :  { %503 = vmatpush1.bf16.msra.mxu1 %v5557_v2  ;;  %534 = vmatprep.mubr.bf16.mxu1 %v6576_v3  ;;  %v5561_v2 = vcombine.low %v38_v56, %v42_v57 }
  0x27   :  { %504 = vmatprep.subr.bf16.mxu1 %v5566_v4  ;;  %3797 = vmatpush1.bf16.msra.mxu0 %v5747_v26  ;;  %v5570_v4 = vcombine.high %v46_v62, %v50_v63  ;;  %v829_v63 = vld [vmem:[%s8980_s3 + $0x5e0] sm:$0xff] }
  0x28   :  { %3798 = vmatprep.subr.bf16.mxu0 %v5756_v28  ;;  %v641_v28 = vld [vmem:[%s8980_s3] sm:$0xff] }
  0x2a   :  { %505 = vmatpush1.bf16.msra.mxu1 %v5565_v11  ;;  %v5577_v11 = vcombine.low %v54_v5, %v58_v6  ;;  %v705_v5 = vld [vmem:[%s8980_s3 + $0x200] sm:$0xff] }
  0x2b   :  { %506 = vmatprep.subr.bf16.mxu1 %v5574_v13  ;;  %3799 = vmatpush1.bf16.msra.mxu0 %v5755_v34  ;;  %v70_v13 = vld [vmem:[%s8978_s1 + $0x118] sm:$0xff]  ;;  %v709_v6 = vld [vmem:[%s8980_s3 + $0x220] sm:$0xff] }
  0x2c   :  { %3800 = vmatprep.subr.bf16.mxu0 %v5764_v36  ;;  %v657_v36 = vld [vmem:[%s8980_s3 + $0x80] sm:$0xff] }
  0x2e   :  { %507 = vmatpush1.bf16.msra.mxu1 %v5573_v19  ;;  %v5602_v19 = vcombine.high %v78_v16, %v82_v17  ;;  %v717_v16 = vld [vmem:[%s8980_s3 + $0x260] sm:$0xff]  ;;  %v5683_v17 = vcombine.low %v705_v5, %v709_v6 }
  0x2f   :  { %508 = vmatprep.subr.bf16.mxu1 %v5582_v21  ;;  %3801 = vmatpush1.bf16.msra.mxu0 %v5763_v42  ;;  %v90_v21 = vld [vmem:[%s8978_s1 + $0x1b8] sm:$0xff] }
  0x30   :  { %3802 = vmatprep.subr.bf16.mxu0 %v5772_v44  ;;  %v5610_v23 = vcombine.high %v86_v20, %v90_v21  ;;  %v5609_v26 = vcombine.low %v86_v20, %v90_v21  ;;  %v677_v44 = vld [vmem:[%s8980_s3 + $0x120] sm:$0xff] }
  0x32   :  { %509 = vmatpush1.bf16.msra.mxu1 %v5581_v27  ;;  %v5618_v27 = vcombine.high %v94_v24, %v98_v25  ;;  %v725_v24 = vld [vmem:[%s8980_s3 + $0x2a0] sm:$0xff] }
  0x33   :  { %510 = vmatprep.subr.bf16.mxu1 %v5590_v29  ;;  %3803 = vmatpush1.bf16.msra.mxu0 %v5771_v50  ;;  %v645_v29 = vld [vmem:[%s8980_s3 + $0x20] sm:$0xff]  ;;  %v5660_v50 = vcombine.high %v681_v47, %v685_v48 }
  0x34   :  { %3804 = vmatprep.subr.bf16.mxu0 %v5780_v52  ;;  %v5620_v31 = vcombine.high %v641_v28, %v645_v29  ;;  %v5619_v34 = vcombine.low %v641_v28, %v645_v29  ;;  %v693_v52 = vld [vmem:[%s8980_s3 + $0x1a0] sm:$0xff] }
  0x35   :  { %v749_v47 = vld [vmem:[%s8980_s3 + $0x360] sm:$0xff] }
  0x36   :  { %511 = vmatpush1.bf16.msra.mxu1 %v5589_v35  ;;  %v5628_v35 = vcombine.high %v649_v32, %v653_v33  ;;  %v733_v32 = vld [vmem:[%s8980_s3 + $0x2e0] sm:$0xff] }
  0x37   :  { %512 = vmatprep.subr.bf16.mxu1 %v5598_v37  ;;  %3805 = vmatpush1.bf16.msra.mxu0 %v5779_v58  ;;  %v661_v37 = vld [vmem:[%s8980_s3 + $0xa0] sm:$0xff] }
  0x38   :  { %3806 = vmatprep.subr.bf16.mxu0 %v5788_v60  ;;  %v5636_v39 = vcombine.high %v657_v36, %v661_v37  ;;  %v5635_v42 = vcombine.low %v657_v36, %v661_v37  ;;  %v701_v60 = vld [vmem:[%s8980_s3 + $0x1e0] sm:$0xff] }
  0x3a   :  { %513 = vmatpush1.bf16.msra.mxu1 %v5597_v43  ;;  %v5644_v43 = vcombine.high %v665_v40, %v669_v41 }
  0x3b   :  { %514 = vmatprep.subr.bf16.mxu1 %v5606_v45  ;;  %3807 = vmatpush1.bf16.msra.mxu0 %v5787_v1  ;;  %v5643_v45 = vcombine.low %v665_v40, %v669_v41  ;;  %v741_v40 = vld [vmem:[%s8980_s3 + $0x320] sm:$0xff] }
  0x3e   :  { %515 = vmatpush1.bf16.msra.mxu1 %v5605_v51  ;;  %v689_v51 = vld [vmem:[%s8980_s3 + $0x180] sm:$0xff] }
  0x3f   :  { %516 = vmatprep.subr.bf16.mxu1 %v5614_v53  ;;  %v817_v53 = vld [vmem:[%s8980_s3 + $0x580] sm:$0xff]  ;;  %v5668_v56 = vcombine.high %v689_v51, %v693_v52  ;;  %v5667_v62 = vcombine.low %v689_v51, %v693_v52 }
  0x40   :  { %v5795_v57 = vcombine.low %v817_v53, %v821_v55  ;;  %v5796_v58 = vcombine.high %v817_v53, %v821_v55  ;;  %v757_v55 = vld [vmem:[%s8980_s3 + $0x3a0] sm:$0xff] }
  0x42   :  { %517 = vmatpush1.bf16.msra.mxu1 %v5613_v59  ;;  %v697_v59 = vld [vmem:[%s8980_s3 + $0x1c0] sm:$0xff]  ;;  %3808 = vmatprep.subr.bf16.mxu0 %v5796_v58 }
  0x43   :  { %584 = vmatprep.subr.bf16.mxu1 %v5562_v61  ;;  %v825_v61 = vld [vmem:[%s8980_s3 + $0x5c0] sm:$0xff]  ;;  %3809 = vmatpush1.bf16.msra.mxu0 %v5795_v57  ;;  %v5676_v1 = vcombine.high %v697_v59, %v701_v60  ;;  %v5675_v10 = vcombine.low %v697_v59, %v701_v60 }
  0x44   :  { %v881_v57 = vld [vmem:[%s8980_s3 + $0x780] sm:$0xff] }
  0x45   :  { %535 = vmatmul.mubr.bf16.vlgmr.msra.gmra.mrb[4].mxu1 %v6734_v0  ;;  %v885_v58 = vld [vmem:[%s8980_s3 + $0x7a0] sm:$0xff] }
  0x46   :  { %585 = vmatpush1.bf16.msra.mxu1 %v5561_v2  ;;  %616 = vmatprep.mubr.bf16.mxu1 %v6576_v3  ;;  %v74_v3 = vld [vmem:[%s8978_s1 + $0x138] sm:$0xff]  ;;  %v5803_v2 = vcombine.low %v825_v61, %v829_v63  ;;  %v5860_v60 = vcombine.high %v881_v57, %v885_v58 }
  0x47   :  { %586 = vmatprep.subr.bf16.mxu1 %v5570_v4  ;;  %v5594_v15 = vcombine.high %v70_v13, %v74_v3  ;;  %v5593_v18 = vcombine.low %v70_v13, %v74_v3  ;;  %v5804_v4 = vcombine.high %v825_v61, %v829_v63  ;;  %v5684_v13 = vcombine.high %v705_v5, %v709_v6  ;;  %v761_v61 = vld [vmem:[%s8980_s3 + $0x3c0] sm:$0xff] }
  0x48   :  { %v5859_v63 = vcombine.low %v881_v57, %v885_v58 }
  0x49   :  { %3810 = vmatprep.subr.bf16.mxu0 %v5804_v4  ;;  %v893_v4 = vld [vmem:[%s8980_s3 + $0x7e0] sm:$0xff] }
  0x4a   :  { %587 = vmatpush1.bf16.msra.mxu1 %v5569_v7  ;;  %v833_v7 = vld [vmem:[%s8980_s3 + $0x600] sm:$0xff]  ;;  %3811 = vmatpush1.bf16.msra.mxu0 %v5803_v2 }
  0x4b   :  { %588 = vmatprep.subr.bf16.mxu1 %v5578_v8  ;;  %v837_v8 = vld [vmem:[%s8980_s3 + $0x620] sm:$0xff] }
  0x4c   :  { %v5811_v3 = vcombine.low %v833_v7, %v837_v8  ;;  %v889_v2 = vld [vmem:[%s8980_s3 + $0x7c0] sm:$0xff] }
  0x4d   :  { %v5868_v6 = vcombine.high %v889_v2, %v893_v4 }
  0x4e   :  { %589 = vmatpush1.bf16.msra.mxu1 %v5577_v11  ;;  %v5812_v11 = vcombine.high %v833_v7, %v837_v8  ;;  %v5867_v7 = vcombine.low %v889_v2, %v893_v4 }
  0x4f   :  { %590 = vmatprep.subr.bf16.mxu1 %v5586_v12  ;;  %v6948_v12 = vld [vmem:[%s8980_s3 + $0x28] sm:$0xff] }
  0x50   :  { %3812 = vmatprep.subr.bf16.mxu0 %v5812_v11  ;;  %v7044_v11 = vld [vmem:[%s8980_s3 + $0x820] sm:$0xff] }
  0x51   :  { %3813 = vmatpush1.bf16.msra.mxu0 %v5811_v3 }
  0x52   :  { %591 = vmatpush1.bf16.msra.mxu1 %v5585_v14  ;;  %v5621_v14 = vcombine.low %v6943_v9, %v6948_v12 }
  0x53   :  { %592 = vmatprep.subr.bf16.mxu1 %v5594_v15  ;;  %v713_v15 = vld [vmem:[%s8980_s3 + $0x240] sm:$0xff] }
  0x54   :  { %v5692_v20 = vcombine.high %v713_v15, %v717_v16  ;;  %v5691_v25 = vcombine.low %v713_v15, %v717_v16  ;;  %v101_v16 = vlaneseq }
  0x56   :  { %593 = vmatpush1.bf16.msra.mxu1 %v5593_v18  ;;  %v841_v18 = vld [vmem:[%s8980_s3 + $0x640] sm:$0xff] }
  0x57   :  { %594 = vmatprep.subr.bf16.mxu1 %v5602_v19  ;;  %v845_v19 = vld [vmem:[%s8980_s3 + $0x660] sm:$0xff] }
  0x58   :  { %v5819_v21 = vcombine.low %v841_v18, %v845_v19 }
  0x5a   :  { %595 = vmatpush1.bf16.msra.mxu1 %v5601_v22  ;;  %v5820_v22 = vcombine.high %v841_v18, %v845_v19  ;;  %v7060_v19 = vld [vmem:[%s8981_s2] sm:$0xff] }
  0x5b   :  { %596 = vmatprep.subr.bf16.mxu1 %v5610_v23  ;;  %v721_v23 = vld [vmem:[%s8980_s3 + $0x280] sm:$0xff] }
  0x5c   :  { %3814 = vmatprep.subr.bf16.mxu0 %v5820_v22  ;;  %v5700_v28 = vcombine.high %v721_v23, %v725_v24  ;;  %v5699_v33 = vcombine.low %v721_v23, %v725_v24 }
  0x5d   :  { %3815 = vmatpush1.bf16.msra.mxu0 %v5819_v21 }
  0x5e   :  { %597 = vmatpush1.bf16.msra.mxu1 %v5609_v26  ;;  %v849_v26 = vld [vmem:[%s8980_s3 + $0x680] sm:$0xff] }
  0x5f   :  { %598 = vmatprep.subr.bf16.mxu1 %v5618_v27  ;;  %v853_v27 = vld [vmem:[%s8980_s3 + $0x6a0] sm:$0xff] }
  0x60   :  { %v5827_v29 = vcombine.low %v849_v26, %v853_v27 }
  0x62   :  { %599 = vmatpush1.bf16.msra.mxu1 %v5617_v30  ;;  %v5828_v30 = vcombine.high %v849_v26, %v853_v27 }
  0x63   :  { %3755 = vmatprep.subr.bf16.mxu1 %v5620_v31  ;;  %v729_v31 = vld [vmem:[%s8980_s3 + $0x2c0] sm:$0xff] }
  0x64   :  { %3816 = vmatprep.subr.bf16.mxu0 %v5828_v30  ;;  %v5708_v36 = vcombine.high %v729_v31, %v733_v32  ;;  %v5707_v41 = vcombine.low %v729_v31, %v733_v32  ;;  %v650_v31 = vld [vmem:[%s8980_s3 + $0x48] sm:$0xff] }
  0x65   :  { %617 = vmatmul.mubr.bf16.vlgmr.msra.gmra.mrb[8].mxu1 %v6734_v0  ;;  %v673_v0 = vld [vmem:[%s8980_s3 + $0x100] sm:$0xff]  ;;  %3817 = vmatpush1.bf16.msra.mxu0 %v5827_v29  ;;  %v654_v32 = vld [vmem:[%s8980_s3 + $0x68] sm:$0xff] }
  0x66   :  { %3756 = vmatpush1.bf16.msra.mxu1 %v5619_v34  ;;  %v5652_v46 = vcombine.high %v673_v0, %v677_v44  ;;  %v5651_v49 = vcombine.low %v673_v0, %v677_v44  ;;  %v857_v34 = vld [vmem:[%s8980_s3 + $0x6c0] sm:$0xff] }
  0x67   :  { %3757 = vmatprep.subr.bf16.mxu1 %v5628_v35  ;;  %v861_v35 = vld [vmem:[%s8980_s3 + $0x6e0] sm:$0xff] }
  0x68   :  { %v5835_v37 = vcombine.low %v857_v34, %v861_v35 }
  0x6a   :  { %3758 = vmatpush1.bf16.msra.mxu1 %v5627_v38  ;;  %v5836_v38 = vcombine.high %v857_v34, %v861_v35  ;;  %v5630_v35 = vcombine.high %v650_v31, %v654_v32 }
  0x6b   :  { %3759 = vmatprep.subr.bf16.mxu1 %v5636_v39  ;;  %v737_v39 = vld [vmem:[%s8980_s3 + $0x300] sm:$0xff] }
  0x6c   :  { %3818 = vmatprep.subr.bf16.mxu0 %v5836_v38  ;;  %v5716_v0 = vcombine.high %v737_v39, %v741_v40  ;;  %v5715_v48 = vcombine.low %v737_v39, %v741_v40  ;;  %v5629_v38 = vcombine.low %v650_v31, %v654_v32 }
  0x6d   :  { %3819 = vmatpush1.bf16.msra.mxu0 %v5835_v37  ;;  %v662_v37 = vld [vmem:[%s8980_s3 + $0xa8] sm:$0xff] }
  0x6e   :  { %3760 = vmatpush1.bf16.msra.mxu1 %v5635_v42  ;;  %v865_v42 = vld [vmem:[%s8980_s3 + $0x700] sm:$0xff] }
  0x6f   :  { %3761 = vmatprep.subr.bf16.mxu1 %v5644_v43  ;;  %v869_v43 = vld [vmem:[%s8980_s3 + $0x720] sm:$0xff] }
  0x70   :  { %v5843_v44 = vcombine.low %v865_v42, %v869_v43 }
  0x72   :  { %3762 = vmatpush1.bf16.msra.mxu1 %v5643_v45  ;;  %v5844_v45 = vcombine.high %v865_v42, %v869_v43  ;;  %v670_v42 = vld [vmem:[%s8980_s3 + $0xe8] sm:$0xff] }
  0x73   :  { %3763 = vmatprep.subr.bf16.mxu1 %v5652_v46  ;;  %v745_v46 = vld [vmem:[%s8980_s3 + $0x340] sm:$0xff] }
  0x74   :  { %3820 = vmatprep.subr.bf16.mxu0 %v5844_v45  ;;  %v5724_v51 = vcombine.high %v745_v46, %v749_v47  ;;  %v678_v45 = vld [vmem:[%s8980_s3 + $0x128] sm:$0xff] }
  0x75   :  { %3821 = vmatpush1.bf16.msra.mxu0 %v5843_v44  ;;  %v674_v44 = vld [vmem:[%s8980_s3 + $0x108] sm:$0xff] }
  0x76   :  { %3764 = vmatpush1.bf16.msra.mxu1 %v5651_v49  ;;  %v873_v49 = vld [vmem:[%s8980_s3 + $0x740] sm:$0xff] }
  0x77   :  { %3765 = vmatprep.subr.bf16.mxu1 %v5660_v50  ;;  %v877_v50 = vld [vmem:[%s8980_s3 + $0x760] sm:$0xff] }
  0x78   :  { %v5851_v52 = vcombine.low %v873_v49, %v877_v50  ;;  %v5852_v53 = vcombine.high %v873_v49, %v877_v50  ;;  %v686_v49 = vld [vmem:[%s8980_s3 + $0x168] sm:$0xff]  ;;  %v5653_v50 = vcombine.low %v674_v44, %v678_v45 }
  0x7a   :  { %3766 = vmatpush1.bf16.msra.mxu1 %v5659_v54  ;;  %v753_v54 = vld [vmem:[%s8980_s3 + $0x380] sm:$0xff]  ;;  %3822 = vmatprep.subr.bf16.mxu0 %v5852_v53  ;;  %v694_v53 = vld [vmem:[%s8980_s3 + $0x1a8] sm:$0xff] }
  0x7b   :  { %3767 = vmatprep.subr.bf16.mxu1 %v5668_v56  ;;  %v5723_v56 = vcombine.low %v745_v46, %v749_v47  ;;  %3823 = vmatpush1.bf16.msra.mxu0 %v5851_v52  ;;  %v5732_v59 = vcombine.high %v753_v54, %v757_v55  ;;  %v5654_v47 = vcombine.high %v674_v44, %v678_v45  ;;  %v690_v52 = vld [vmem:[%s8980_s3 + $0x188] sm:$0xff]  ;;  %v921_v44 = vld [vmem:[%s8980_s3 + $0x8c0] sm:$0xff] }
  0x7c   :  { %3824 = vmatprep.subr.bf16.mxu0 %v5860_v60  ;;  %v5670_v58 = vcombine.high %v690_v52, %v694_v53  ;;  %v702_v60 = vld [vmem:[%s8980_s3 + $0x1e8] sm:$0xff]  ;;  %v925_v45 = vld [vmem:[%s8980_s3 + $0x8e0] sm:$0xff] }
  0x7e   :  { %3768 = vmatpush1.bf16.msra.mxu1 %v5667_v62  ;;  %v765_v62 = vld [vmem:[%s8980_s3 + $0x3e0] sm:$0xff] }
  0x7f   :  { %3769 = vmatprep.subr.bf16.mxu1 %v5676_v1  ;;  %v5731_v1 = vcombine.low %v753_v54, %v757_v55  ;;  %3825 = vmatpush1.bf16.msra.mxu0 %v5859_v63  ;;  %v5740_v5 = vcombine.high %v761_v61, %v765_v62  ;;  %v5739_v8 = vcombine.low %v761_v61, %v765_v62 }
  0x80   :  { %3826 = vmatprep.subr.bf16.mxu0 %v5868_v6  ;;  %v5669_v63 = vcombine.low %v690_v52, %v694_v53  ;;  %v710_v6 = vld [vmem:[%s8980_s3 + $0x228] sm:$0xff]  ;;  %v5899_v53 = vcombine.low %v921_v44, %v925_v45 }
  0x81   :  { %v742_v52 = vld [vmem:[%s8980_s3 + $0x328] sm:$0xff] }
  0x82   :  { %3770 = vmatpush1.bf16.msra.mxu1 %v5675_v10  ;;  %v7039_v10 = vld [vmem:[%s8980_s3 + $0x800] sm:$0xff] }
  0x83   :  { %3771 = vmatprep.subr.bf16.mxu1 %v5684_v13  ;;  %3827 = vmatpush1.bf16.msra.mxu0 %v5867_v7  ;;  %v5622_v13 = vcombine.high %v6943_v9, %v6948_v12  ;;  %v5876_v3 = vcombine.high %v7039_v10, %v7044_v11  ;;  %v5875_v15 = vcombine.low %v7039_v10, %v7044_v11  ;;  %v730_v10 = vld [vmem:[%s8980_s3 + $0x2c8] sm:$0xff] }
  0x84   :  { %v734_v11 = vld [vmem:[%s8980_s3 + $0x2e8] sm:$0xff] }
  0x85   :  { %3837 = vmatprep.subr.bf16.mxu0 %v5876_v3 }
  0x86   :  { %3772 = vmatpush1.bf16.msra.mxu1 %v5683_v17  ;;  %v7052_v17 = vshrl.u32 %v101_v16, 7 }
  0x87   :  { %3773 = vmatprep.subr.bf16.mxu1 %v5692_v20 }
  0x88   :  { %v7055_v18 = vsub.s32 0, %v7052_v17  ;;  %v7063_v20 = vsub.s32 1, %v7052_v17  ;;  %v123_v54 = vsub.s32 5, %v7052_v17  ;;  %v111_v55 = vsub.s32 2, %v7052_v17 }
  0x89   :  { %v115_v57 = vsub.s32 3, %v7052_v17 }
  0x8a   :  { %3774 = vmatpush1.bf16.msra.mxu1 %v5691_v25  ;;  %v104_v21 = vrot.slane %v7060_v19, %v7055_v18  ;;  %v108_v22 = vrot.slane %v7060_v19, %v7063_v20  ;;  %v124_v61 = vrot.slane %v7060_v19, %v123_v54  ;;  %v112_v62 = vrot.slane %v7060_v19, %v111_v55 }
  0x8b   :  { %3775 = vmatprep.subr.bf16.mxu1 %v5700_v28 }
  0x8e   :  { %3776 = vmatpush1.bf16.msra.mxu1 %v5699_v33 }
  0x8f   :  { %3777 = vmatprep.subr.bf16.mxu1 %v5708_v36  ;;  %v658_v36 = vld [vmem:[%s8980_s3 + $0x88] sm:$0xff] }
  0x90   :  { %v5638_v39 = vcombine.high %v658_v36, %v662_v37  ;;  %v5637_v9 = vcombine.low %v658_v36, %v662_v37 }
  0x92   :  { %3778 = vmatpush1.bf16.msra.mxu1 %v5707_v41  ;;  %v666_v41 = vld [vmem:[%s8980_s3 + $0xc8] sm:$0xff] }
  0x93   :  { %3779 = vmatprep.subr.bf16.mxu1 %v5716_v0  ;;  %v5645_v46 = vcombine.low %v666_v41, %v670_v42 }
  0x96   :  { %3780 = vmatpush1.bf16.msra.mxu1 %v5715_v48  ;;  %v682_v48 = vld [vmem:[%s8980_s3 + $0x148] sm:$0xff] }
  0x97   :  { %3781 = vmatprep.subr.bf16.mxu1 %v5724_v51  ;;  %v5662_v51 = vcombine.high %v682_v48, %v686_v49 }
  0x9a   :  { %3782 = vmatpush1.bf16.msra.mxu1 %v5723_v56  ;;  %v5661_v56 = vcombine.low %v682_v48, %v686_v49  ;;  %v5710_v48 = vcombine.high %v730_v10, %v734_v11  ;;  %v929_v49 = vld [vmem:[%s8980_s3 + $0x900] sm:$0xff] }
  0x9b   :  { %3783 = vmatprep.subr.bf16.mxu1 %v5732_v59  ;;  %v698_v59 = vld [vmem:[%s8980_s3 + $0x1c8] sm:$0xff] }
  0x9c   :  { %v5678_v2 = vcombine.high %v698_v59, %v702_v60  ;;  %v5677_v16 = vcombine.low %v698_v59, %v702_v60  ;;  %v937_v60 = vld [vmem:[%s8980_s3 + $0x940] sm:$0xff] }
  0x9e   :  { %3784 = vmatpush1.bf16.msra.mxu1 %v5731_v1  ;;  %v116_v1 = vrot.slane %v7060_v19, %v115_v57 }
  0x9f   :  { %3785 = vmatprep.subr.bf16.mxu1 %v5740_v5  ;;  %v706_v5 = vld [vmem:[%s8980_s3 + $0x208] sm:$0xff] }
  0xa2   :  { %3786 = vmatpush1.bf16.msra.mxu1 %v5739_v8 }
  0xa3   :  { %3919 = vmatprep.subr.bf16.mxu1 %v5622_v13 }
  0xf8   :  { %v495_v23 = vpop.f32.mrb[0].mxu1  ;;  %v7091_v40 = vpop.f32.mrb[0].mxu0 }
  0xf9   :  { %v496_v24 = vadd.f32 %v495_v23, %v104_v21  ;;  %v497_v25 = vpop.f32.mrb[1].mxu1  ;;  %v579_v43 = vpop.f32.mrb[1].mxu0  ;;  %v5686_v23 = vcombine.high %v706_v5, %v710_v6 }
  0xfa   :  { %v498_v26 = vadd.f32 %v497_v25, %v108_v22  ;;  %v499_v27 = vpop.f32.mrb[2].mxu1  ;;  %v581_v0 = vpop.f32.mrb[2].mxu0  ;;  %v580_v7 = vadd.f32 %v579_v43, %v124_v61  ;;  %v941_v61 = vld [vmem:[%s8980_s3 + $0x960] sm:$0xff] }
  0xfb   :  { %v625_v28 = vmax.f32 %v496_v24, 0.0  ;;  %v500_v29 = vpop.f32.mrb[3].mxu1  ;;  %v582_v12 = vpop.f32.mrb[3].mxu0  ;;  %v905_v24 = vld [vmem:[%s8980_s3 + $0x840] sm:$0xff] }
  0xfc   :  { %v626_v30 = vmax.f32 %v498_v26, 0.0  ;;  %v909_v27 = vld [vmem:[%s8980_s3 + $0x860] sm:$0xff]  ;;  %v718_v29 = vld [vmem:[%s8980_s3 + $0x268] sm:$0xff] }
  0xfd   :  { %v7077_v34 = vpack.c.bf16 %v625_v28, %v625_v28  ;;  %v714_v28 = vld [vmem:[%s8980_s3 + $0x248] sm:$0xff]  ;;  %v5884_v36 = vcombine.high %v905_v24, %v909_v27  ;;  %v5883_v0 = vcombine.low %v905_v24, %v909_v27  ;;  %v957_v24 = vld [vmem:[%s8980_s3 + $0x9e0] sm:$0xff] }
  0xfe   :  { %v7075_v33 = vpack.c.bf16 %v626_v30, %v626_v30  ;;  %v630_v30 = vmax.f32 %v580_v7, 0.0  ;;  %v5694_v37 = vcombine.high %v714_v28, %v718_v29  ;;  %v949_v7 = vld [vmem:[%s8980_s3 + $0x9a0] sm:$0xff] }
 0x100   :  { %3787 = vmatprep.mubr.bf16.mxu1 %v7075_v33  ;;  %v7170_v43 = vpack.c.bf16 %v630_v30, %v630_v30 }
 0x101   :  { %3788 = vmatmul.mubr.bf16.vlgmr.msra.gmra.mrb[12].mxu1 %v7077_v34 }
 0x102   :  { %3920 = vmatpush1.bf16.msra.mxu1 %v5621_v14  ;;  %3951 = vmatprep.mubr.bf16.mxu1 %v7075_v33  ;;  %v5646_v14 = vcombine.high %v666_v41, %v670_v42  ;;  %v722_v41 = vld [vmem:[%s8980_s3 + $0x288] sm:$0xff] }
 0x103   :  { %3921 = vmatprep.subr.bf16.mxu1 %v5630_v35  ;;  %v5685_v35 = vcombine.low %v706_v5, %v710_v6  ;;  %v726_v42 = vld [vmem:[%s8980_s3 + $0x2a8] sm:$0xff]  ;;  %v945_v6 = vld [vmem:[%s8980_s3 + $0x980] sm:$0xff] }
 0x104   :  { %v5923_v27 = vcombine.low %v945_v6, %v949_v7 }
 0x106   :  { %3922 = vmatpush1.bf16.msra.mxu1 %v5629_v38  ;;  %v913_v38 = vld [vmem:[%s8980_s3 + $0x880] sm:$0xff] }
 0x107   :  { %3923 = vmatprep.subr.bf16.mxu1 %v5638_v39  ;;  %v917_v39 = vld [vmem:[%s8980_s3 + $0x8a0] sm:$0xff] }
 0x108   :  { %v5892_v12 = vcombine.high %v913_v38, %v917_v39 }
 0x10a   :  { %3924 = vmatpush1.bf16.msra.mxu1 %v5637_v9  ;;  %v5693_v9 = vcombine.low %v714_v28, %v718_v29 }
 0x10b   :  { %3925 = vmatprep.subr.bf16.mxu1 %v5646_v14  ;;  %v5702_v14 = vcombine.high %v722_v41, %v726_v42 }
 0x10e   :  { %3926 = vmatpush1.bf16.msra.mxu1 %v5645_v46  ;;  %v5701_v46 = vcombine.low %v722_v41, %v726_v42 }
 0x10f   :  { %3927 = vmatprep.subr.bf16.mxu1 %v5654_v47  ;;  %v5900_v47 = vcombine.high %v921_v44, %v925_v45  ;;  %v969_v45 = vld [vmem:[%s8980_s3 + $0xa40] sm:$0xff] }
 0x112   :  { %3928 = vmatpush1.bf16.msra.mxu1 %v5653_v50  ;;  %v933_v50 = vld [vmem:[%s8980_s3 + $0x920] sm:$0xff] }
 0x113   :  { %3929 = vmatprep.subr.bf16.mxu1 %v5662_v51  ;;  %v738_v51 = vld [vmem:[%s8980_s3 + $0x308] sm:$0xff] }
 0x114   :  { %v5718_v59 = vcombine.high %v738_v51, %v742_v52 }
 0x116   :  { %3930 = vmatpush1.bf16.msra.mxu1 %v5661_v56  ;;  %v5709_v56 = vcombine.low %v730_v10, %v734_v11  ;;  %v973_v10 = vld [vmem:[%s8980_s3 + $0xa60] sm:$0xff]  ;;  %v778_v11 = vld [vmem:[%s8980_s3 + $0x448] sm:$0xff] }
 0x117   :  { %3931 = vmatprep.subr.bf16.mxu1 %v5670_v58  ;;  %v5908_v58 = vcombine.high %v929_v49, %v933_v50 }
 0x118   :  { %v536_v4 = vpop.f32.mrb[4].mxu1 }
 0x119   :  { %v537_v8 = vadd.f32 %v536_v4, %v112_v62  ;;  %v538_v13 = vpop.f32.mrb[5].mxu1  ;;  %v746_v62 = vld [vmem:[%s8980_s3 + $0x348] sm:$0xff]  ;;  %v5916_v4 = vcombine.high %v937_v60, %v941_v61 }
 0x11a   :  { %v539_v3 = vadd.f32 %v538_v13, %v116_v1  ;;  %3932 = vmatpush1.bf16.msra.mxu1 %v5669_v63  ;;  %v540_v21 = vpop.f32.mrb[6].mxu1  ;;  %v750_v63 = vld [vmem:[%s8980_s3 + $0x368] sm:$0xff]  ;;  %v5907_v1 = vcombine.low %v929_v49, %v933_v50  ;;  %v977_v49 = vld [vmem:[%s8980_s3 + $0xa80] sm:$0xff] }
 0x11b   :  { %v627_v22 = vmax.f32 %v537_v8, 0.0  ;;  %3933 = vmatprep.subr.bf16.mxu1 %v5678_v2  ;;  %v541_v25 = vpop.f32.mrb[7].mxu1  ;;  %v5717_v2 = vcombine.low %v738_v51, %v742_v52  ;;  %v5726_v5 = vcombine.high %v746_v62, %v750_v63  ;;  %v754_v8 = vld [vmem:[%s8980_s3 + $0x388] sm:$0xff]  ;;  %v5924_v21 = vcombine.high %v945_v6, %v949_v7  ;;  %v981_v51 = vld [vmem:[%s8980_s3 + $0xaa0] sm:$0xff] }
 0x11c   :  { %v628_v26 = vmax.f32 %v539_v3, 0.0  ;;  %v758_v13 = vld [vmem:[%s8980_s3 + $0x3a8] sm:$0xff]  ;;  %v5915_v3 = vcombine.low %v937_v60, %v941_v61  ;;  %v985_v61 = vld [vmem:[%s8980_s3 + $0xac0] sm:$0xff] }
 0x11d   :  { %v7153_v31 = vpack.c.bf16 %v627_v22, %v627_v22  ;;  %v5734_v22 = vcombine.high %v754_v8, %v758_v13  ;;  %v762_v25 = vld [vmem:[%s8980_s3 + $0x3c8] sm:$0xff]  ;;  %v5733_v28 = vcombine.low %v754_v8, %v758_v13  ;;  %v993_v7 = vld [vmem:[%s8980_s3 + $0xb00] sm:$0xff] }
 0x11e   :  { %v7155_v32 = vpack.c.bf16 %v628_v26, %v628_v26  ;;  %3934 = vmatpush1.bf16.msra.mxu1 %v5677_v16  ;;  %v5725_v16 = vcombine.low %v746_v62, %v750_v63  ;;  %v766_v26 = vld [vmem:[%s8980_s3 + $0x3e8] sm:$0xff]  ;;  %v989_v62 = vld [vmem:[%s8980_s3 + $0xae0] sm:$0xff] }
 0x11f   :  { %3935 = vmatprep.subr.bf16.mxu1 %v5686_v23  ;;  %v953_v23 = vld [vmem:[%s8980_s3 + $0x9c0] sm:$0xff]  ;;  %v5742_v30 = vcombine.high %v762_v25, %v766_v26  ;;  %v786_v52 = vld [vmem:[%s8980_s3 + $0x488] sm:$0xff] }
 0x120   :  { %3828 = vmatprep.mubr.bf16.mxu0 %v7155_v32  ;;  %v5932_v29 = vcombine.high %v953_v23, %v957_v24  ;;  %v5931_v42 = vcombine.low %v953_v23, %v957_v24  ;;  %v794_v63 = vld [vmem:[%s8980_s3 + $0x4c8] sm:$0xff]  ;;  %v997_v8 = vld [vmem:[%s8980_s3 + $0xb20] sm:$0xff] }
 0x121   :  { %3829 = vmatmul.mubr.bf16.vlgmr.msra.gmra.mrb[4].mxu0 %v7153_v31  ;;  %v802_v13 = vld [vmem:[%s8980_s3 + $0x508] sm:$0xff]  ;;  %v1001_v24 = vld [vmem:[%s8980_s3 + $0xb40] sm:$0xff] }
 0x122   :  { %3838 = vmatpush1.bf16.msra.mxu0 %v5875_v15  ;;  %3936 = vmatpush1.bf16.msra.mxu1 %v5685_v35  ;;  %v5891_v15 = vcombine.low %v913_v38, %v917_v39  ;;  %v961_v35 = vld [vmem:[%s8980_s3 + $0xa00] sm:$0xff]  ;;  %v774_v38 = vld [vmem:[%s8980_s3 + $0x428] sm:$0xff] }
 0x123   :  { %3839 = vmatprep.subr.bf16.mxu0 %v5884_v36  ;;  %3937 = vmatprep.subr.bf16.mxu1 %v5694_v37  ;;  %v965_v36 = vld [vmem:[%s8980_s3 + $0xa20] sm:$0xff]  ;;  %v770_v37 = vld [vmem:[%s8980_s3 + $0x408] sm:$0xff] }
 0x124   :  { %3869 = vmatprep.mubr.bf16.mxu0 %v7170_v43 }
 0x126   :  { %3840 = vmatpush1.bf16.msra.mxu0 %v5883_v0  ;;  %3938 = vmatpush1.bf16.msra.mxu1 %v5693_v9  ;;  %v5741_v0 = vcombine.low %v762_v25, %v766_v26  ;;  %v1005_v25 = vld [vmem:[%s8980_s3 + $0xb60] sm:$0xff]  ;;  %v810_v26 = vld [vmem:[%s8980_s3 + $0x548] sm:$0xff] }
 0x127   :  { %3841 = vmatprep.subr.bf16.mxu0 %v5892_v12  ;;  %3939 = vmatprep.subr.bf16.mxu1 %v5702_v14  ;;  %v5940_v12 = vcombine.high %v961_v35, %v965_v36  ;;  %v5750_v14 = vcombine.high %v770_v37, %v774_v38 }
 0x12a   :  { %3842 = vmatpush1.bf16.msra.mxu0 %v5891_v15  ;;  %3940 = vmatpush1.bf16.msra.mxu1 %v5701_v46  ;;  %v782_v15 = vld [vmem:[%s8980_s3 + $0x468] sm:$0xff]  ;;  %v5939_v46 = vcombine.low %v961_v35, %v965_v36  ;;  %v5980_v35 = vcombine.high %v1001_v24, %v1005_v25 }
 0x12b   :  { %3843 = vmatprep.subr.bf16.mxu0 %v5900_v47  ;;  %3941 = vmatprep.subr.bf16.mxu1 %v5710_v48  ;;  %v5749_v47 = vcombine.low %v770_v37, %v774_v38  ;;  %v5948_v48 = vcombine.high %v969_v45, %v973_v10  ;;  %v5758_v50 = vcombine.high %v778_v11, %v782_v15  ;;  %v1009_v37 = vld [vmem:[%s8980_s3 + $0xb80] sm:$0xff] }
 0x12c   :  { %v1013_v38 = vld [vmem:[%s8980_s3 + $0xba0] sm:$0xff] }
 0x12e   :  { %3844 = vmatpush1.bf16.msra.mxu0 %v5899_v53  ;;  %3942 = vmatpush1.bf16.msra.mxu1 %v5709_v56  ;;  %v790_v53 = vld [vmem:[%s8980_s3 + $0x4a8] sm:$0xff]  ;;  %v5947_v56 = vcombine.low %v969_v45, %v973_v10  ;;  %v5988_v45 = vcombine.high %v1009_v37, %v1013_v38 }
 0x12f   :  { %3845 = vmatprep.subr.bf16.mxu0 %v5908_v58  ;;  %3943 = vmatprep.subr.bf16.mxu1 %v5718_v59  ;;  %v5757_v58 = vcombine.low %v778_v11, %v782_v15  ;;  %v5956_v59 = vcombine.high %v977_v49, %v981_v51  ;;  %v5766_v60 = vcombine.high %v786_v52, %v790_v53  ;;  %v1017_v11 = vld [vmem:[%s8980_s3 + $0xbc0] sm:$0xff] }
 0x130   :  { %v1021_v15 = vld [vmem:[%s8980_s3 + $0xbe0] sm:$0xff] }
 0x132   :  { %3846 = vmatpush1.bf16.msra.mxu0 %v5907_v1  ;;  %3944 = vmatpush1.bf16.msra.mxu1 %v5717_v2  ;;  %v798_v1 = vld [vmem:[%s8980_s3 + $0x4e8] sm:$0xff]  ;;  %v5955_v2 = vcombine.low %v977_v49, %v981_v51 }
 0x133   :  { %3847 = vmatprep.subr.bf16.mxu0 %v5916_v4  ;;  %3945 = vmatprep.subr.bf16.mxu1 %v5726_v5  ;;  %v5765_v4 = vcombine.low %v786_v52, %v790_v53  ;;  %v5964_v5 = vcombine.high %v985_v61, %v989_v62  ;;  %v5774_v6 = vcombine.high %v794_v63, %v798_v1 }
 0x134   :  { %v5996_v52 = vcombine.high %v1017_v11, %v1021_v15 }
 0x136   :  { %3848 = vmatpush1.bf16.msra.mxu0 %v5915_v3  ;;  %3946 = vmatpush1.bf16.msra.mxu1 %v5725_v16  ;;  %v806_v3 = vld [vmem:[%s8980_s3 + $0x528] sm:$0xff]  ;;  %v5963_v16 = vcombine.low %v985_v61, %v989_v62  ;;  %v5995_v62 = vcombine.low %v1017_v11, %v1021_v15 }
 0x137   :  { %3849 = vmatprep.subr.bf16.mxu0 %v5924_v21  ;;  %3947 = vmatprep.subr.bf16.mxu1 %v5734_v22  ;;  %v5773_v21 = vcombine.low %v794_v63, %v798_v1  ;;  %v5972_v22 = vcombine.high %v993_v7, %v997_v8  ;;  %v5782_v23 = vcombine.high %v802_v13, %v806_v3  ;;  %v866_v11 = vld [vmem:[%s8980_s3 + $0x708] sm:$0xff] }
 0x138   :  { %v7249_v39 = vpop.f32.mrb[8].mxu1  ;;  %v870_v15 = vld [vmem:[%s8980_s3 + $0x728] sm:$0xff] }
 0x139   :  { %v7251_v41 = vpop.f32.mrb[9].mxu1 }
 0x13a   :  { %3850 = vmatpush1.bf16.msra.mxu0 %v5923_v27  ;;  %3948 = vmatpush1.bf16.msra.mxu1 %v5733_v28  ;;  %v622_v9 = vpop.f32.mrb[10].mxu1  ;;  %v814_v27 = vld [vmem:[%s8980_s3 + $0x568] sm:$0xff]  ;;  %v119_v28 = vsub.s32 4, %v7052_v17 }
 0x13b   :  { %3851 = vmatprep.subr.bf16.mxu0 %v5932_v29  ;;  %3949 = vmatprep.subr.bf16.mxu1 %v5742_v30  ;;  %v623_v44 = vpop.f32.mrb[11].mxu1  ;;  %v5971_v29 = vcombine.low %v993_v7, %v997_v8  ;;  %v5781_v30 = vcombine.low %v802_v13, %v806_v3  ;;  %v5790_v36 = vcombine.high %v810_v26, %v814_v27  ;;  %v131_v9 = vsub.s32 7, %v7052_v17 }
 0x13c   :  { %v5789_v44 = vcombine.low %v810_v26, %v814_v27 }
 0x13e   :  { %3852 = vmatpush1.bf16.msra.mxu0 %v5931_v42  ;;  %3950 = vmatpush1.bf16.msra.mxu1 %v5741_v0  ;;  %v818_v42 = vld [vmem:[%s8980_s3 + $0x588] sm:$0xff] }
 0x13f   :  { %3853 = vmatprep.subr.bf16.mxu0 %v5940_v12  ;;  %3960 = vmatprep.subr.bf16.mxu1 %v5750_v14  ;;  %v822_v0 = vld [vmem:[%s8980_s3 + $0x5a8] sm:$0xff]  ;;  %v120_v12 = vrot.slane %v7060_v19, %v119_v28  ;;  %v5979_v14 = vcombine.low %v1001_v24, %v1005_v25 }
 0x140   :  { %v5798_v10 = vcombine.high %v818_v42, %v822_v0  ;;  %v5797_v51 = vcombine.low %v818_v42, %v822_v0  ;;  %v850_v24 = vld [vmem:[%s8980_s3 + $0x688] sm:$0xff] }
 0x141   :  { %3952 = vmatmul.mubr.bf16.vlgmr.msra.gmra.mrb[16].mxu1 %v7077_v34  ;;  %v578_v49 = vadd.f32 %v7091_v40, %v120_v12  ;;  %v834_v40 = vld [vmem:[%s8980_s3 + $0x608] sm:$0xff] }
 0x142   :  { %3854 = vmatpush1.bf16.msra.mxu0 %v5939_v46  ;;  %3961 = vmatpush1.bf16.msra.mxu1 %v5749_v47  ;;  %v826_v46 = vld [vmem:[%s8980_s3 + $0x5c8] sm:$0xff] }
 0x143   :  { %3992 = vmatprep.mubr.bf16.mxu1 %v7155_v32  ;;  %3855 = vmatprep.subr.bf16.mxu0 %v5948_v48  ;;  %v830_v47 = vld [vmem:[%s8980_s3 + $0x5e8] sm:$0xff]  ;;  %v132_v48 = vrot.slane %v7060_v19, %v131_v9  ;;  %v629_v61 = vmax.f32 %v578_v49, 0.0  ;;  %v5846_v49 = vcombine.high %v866_v11, %v870_v15 }
 0x144   :  { %3962 = vmatprep.subr.bf16.mxu1 %v5758_v50  ;;  %v5987_v50 = vcombine.low %v1009_v37, %v1013_v38  ;;  %v5806_v53 = vcombine.high %v826_v46, %v830_v47  ;;  %v5805_v63 = vcombine.low %v826_v46, %v830_v47  ;;  %v854_v25 = vld [vmem:[%s8980_s3 + $0x6a8] sm:$0xff]  ;;  %v1053_v37 = vld [vmem:[%s8980_s3 + $0xce0] sm:$0xff] }
 0x145   :  { %v7373_v8 = vpack.c.bf16 %v629_v61, %v629_v61  ;;  %v858_v38 = vld [vmem:[%s8980_s3 + $0x6c8] sm:$0xff]  ;;  %v5829_v12 = vcombine.low %v850_v24, %v854_v25  ;;  %v1077_v61 = vld [vmem:[%s8980_s3 + $0xda0] sm:$0xff] }
 0x146   :  { %3856 = vmatpush1.bf16.msra.mxu0 %v5947_v56  ;;  %3963 = vmatpush1.bf16.msra.mxu1 %v5757_v58  ;;  %v1025_v56 = vld [vmem:[%s8980_s3 + $0xc00] sm:$0xff]  ;;  %v862_v42 = vld [vmem:[%s8980_s3 + $0x6e8] sm:$0xff] }
 0x147   :  { %3857 = vmatprep.subr.bf16.mxu0 %v5956_v59  ;;  %3964 = vmatprep.subr.bf16.mxu1 %v5766_v60  ;;  %v1029_v58 = vld [vmem:[%s8980_s3 + $0xc20] sm:$0xff]  ;;  %v838_v59 = vld [vmem:[%s8980_s3 + $0x628] sm:$0xff]  ;;  %v621_v60 = vadd.f32 %v7251_v41, %v132_v48  ;;  %v5837_v47 = vcombine.low %v858_v38, %v862_v42 }
 0x148   :  { %v6004_v1 = vcombine.high %v1025_v56, %v1029_v58  ;;  %v842_v41 = vld [vmem:[%s8980_s3 + $0x648] sm:$0xff]  ;;  %v6003_v13 = vcombine.low %v1025_v56, %v1029_v58  ;;  %v5813_v3 = vcombine.low %v834_v40, %v838_v59  ;;  %v5845_v58 = vcombine.low %v866_v11, %v870_v15  ;;  %v1109_v11 = vld [vmem:[%s8980_s3 + $0xea0] sm:$0xff] }
 0x149   :  { %v632_v7 = vmax.f32 %v621_v60, 0.0  ;;  %v1073_v60 = vld [vmem:[%s8980_s3 + $0xd80] sm:$0xff]  ;;  %v914_v15 = vld [vmem:[%s8980_s3 + $0x888] sm:$0xff] }
 0x14a   :  { %3858 = vmatpush1.bf16.msra.mxu0 %v5955_v2  ;;  %3965 = vmatpush1.bf16.msra.mxu1 %v5765_v4  ;;  %v5814_v2 = vcombine.high %v834_v40, %v838_v59  ;;  %v1033_v4 = vld [vmem:[%s8980_s3 + $0xc40] sm:$0xff] }
 0x14b   :  { %3859 = vmatprep.subr.bf16.mxu0 %v5964_v5  ;;  %3966 = vmatprep.subr.bf16.mxu1 %v5774_v6  ;;  %v1037_v5 = vld [vmem:[%s8980_s3 + $0xc60] sm:$0xff]  ;;  %v846_v6 = vld [vmem:[%s8980_s3 + $0x668] sm:$0xff]  ;;  %v7387_v26 = vpack.c.bf16 %v632_v7, %v632_v7 }
 0x14c   :  { %v6011_v27 = vcombine.low %v1033_v4, %v1037_v5  ;;  %v890_v7 = vld [vmem:[%s8980_s3 + $0x7c8] sm:$0xff] }
 0x14e   :  { %3860 = vmatpush1.bf16.msra.mxu0 %v5963_v16  ;;  %3967 = vmatpush1.bf16.msra.mxu1 %v5773_v21  ;;  %v6012_v16 = vcombine.high %v1033_v4, %v1037_v5  ;;  %v5822_v21 = vcombine.high %v842_v41, %v846_v6  ;;  %v6052_v4 = vcombine.high %v1073_v60, %v1077_v61 }
 0x14f   :  { %3861 = vmatprep.subr.bf16.mxu0 %v5972_v22  ;;  %3968 = vmatprep.subr.bf16.mxu1 %v5782_v23  ;;  %v1041_v22 = vld [vmem:[%s8980_s3 + $0xc80] sm:$0xff] }
 0x150   :  { %v1045_v23 = vld [vmem:[%s8980_s3 + $0xca0] sm:$0xff] }
 0x151   :  { %v6019_v0 = vcombine.low %v1041_v22, %v1045_v23 }
 0x152   :  { %3862 = vmatpush1.bf16.msra.mxu0 %v5971_v29  ;;  %3969 = vmatpush1.bf16.msra.mxu1 %v5781_v30  ;;  %v5821_v29 = vcombine.low %v842_v41, %v846_v6  ;;  %v6020_v30 = vcombine.high %v1041_v22, %v1045_v23  ;;  %v1081_v41 = vld [vmem:[%s8980_s3 + $0xdc0] sm:$0xff] }
 0x153   :  { %3863 = vmatprep.subr.bf16.mxu0 %v5980_v35  ;;  %3970 = vmatprep.subr.bf16.mxu1 %v5790_v36  ;;  %v5830_v35 = vcombine.high %v850_v24, %v854_v25  ;;  %v1049_v36 = vld [vmem:[%s8980_s3 + $0xcc0] sm:$0xff]  ;;  %v898_v25 = vld [vmem:[%s8980_s3 + $0x808] sm:$0xff] }
 0x154   :  { %v6027_v46 = vcombine.low %v1049_v36, %v1053_v37  ;;  %v1085_v6 = vld [vmem:[%s8980_s3 + $0xde0] sm:$0xff] }
 0x155   :  { %v1089_v23 = vld [vmem:[%s8980_s3 + $0xe00] sm:$0xff] }
 0x156   :  { %3864 = vmatpush1.bf16.msra.mxu0 %v5979_v14  ;;  %3971 = vmatpush1.bf16.msra.mxu1 %v5789_v44  ;;  %v6028_v14 = vcombine.high %v1049_v36, %v1053_v37  ;;  %v5838_v44 = vcombine.high %v858_v38, %v862_v42  ;;  %v1093_v24 = vld [vmem:[%s8980_s3 + $0xe20] sm:$0xff]  ;;  %v906_v42 = vld [vmem:[%s8980_s3 + $0x848] sm:$0xff] }
 0x157   :  { %3865 = vmatprep.subr.bf16.mxu0 %v5988_v45  ;;  %3972 = vmatprep.subr.bf16.mxu1 %v5798_v10  ;;  %v1057_v45 = vld [vmem:[%s8980_s3 + $0xd00] sm:$0xff] }
 0x158   :  { %v1061_v10 = vld [vmem:[%s8980_s3 + $0xd20] sm:$0xff] }
 0x159   :  { %v6036_v48 = vcombine.high %v1057_v45, %v1061_v10  ;;  %v6035_v56 = vcombine.low %v1057_v45, %v1061_v10  ;;  %v1097_v37 = vld [vmem:[%s8980_s3 + $0xe40] sm:$0xff] }
 0x15a   :  { %3866 = vmatpush1.bf16.msra.mxu0 %v5987_v50  ;;  %3973 = vmatpush1.bf16.msra.mxu1 %v5797_v51  ;;  %v1065_v50 = vld [vmem:[%s8980_s3 + $0xd40] sm:$0xff] }
 0x15b   :  { %3867 = vmatprep.subr.bf16.mxu0 %v5996_v52  ;;  %3974 = vmatprep.subr.bf16.mxu1 %v5806_v53  ;;  %v1069_v51 = vld [vmem:[%s8980_s3 + $0xd60] sm:$0xff]  ;;  %v874_v52 = vld [vmem:[%s8980_s3 + $0x748] sm:$0xff] }
 0x15c   :  { %v878_v53 = vld [vmem:[%s8980_s3 + $0x768] sm:$0xff]  ;;  %v6044_v40 = vcombine.high %v1065_v50, %v1069_v51  ;;  %v1101_v38 = vld [vmem:[%s8980_s3 + $0xe60] sm:$0xff] }
 0x15d   :  { %v5854_v59 = vcombine.high %v874_v52, %v878_v53  ;;  %v1105_v45 = vld [vmem:[%s8980_s3 + $0xe80] sm:$0xff] }
 0x15e   :  { %3868 = vmatpush1.bf16.msra.mxu0 %v5995_v62  ;;  %3975 = vmatpush1.bf16.msra.mxu1 %v5805_v63  ;;  %v882_v62 = vld [vmem:[%s8980_s3 + $0x788] sm:$0xff] }
 0x15f   :  { %3878 = vmatprep.subr.bf16.mxu0 %v6004_v1  ;;  %3976 = vmatprep.subr.bf16.mxu1 %v5814_v2  ;;  %v886_v63 = vld [vmem:[%s8980_s3 + $0x7a8] sm:$0xff]  ;;  %v6043_v1 = vcombine.low %v1065_v50, %v1069_v51  ;;  %v5853_v2 = vcombine.low %v874_v52, %v878_v53  ;;  %v1113_v51 = vld [vmem:[%s8980_s3 + $0xec0] sm:$0xff] }
 0x160   :  { %v5862_v5 = vcombine.high %v882_v62, %v886_v63  ;;  %v1117_v52 = vld [vmem:[%s8980_s3 + $0xee0] sm:$0xff]  ;;  %v922_v53 = vld [vmem:[%s8980_s3 + $0x8c8] sm:$0xff] }
 0x161   :  { %3870 = vmatmul.mubr.bf16.vlgmr.msra.gmra.mrb[4].mxu0 %v7373_v8 }
 0x162   :  { %3879 = vmatpush1.bf16.msra.mxu0 %v6003_v13  ;;  %3977 = vmatpush1.bf16.msra.mxu1 %v5813_v3  ;;  %v894_v13 = vld [vmem:[%s8980_s3 + $0x7e8] sm:$0xff]  ;;  %v6051_v3 = vcombine.low %v1073_v60, %v1077_v61  ;;  %v1121_v61 = vld [vmem:[%s8980_s3 + $0xf00] sm:$0xff] }
 0x163   :  { %3880 = vmatprep.subr.bf16.mxu0 %v6012_v16  ;;  %3978 = vmatprep.subr.bf16.mxu1 %v5822_v21  ;;  %v5861_v16 = vcombine.low %v882_v62, %v886_v63  ;;  %v6060_v21 = vcombine.high %v1081_v41, %v1085_v6  ;;  %v5870_v22 = vcombine.high %v890_v7, %v894_v13  ;;  %v1125_v62 = vld [vmem:[%s8980_s3 + $0xf20] sm:$0xff]  ;;  %v930_v63 = vld [vmem:[%s8980_s3 + $0x908] sm:$0xff] }
 0x164   :  { %3910 = vmatprep.mubr.bf16.mxu0 %v7387_v26 }
 0x166   :  { %3881 = vmatpush1.bf16.msra.mxu0 %v6011_v27  ;;  %3979 = vmatpush1.bf16.msra.mxu1 %v5821_v29  ;;  %v902_v27 = vld [vmem:[%s8980_s3 + $0x828] sm:$0xff]  ;;  %v6059_v29 = vcombine.low %v1081_v41, %v1085_v6  ;;  %v1129_v6 = vld [vmem:[%s8980_s3 + $0xf40] sm:$0xff] }
 0x167   :  { %3882 = vmatprep.subr.bf16.mxu0 %v6020_v30  ;;  %3980 = vmatprep.subr.bf16.mxu1 %v5830_v35  ;;  %v5869_v30 = vcombine.low %v890_v7, %v894_v13  ;;  %v6068_v35 = vcombine.high %v1089_v23, %v1093_v24  ;;  %v5878_v36 = vcombine.high %v898_v25, %v902_v27  ;;  %v1133_v7 = vld [vmem:[%s8980_s3 + $0xf60] sm:$0xff]  ;;  %v938_v13 = vld [vmem:[%s8980_s3 + $0x948] sm:$0xff] }
 0x16a   :  { %3883 = vmatpush1.bf16.msra.mxu0 %v6019_v0  ;;  %3981 = vmatpush1.bf16.msra.mxu1 %v5829_v12  ;;  %v910_v0 = vld [vmem:[%s8980_s3 + $0x868] sm:$0xff]  ;;  %v6067_v12 = vcombine.low %v1089_v23, %v1093_v24  ;;  %v6108_v23 = vcombine.high %v1129_v6, %v1133_v7 }
 0x16b   :  { %3884 = vmatprep.subr.bf16.mxu0 %v6028_v14  ;;  %3982 = vmatprep.subr.bf16.mxu1 %v5838_v44  ;;  %v5877_v14 = vcombine.low %v898_v25, %v902_v27  ;;  %v6076_v44 = vcombine.high %v1097_v37, %v1101_v38  ;;  %v5886_v10 = vcombine.high %v906_v42, %v910_v0  ;;  %v1137_v25 = vld [vmem:[%s8980_s3 + $0xf80] sm:$0xff] }
 0x16c   :  { %v1141_v27 = vld [vmem:[%s8980_s3 + $0xfa0] sm:$0xff] }
 0x16e   :  { %3885 = vmatpush1.bf16.msra.mxu0 %v6027_v46  ;;  %3983 = vmatpush1.bf16.msra.mxu1 %v5837_v47  ;;  %v918_v46 = vld [vmem:[%s8980_s3 + $0x8a8] sm:$0xff]  ;;  %v6075_v47 = vcombine.low %v1097_v37, %v1101_v38  ;;  %v6116_v38 = vcombine.high %v1137_v25, %v1141_v27 }
 0x16f   :  { %3886 = vmatprep.subr.bf16.mxu0 %v6036_v48  ;;  %3984 = vmatprep.subr.bf16.mxu1 %v5846_v49  ;;  %v5885_v48 = vcombine.low %v906_v42, %v910_v0  ;;  %v6084_v49 = vcombine.high %v1105_v45, %v1109_v11  ;;  %v5894_v50 = vcombine.high %v914_v15, %v918_v46  ;;  %v1145_v0 = vld [vmem:[%s8980_s3 + $0xfc0] sm:$0xff] }
 0x172   :  { %3887 = vmatpush1.bf16.msra.mxu0 %v6035_v56  ;;  %3985 = vmatpush1.bf16.msra.mxu1 %v5845_v58  ;;  %v926_v56 = vld [vmem:[%s8980_s3 + $0x8e8] sm:$0xff]  ;;  %v6083_v58 = vcombine.low %v1105_v45, %v1109_v11 }
 0x173   :  { %3888 = vmatprep.subr.bf16.mxu0 %v6044_v40  ;;  %3986 = vmatprep.subr.bf16.mxu1 %v5854_v59  ;;  %v5893_v40 = vcombine.low %v914_v15, %v918_v46  ;;  %v6092_v59 = vcombine.high %v1113_v51, %v1117_v52  ;;  %v5902_v60 = vcombine.high %v922_v53, %v926_v56  ;;  %v962_v46 = vld [vmem:[%s8980_s3 + $0xa08] sm:$0xff] }
 0x176   :  { %3889 = vmatpush1.bf16.msra.mxu0 %v6043_v1  ;;  %3987 = vmatpush1.bf16.msra.mxu1 %v5853_v2  ;;  %v934_v1 = vld [vmem:[%s8980_s3 + $0x928] sm:$0xff]  ;;  %v6091_v2 = vcombine.low %v1113_v51, %v1117_v52 }
 0x177   :  { %3890 = vmatprep.subr.bf16.mxu0 %v6052_v4  ;;  %3988 = vmatprep.subr.bf16.mxu1 %v5862_v5  ;;  %v5901_v4 = vcombine.low %v922_v53, %v926_v56  ;;  %v6100_v5 = vcombine.high %v1121_v61, %v1125_v62  ;;  %v5910_v41 = vcombine.high %v930_v63, %v934_v1  ;;  %v970_v56 = vld [vmem:[%s8980_s3 + $0xa48] sm:$0xff] }
 0x17a   :  { %3891 = vmatpush1.bf16.msra.mxu0 %v6051_v3  ;;  %3989 = vmatpush1.bf16.msra.mxu1 %v5861_v16  ;;  %v942_v3 = vld [vmem:[%s8980_s3 + $0x968] sm:$0xff]  ;;  %v6099_v16 = vcombine.low %v1121_v61, %v1125_v62 }
 0x17b   :  { %3892 = vmatprep.subr.bf16.mxu0 %v6060_v21  ;;  %3990 = vmatprep.subr.bf16.mxu1 %v5870_v22  ;;  %v5909_v21 = vcombine.low %v930_v63, %v934_v1  ;;  %v127_v22 = vsub.s32 6, %v7052_v17  ;;  %v5918_v24 = vcombine.high %v938_v13, %v942_v3  ;;  %v978_v1 = vld [vmem:[%s8980_s3 + $0xa88] sm:$0xff]  ;;  %v6572_v17 = vld [vmem:[%s8984_s7 + $0x30] sm:$0xff]  }
 0x17d   :  { %v128_v37 = vrot.slane %v7060_v19, %v127_v22  ;;  %v958_v19 = vld [vmem:[%s8980_s3 + $0x9e8] sm:$0xff] }
 0x17e   :  { %3893 = vmatpush1.bf16.msra.mxu0 %v6059_v29  ;;  %3991 = vmatpush1.bf16.msra.mxu1 %v5869_v30  ;;  %v946_v29 = vld [vmem:[%s8980_s3 + $0x988] sm:$0xff] }
 0x17f   :  { %3894 = vmatprep.subr.bf16.mxu0 %v6068_v35  ;;  %4001 = vmatprep.subr.bf16.mxu1 %v5878_v36  ;;  %v950_v30 = vld [vmem:[%s8980_s3 + $0x9a8] sm:$0xff]  ;;  %v6107_v35 = vcombine.low %v1129_v6, %v1133_v7  ;;  %v5917_v36 = vcombine.low %v938_v13, %v942_v3 }
 0x180   :  { %v5926_v42 = vcombine.high %v946_v29, %v950_v30  ;;  %v5925_v45 = vcombine.low %v946_v29, %v950_v30 }
 0x181   :  { %3993 = vmatmul.mubr.bf16.vlgmr.msra.gmra.mrb[16].mxu1 %v7153_v31 }
 0x182   :  { %3895 = vmatpush1.bf16.msra.mxu0 %v6067_v12  ;;  %4002 = vmatpush1.bf16.msra.mxu1 %v5877_v14  ;;  %v1149_v12 = vld [vmem:[%s8980_s3 + $0xfe0] sm:$0xff]  ;;  %v954_v14 = vld [vmem:[%s8980_s3 + $0x9c8] sm:$0xff] }
 0x183   :  { %4033 = vmatprep.mubr.bf16.mxu1 %v7170_v43  ;;  %3896 = vmatprep.subr.bf16.mxu0 %v6076_v44  ;;  %v6115_v44 = vcombine.low %v1137_v25, %v1141_v27  ;;  %v6124_v11 = vcombine.high %v1145_v0, %v1149_v12  ;;  %v5934_v15 = vcombine.high %v954_v14, %v958_v19 }
 0x184   :  { %4003 = vmatprep.subr.bf16.mxu1 %v5886_v10  ;;  %v619_v10 = vadd.f32 %v7249_v39, %v128_v37  ;;  %v647_v39 = vld [vmem:[%s8980_s3 + $0x30] sm:$0xff] }
 0x185   :  { %v675_v37 = vld [vmem:[%s8980_s3 + $0x110] sm:$0xff] }
 0x186   :  { %3897 = vmatpush1.bf16.msra.mxu0 %v6075_v47  ;;  %4004 = vmatpush1.bf16.msra.mxu1 %v5885_v48  ;;  %v966_v47 = vld [vmem:[%s8980_s3 + $0xa28] sm:$0xff]  ;;  %v643_v48 = vld [vmem:[%s8980_s3 + $0x10] sm:$0xff]  ;;  %v631_v51 = vmax.f32 %v619_v10, 0.0 }
 0x187   :  { %3898 = vmatprep.subr.bf16.mxu0 %v6084_v49  ;;  %4005 = vmatprep.subr.bf16.mxu1 %v5894_v50  ;;  %v6123_v49 = vcombine.low %v1145_v0, %v1149_v12  ;;  %v5933_v50 = vcombine.low %v954_v14, %v958_v19  ;;  %v5942_v52 = vcombine.high %v962_v46, %v966_v47  ;;  %v1002_v19 = vld [vmem:[%s8980_s3 + $0xb48] sm:$0xff]  ;;  %v687_v10 = vld [vmem:[%s8980_s3 + $0x170] sm:$0xff] }
 0x188   :  { %v5624_v53 = vcombine.high %v643_v48, %v647_v39  ;;  %v5623_v61 = vcombine.low %v643_v48, %v647_v39  ;;  %v7578_v62 = vpack.c.bf16 %v631_v51, %v631_v51  ;;  %v1010_v48 = vld [vmem:[%s8980_s3 + $0xb88] sm:$0xff] }
 0x189   :  { %v1014_v39 = vld [vmem:[%s8980_s3 + $0xba8] sm:$0xff] }
 0x18a   :  { %3899 = vmatpush1.bf16.msra.mxu0 %v6083_v58  ;;  %4006 = vmatpush1.bf16.msra.mxu1 %v5893_v40  ;;  %v974_v58 = vld [vmem:[%s8980_s3 + $0xa68] sm:$0xff]  ;;  %v651_v40 = vld [vmem:[%s8980_s3 + $0x50] sm:$0xff] }
 0x18b   :  { %3900 = vmatprep.subr.bf16.mxu0 %v6092_v59  ;;  %4007 = vmatprep.subr.bf16.mxu1 %v5902_v60  ;;  %v655_v59 = vld [vmem:[%s8980_s3 + $0x70] sm:$0xff]  ;;  %v5941_v60 = vcombine.low %v962_v46, %v966_v47  ;;  %v5950_v63 = vcombine.high %v970_v56, %v974_v58  ;;  %v5949_v6 = vcombine.low %v970_v56, %v974_v58  ;;  %v1018_v58 = vld [vmem:[%s8980_s3 + $0xbc8] sm:$0xff] }
 0x18c   :  { %v5631_v7 = vcombine.low %v651_v40, %v655_v59 }
 0x18e   :  { %3901 = vmatpush1.bf16.msra.mxu0 %v6091_v2  ;;  %4008 = vmatpush1.bf16.msra.mxu1 %v5901_v4  ;;  %v5632_v2 = vcombine.high %v651_v40, %v655_v59  ;;  %v982_v4 = vld [vmem:[%s8980_s3 + $0xaa8] sm:$0xff]  ;;  %v699_v59 = vld [vmem:[%s8980_s3 + $0x1d0] sm:$0xff] }
 0x18f   :  { %3902 = vmatprep.subr.bf16.mxu0 %v6100_v5  ;;  %4009 = vmatprep.subr.bf16.mxu1 %v5910_v41  ;;  %v659_v5 = vld [vmem:[%s8980_s3 + $0x90] sm:$0xff]  ;;  %v5958_v13 = vcombine.high %v978_v1, %v982_v4  ;;  %v5957_v25 = vcombine.low %v978_v1, %v982_v4  ;;  %v1022_v40 = vld [vmem:[%s8980_s3 + $0xbe8] sm:$0xff] }
 0x190   :  { %v663_v41 = vld [vmem:[%s8980_s3 + $0xb0] sm:$0xff]  ;;  %v5998_v1 = vcombine.high %v1018_v58, %v1022_v40  ;;  %v1026_v4 = vld [vmem:[%s8980_s3 + $0xc08] sm:$0xff] }
 0x191   :  { %v5640_v3 = vcombine.high %v659_v5, %v663_v41  ;;  %v5639_v27 = vcombine.low %v659_v5, %v663_v41  ;;  %v1030_v5 = vld [vmem:[%s8980_s3 + $0xc28] sm:$0xff]  ;;  %v707_v41 = vld [vmem:[%s8980_s3 + $0x210] sm:$0xff] }
 0x192   :  { %3903 = vmatpush1.bf16.msra.mxu0 %v6099_v16  ;;  %4010 = vmatpush1.bf16.msra.mxu1 %v5909_v21  ;;  %v986_v16 = vld [vmem:[%s8980_s3 + $0xac8] sm:$0xff] }
 0x193   :  { %3904 = vmatprep.subr.bf16.mxu0 %v6108_v23  ;;  %4011 = vmatprep.subr.bf16.mxu1 %v5918_v24  ;;  %v990_v21 = vld [vmem:[%s8980_s3 + $0xae8] sm:$0xff]  ;;  %v667_v23 = vld [vmem:[%s8980_s3 + $0xd0] sm:$0xff] }
 0x194   :  { %v671_v24 = vld [vmem:[%s8980_s3 + $0xf0] sm:$0xff]  ;;  %v5966_v29 = vcombine.high %v986_v16, %v990_v21 }
 0x195   :  { %v5648_v30 = vcombine.high %v667_v23, %v671_v24  ;;  %v5647_v0 = vcombine.low %v667_v23, %v671_v24  ;;  %v1038_v23 = vld [vmem:[%s8980_s3 + $0xc68] sm:$0xff]  ;;  %v715_v24 = vld [vmem:[%s8980_s3 + $0x250] sm:$0xff] }
 0x196   :  { %3905 = vmatpush1.bf16.msra.mxu0 %v6107_v35  ;;  %4012 = vmatpush1.bf16.msra.mxu1 %v5917_v36  ;;  %v994_v35 = vld [vmem:[%s8980_s3 + $0xb08] sm:$0xff] }
 0x197   :  { %3906 = vmatprep.subr.bf16.mxu0 %v6116_v38  ;;  %4013 = vmatprep.subr.bf16.mxu1 %v5926_v42  ;;  %v998_v36 = vld [vmem:[%s8980_s3 + $0xb28] sm:$0xff]  ;;  %v679_v38 = vld [vmem:[%s8980_s3 + $0x130] sm:$0xff]  ;;  %v5965_v42 = vcombine.low %v986_v16, %v990_v21 }
 0x198   :  { %v5974_v12 = vcombine.high %v994_v35, %v998_v36  ;;  %v5656_v14 = vcombine.high %v675_v37, %v679_v38  ;;  %v1034_v21 = vld [vmem:[%s8980_s3 + $0xc48] sm:$0xff] }
 0x19a   :  { %3907 = vmatpush1.bf16.msra.mxu0 %v6115_v44  ;;  %4014 = vmatpush1.bf16.msra.mxu1 %v5925_v45  ;;  %v1006_v44 = vld [vmem:[%s8980_s3 + $0xb68] sm:$0xff]  ;;  %v683_v45 = vld [vmem:[%s8980_s3 + $0x150] sm:$0xff] }
 0x19b   :  { %3908 = vmatprep.subr.bf16.mxu0 %v6124_v11  ;;  %4015 = vmatprep.subr.bf16.mxu1 %v5934_v15  ;;  %v5973_v11 = vcombine.low %v994_v35, %v998_v36  ;;  %v5655_v15 = vcombine.low %v675_v37, %v679_v38  ;;  %v5982_v46 = vcombine.high %v1002_v19, %v1006_v44  ;;  %v1042_v36 = vld [vmem:[%s8980_s3 + $0xc88] sm:$0xff]  ;;  %v723_v38 = vld [vmem:[%s8980_s3 + $0x290] sm:$0xff] }
 0x19c   :  { %v5664_v47 = vcombine.high %v683_v45, %v687_v10  ;;  %v5981_v51 = vcombine.low %v1002_v19, %v1006_v44  ;;  %v1046_v37 = vld [vmem:[%s8980_s3 + $0xca8] sm:$0xff] }
 0x19d   :  { %v1050_v44 = vld [vmem:[%s8980_s3 + $0xcc8] sm:$0xff] }
 0x19e   :  { %3909 = vmatpush1.bf16.msra.mxu0 %v6123_v49  ;;  %4016 = vmatpush1.bf16.msra.mxu1 %v5933_v50  ;;  %v691_v49 = vld [vmem:[%s8980_s3 + $0x190] sm:$0xff] }
 0x19f   :  { %4017 = vmatprep.subr.bf16.mxu1 %v5942_v52  ;;  %4083 = vmatprep.subr.bf16.mxu0 %v5624_v53  ;;  %v695_v50 = vld [vmem:[%s8980_s3 + $0x1b0] sm:$0xff]  ;;  %v5663_v52 = vcombine.low %v683_v45, %v687_v10  ;;  %v5990_v53 = vcombine.high %v1010_v48, %v1014_v39  ;;  %v1054_v45 = vld [vmem:[%s8980_s3 + $0xce8] sm:$0xff] }
 0x1a0   :  { %v5672_v56 = vcombine.high %v691_v49, %v695_v50  ;;  %v731_v10 = vld [vmem:[%s8980_s3 + $0x2d0] sm:$0xff] }
 0x1a1   :  { %3911 = vmatmul.mubr.bf16.vlgmr.msra.gmra.mrb[4].mxu0 %v7578_v62 }
 0x1a2   :  { %4018 = vmatpush1.bf16.msra.mxu1 %v5941_v60  ;;  %4084 = vmatpush1.bf16.msra.mxu0 %v5623_v61  ;;  %v703_v60 = vld [vmem:[%s8980_s3 + $0x1f0] sm:$0xff]  ;;  %v5989_v61 = vcombine.low %v1010_v48, %v1014_v39  ;;  %v1058_v39 = vld [vmem:[%s8980_s3 + $0xd08] sm:$0xff] }
 0x1a3   :  { %4115 = vmatprep.mubr.bf16.mxu0 %v7075_v33  ;;  %4019 = vmatprep.subr.bf16.mxu1 %v5950_v63  ;;  %v5671_v63 = vcombine.low %v691_v49, %v695_v50  ;;  %v1062_v49 = vld [vmem:[%s8980_s3 + $0xd28] sm:$0xff]  ;;  %v739_v50 = vld [vmem:[%s8980_s3 + $0x310] sm:$0xff] }
 0x1a4   :  { %4085 = vmatprep.subr.bf16.mxu0 %v5632_v2  ;;  %v5680_v2 = vcombine.high %v699_v59, %v703_v60 }
 0x1a6   :  { %4020 = vmatpush1.bf16.msra.mxu1 %v5949_v6  ;;  %4086 = vmatpush1.bf16.msra.mxu0 %v5631_v7  ;;  %v711_v6 = vld [vmem:[%s8980_s3 + $0x230] sm:$0xff]  ;;  %v5997_v7 = vcombine.low %v1018_v58, %v1022_v40  ;;  %v1066_v40 = vld [vmem:[%s8980_s3 + $0xd48] sm:$0xff] }
 0x1a7   :  { %4021 = vmatprep.subr.bf16.mxu1 %v5958_v13  ;;  %4087 = vmatprep.subr.bf16.mxu0 %v5640_v3  ;;  %v5679_v13 = vcombine.low %v699_v59, %v703_v60  ;;  %v6006_v3 = vcombine.high %v1026_v4, %v1030_v5  ;;  %v5688_v16 = vcombine.high %v707_v41, %v711_v6  ;;  %v1070_v59 = vld [vmem:[%s8980_s3 + $0xd68] sm:$0xff]  ;;  %v747_v60 = vld [vmem:[%s8980_s3 + $0x350] sm:$0xff] }
 0x1aa   :  { %4022 = vmatpush1.bf16.msra.mxu1 %v5957_v25  ;;  %4088 = vmatpush1.bf16.msra.mxu0 %v5639_v27  ;;  %v719_v25 = vld [vmem:[%s8980_s3 + $0x270] sm:$0xff]  ;;  %v6005_v27 = vcombine.low %v1026_v4, %v1030_v5  ;;  %v1074_v5 = vld [vmem:[%s8980_s3 + $0xd88] sm:$0xff] }
 0x1ab   :  { %4023 = vmatprep.subr.bf16.mxu1 %v5966_v29  ;;  %4089 = vmatprep.subr.bf16.mxu0 %v5648_v30  ;;  %v5687_v29 = vcombine.low %v707_v41, %v711_v6  ;;  %v6014_v30 = vcombine.high %v1034_v21, %v1038_v23  ;;  %v5696_v35 = vcombine.high %v715_v24, %v719_v25  ;;  %v1078_v41 = vld [vmem:[%s8980_s3 + $0xda8] sm:$0xff]  ;;  %v755_v6 = vld [vmem:[%s8980_s3 + $0x390] sm:$0xff] }
 0x1ae   :  { %4024 = vmatpush1.bf16.msra.mxu1 %v5965_v42  ;;  %4090 = vmatpush1.bf16.msra.mxu0 %v5647_v0  ;;  %v727_v42 = vld [vmem:[%s8980_s3 + $0x2b0] sm:$0xff]  ;;  %v6013_v0 = vcombine.low %v1034_v21, %v1038_v23 }
 0x1af   :  { %4025 = vmatprep.subr.bf16.mxu1 %v5974_v12  ;;  %4091 = vmatprep.subr.bf16.mxu0 %v5656_v14  ;;  %v5695_v12 = vcombine.low %v715_v24, %v719_v25  ;;  %v6022_v14 = vcombine.high %v1042_v36, %v1046_v37  ;;  %v5704_v19 = vcombine.high %v723_v38, %v727_v42  ;;  %v1082_v24 = vld [vmem:[%s8980_s3 + $0xdc8] sm:$0xff] }
 0x1b0   :  { %v1086_v25 = vld [vmem:[%s8980_s3 + $0xde8] sm:$0xff] }
 0x1b2   :  { %4026 = vmatpush1.bf16.msra.mxu1 %v5973_v11  ;;  %4092 = vmatpush1.bf16.msra.mxu0 %v5655_v15  ;;  %v735_v11 = vld [vmem:[%s8980_s3 + $0x2f0] sm:$0xff]  ;;  %v6021_v15 = vcombine.low %v1042_v36, %v1046_v37  ;;  %v6053_v36 = vcombine.low %v1074_v5, %v1078_v41 }
 0x1b3   :  { %4027 = vmatprep.subr.bf16.mxu1 %v5982_v46  ;;  %4093 = vmatprep.subr.bf16.mxu0 %v5664_v47  ;;  %v5703_v46 = vcombine.low %v723_v38, %v727_v42  ;;  %v6030_v47 = vcombine.high %v1050_v44, %v1054_v45  ;;  %v5712_v48 = vcombine.high %v731_v10, %v735_v11 }
 0x1b4   :  { %v6062_v42 = vcombine.high %v1082_v24, %v1086_v25 }
 0x1b6   :  { %4028 = vmatpush1.bf16.msra.mxu1 %v5981_v51  ;;  %4094 = vmatpush1.bf16.msra.mxu0 %v5663_v52  ;;  %v743_v51 = vld [vmem:[%s8980_s3 + $0x330] sm:$0xff]  ;;  %v6029_v52 = vcombine.low %v1050_v44, %v1054_v45  ;;  %v6061_v45 = vcombine.low %v1082_v24, %v1086_v25 }
 0x1b7   :  { %4029 = vmatprep.subr.bf16.mxu1 %v5990_v53  ;;  %4095 = vmatprep.subr.bf16.mxu0 %v5672_v56  ;;  %v5711_v53 = vcombine.low %v731_v10, %v735_v11  ;;  %v6038_v56 = vcombine.high %v1058_v39, %v1062_v49  ;;  %v5720_v58 = vcombine.high %v739_v50, %v743_v51  ;;  %v775_v44 = vld [vmem:[%s8980_s3 + $0x430] sm:$0xff] }
 0x1b8   :  { %v807_v24 = vld [vmem:[%s8980_s3 + $0x530] sm:$0xff] }
 0x1ba   :  { %4030 = vmatpush1.bf16.msra.mxu1 %v5989_v61  ;;  %4096 = vmatpush1.bf16.msra.mxu0 %v5671_v63  ;;  %v751_v61 = vld [vmem:[%s8980_s3 + $0x370] sm:$0xff]  ;;  %v6037_v63 = vcombine.low %v1058_v39, %v1062_v49 }
 0x1bb   :  { %4031 = vmatprep.subr.bf16.mxu1 %v5998_v1  ;;  %4097 = vmatprep.subr.bf16.mxu0 %v5680_v2  ;;  %v5719_v1 = vcombine.low %v739_v50, %v743_v51  ;;  %v6046_v2 = vcombine.high %v1066_v40, %v1070_v59  ;;  %v5728_v4 = vcombine.high %v747_v60, %v751_v61  ;;  %v783_v39 = vld [vmem:[%s8980_s3 + $0x470] sm:$0xff] }
 0x1be   :  { %4032 = vmatpush1.bf16.msra.mxu1 %v5997_v7  ;;  %4098 = vmatpush1.bf16.msra.mxu0 %v5679_v13  ;;  %v759_v7 = vld [vmem:[%s8980_s3 + $0x3b0] sm:$0xff]  ;;  %v6045_v13 = vcombine.low %v1066_v40, %v1070_v59 }
 0x1bf   :  { %4042 = vmatprep.subr.bf16.mxu1 %v6006_v3  ;;  %4099 = vmatprep.subr.bf16.mxu0 %v5688_v16  ;;  %v5727_v3 = vcombine.low %v747_v60, %v751_v61  ;;  %v6054_v16 = vcombine.high %v1074_v5, %v1078_v41  ;;  %v5736_v23 = vcombine.high %v755_v6, %v759_v7  ;;  %v791_v40 = vld [vmem:[%s8980_s3 + $0x4b0] sm:$0xff] }
 0x1c0   :  { %v5735_v38 = vcombine.low %v755_v6, %v759_v7  ;;  %v799_v5 = vld [vmem:[%s8980_s3 + $0x4f0] sm:$0xff] }
 0x1c1   :  { %4034 = vmatmul.mubr.bf16.vlgmr.msra.gmra.mrb[16].mxu1 %v7373_v8 }
 0x1c2   :  { %4043 = vmatpush1.bf16.msra.mxu1 %v6005_v27  ;;  %4074 = vmatprep.mubr.bf16.mxu1 %v7387_v26 }
 0x1c3   :  { %4100 = vmatpush1.bf16.msra.mxu0 %v5687_v29  ;;  %4044 = vmatprep.subr.bf16.mxu1 %v6014_v30  ;;  %v763_v29 = vld [vmem:[%s8980_s3 + $0x3d0] sm:$0xff] }
 0x1c4   :  { %4101 = vmatprep.subr.bf16.mxu0 %v5696_v35  ;;  %v767_v30 = vld [vmem:[%s8980_s3 + $0x3f0] sm:$0xff] }
 0x1c5   :  { %v5743_v10 = vcombine.low %v763_v29, %v767_v30 }
 0x1c6   :  { %4045 = vmatpush1.bf16.msra.mxu1 %v6013_v0  ;;  %v5744_v0 = vcombine.high %v763_v29, %v767_v30 }
 0x1c7   :  { %4102 = vmatpush1.bf16.msra.mxu0 %v5695_v12  ;;  %4046 = vmatprep.subr.bf16.mxu1 %v6022_v14  ;;  %v1090_v12 = vld [vmem:[%s8980_s3 + $0xe08] sm:$0xff] }
 0x1c8   :  { %4103 = vmatprep.subr.bf16.mxu0 %v5704_v19  ;;  %v1094_v14 = vld [vmem:[%s8980_s3 + $0xe28] sm:$0xff]  ;;  %v771_v19 = vld [vmem:[%s8980_s3 + $0x410] sm:$0xff] }
 0x1c9   :  { %v6070_v11 = vcombine.high %v1090_v12, %v1094_v14  ;;  %v6069_v49 = vcombine.low %v1090_v12, %v1094_v14  ;;  %v5751_v50 = vcombine.low %v771_v19, %v775_v44 }
 0x1ca   :  { %4047 = vmatpush1.bf16.msra.mxu1 %v6021_v15  ;;  %v5752_v15 = vcombine.high %v771_v19, %v775_v44  ;;  %v1138_v44 = vld [vmem:[%s8980_s3 + $0xf88] sm:$0xff] }
 0x1cb   :  { %4104 = vmatpush1.bf16.msra.mxu0 %v5703_v46  ;;  %4048 = vmatprep.subr.bf16.mxu1 %v6030_v47  ;;  %v1098_v46 = vld [vmem:[%s8980_s3 + $0xe48] sm:$0xff] }
 0x1cc   :  { %4105 = vmatprep.subr.bf16.mxu0 %v5712_v48  ;;  %v1102_v47 = vld [vmem:[%s8980_s3 + $0xe68] sm:$0xff]  ;;  %v779_v48 = vld [vmem:[%s8980_s3 + $0x450] sm:$0xff] }
 0x1cd   :  { %v6078_v51 = vcombine.high %v1098_v46, %v1102_v47  ;;  %v6077_v59 = vcombine.low %v1098_v46, %v1102_v47  ;;  %v5759_v60 = vcombine.low %v779_v48, %v783_v39 }
 0x1ce   :  { %4049 = vmatpush1.bf16.msra.mxu1 %v6029_v52  ;;  %v5760_v52 = vcombine.high %v779_v48, %v783_v39  ;;  %v1146_v39 = vld [vmem:[%s8980_s3 + $0xfc8] sm:$0xff] }
 0x1cf   :  { %4106 = vmatpush1.bf16.msra.mxu0 %v5711_v53  ;;  %4050 = vmatprep.subr.bf16.mxu1 %v6038_v56  ;;  %v1106_v53 = vld [vmem:[%s8980_s3 + $0xe88] sm:$0xff] }
 0x1d0   :  { %4107 = vmatprep.subr.bf16.mxu0 %v5720_v58  ;;  %v1110_v56 = vld [vmem:[%s8980_s3 + $0xea8] sm:$0xff]  ;;  %v787_v58 = vld [vmem:[%s8980_s3 + $0x490] sm:$0xff] }
 0x1d1   :  { %v6086_v61 = vcombine.high %v1106_v53, %v1110_v56  ;;  %v6085_v41 = vcombine.low %v1106_v53, %v1110_v56  ;;  %v5767_v6 = vcombine.low %v787_v58, %v791_v40 }
 0x1d2   :  { %4051 = vmatpush1.bf16.msra.mxu1 %v6037_v63  ;;  %v5768_v63 = vcombine.high %v787_v58, %v791_v40  ;;  %v644_v40 = vld [vmem:[%s8980_s3 + $0x18] sm:$0xff] }
 0x1d3   :  { %4108 = vmatpush1.bf16.msra.mxu0 %v5719_v1  ;;  %4052 = vmatprep.subr.bf16.mxu1 %v6046_v2  ;;  %v1114_v1 = vld [vmem:[%s8980_s3 + $0xec8] sm:$0xff] }
 0x1d4   :  { %v7740_v21 = vpop.f32.mrb[12].mxu1  ;;  %4109 = vmatprep.subr.bf16.mxu0 %v5728_v4  ;;  %v1118_v2 = vld [vmem:[%s8980_s3 + $0xee8] sm:$0xff]  ;;  %v795_v4 = vld [vmem:[%s8980_s3 + $0x4d0] sm:$0xff] }
 0x1d5   :  { %v7748_v27 = vpop.f32.mrb[13].mxu1  ;;  %v6094_v7 = vcombine.high %v1114_v1, %v1118_v2  ;;  %v6093_v25 = vcombine.low %v1114_v1, %v1118_v2  ;;  %v5775_v29 = vcombine.low %v795_v4, %v799_v5 }
 0x1d6   :  { %4053 = vmatpush1.bf16.msra.mxu1 %v6045_v13  ;;  %v3793_v35 = vpop.f32.mrb[14].mxu1  ;;  %v5776_v13 = vcombine.high %v795_v4, %v799_v5  ;;  %v652_v5 = vld [vmem:[%s8980_s3 + $0x58] sm:$0xff] }
 0x1d7   :  { %4110 = vmatpush1.bf16.msra.mxu0 %v5727_v3  ;;  %v3794_v37 = vpop.f32.mrb[15].mxu1  ;;  %4054 = vmatprep.subr.bf16.mxu1 %v6054_v16  ;;  %v1122_v3 = vld [vmem:[%s8980_s3 + $0xf08] sm:$0xff] }
 0x1d8   :  { %4111 = vmatprep.subr.bf16.mxu0 %v5736_v23  ;;  %v1126_v16 = vld [vmem:[%s8980_s3 + $0xf28] sm:$0xff]  ;;  %v803_v23 = vld [vmem:[%s8980_s3 + $0x510] sm:$0xff] }
 0x1d9   :  { %v6102_v30 = vcombine.high %v1122_v3, %v1126_v16  ;;  %v5784_v35 = vcombine.high %v803_v23, %v807_v24  ;;  %v1134_v37 = vld [vmem:[%s8980_s3 + $0xf68] sm:$0xff]  ;;  %v5783_v12 = vcombine.low %v803_v23, %v807_v24  ;;  %v660_v24 = vld [vmem:[%s8980_s3 + $0x98] sm:$0xff] }
 0x1da   :  { %4055 = vmatpush1.bf16.msra.mxu1 %v6053_v36  ;;  %v1130_v36 = vld [vmem:[%s8980_s3 + $0xf48] sm:$0xff] }
 0x1db   :  { %4112 = vmatpush1.bf16.msra.mxu0 %v5735_v38  ;;  %4056 = vmatprep.subr.bf16.mxu1 %v6062_v42  ;;  %v811_v38 = vld [vmem:[%s8980_s3 + $0x550] sm:$0xff]  ;;  %v6110_v14 = vcombine.high %v1130_v36, %v1134_v37 }
 0x1dc   :  { %4113 = vmatprep.subr.bf16.mxu0 %v5744_v0  ;;  %v815_v42 = vld [vmem:[%s8980_s3 + $0x570] sm:$0xff]  ;;  %v6101_v0 = vcombine.low %v1122_v3, %v1126_v16 }
 0x1dd   :  { %v5792_v19 = vcombine.high %v811_v38, %v815_v42  ;;  %v5791_v46 = vcombine.low %v811_v38, %v815_v42  ;;  %v668_v42 = vld [vmem:[%s8980_s3 + $0xd8] sm:$0xff] }
 0x1de   :  { %4057 = vmatpush1.bf16.msra.mxu1 %v6061_v45  ;;  %v1142_v45 = vld [vmem:[%s8980_s3 + $0xfa8] sm:$0xff] }
 0x1df   :  { %4114 = vmatpush1.bf16.msra.mxu0 %v5743_v10  ;;  %4058 = vmatprep.subr.bf16.mxu1 %v6070_v11  ;;  %v819_v10 = vld [vmem:[%s8980_s3 + $0x590] sm:$0xff]  ;;  %v6118_v47 = vcombine.high %v1138_v44, %v1142_v45 }
 0x1e0   :  { %4124 = vmatprep.subr.bf16.mxu0 %v5752_v15  ;;  %v823_v11 = vld [vmem:[%s8980_s3 + $0x5b0] sm:$0xff]  ;;  %v6109_v15 = vcombine.low %v1130_v36, %v1134_v37 }
 0x1e1   :  { %v5800_v48 = vcombine.high %v819_v10, %v823_v11  ;;  %v5799_v53 = vcombine.low %v819_v10, %v823_v11  ;;  %v676_v10 = vld [vmem:[%s8980_s3 + $0x118] sm:$0xff] }
 0x1e2   :  { %4116 = vmatmul.mubr.bf16.vlgmr.msra.gmra.mrb[8].mxu0 %v7077_v34  ;;  %4059 = vmatpush1.bf16.msra.mxu1 %v6069_v49  ;;  %v1150_v49 = vld [vmem:[%s8980_s3 + $0xfe8] sm:$0xff]  ;;  %v680_v11 = vld [vmem:[%s8980_s3 + $0x138] sm:$0xff] }
 0x1e3   :  { %4125 = vmatpush1.bf16.msra.mxu0 %v5751_v50  ;;  %4156 = vmatprep.mubr.bf16.mxu0 %v7155_v32  ;;  %v827_v50 = vld [vmem:[%s8980_s3 + $0x5d0] sm:$0xff]  ;;  %v6126_v56 = vcombine.high %v1146_v39, %v1150_v49 }
 0x1e4   :  { %4060 = vmatprep.subr.bf16.mxu1 %v6078_v51  ;;  %4126 = vmatprep.subr.bf16.mxu0 %v5760_v52  ;;  %v831_v51 = vld [vmem:[%s8980_s3 + $0x5f0] sm:$0xff]  ;;  %v6117_v52 = vcombine.low %v1138_v44, %v1142_v45 }
 0x1e5   :  { %v5808_v58 = vcombine.high %v827_v50, %v831_v51  ;;  %v5807_v1 = vcombine.low %v827_v50, %v831_v51  ;;  %v684_v50 = vld [vmem:[%s8980_s3 + $0x158] sm:$0xff] }
 0x1e6   :  { %4061 = vmatpush1.bf16.msra.mxu1 %v6077_v59  ;;  %v648_v59 = vld [vmem:[%s8980_s3 + $0x38] sm:$0xff] }
 0x1e7   :  { %4127 = vmatpush1.bf16.msra.mxu0 %v5759_v60  ;;  %4062 = vmatprep.subr.bf16.mxu1 %v6086_v61  ;;  %v835_v60 = vld [vmem:[%s8980_s3 + $0x610] sm:$0xff]  ;;  %v5626_v2 = vcombine.high %v644_v40, %v648_v59  ;;  %v688_v51 = vld [vmem:[%s8980_s3 + $0x178] sm:$0xff] }
 0x1e8   :  { %4128 = vmatprep.subr.bf16.mxu0 %v5768_v63  ;;  %v839_v61 = vld [vmem:[%s8980_s3 + $0x630] sm:$0xff]  ;;  %v6125_v63 = vcombine.low %v1146_v39, %v1150_v49  ;;  %v5658_v39 = vcombine.high %v676_v10, %v680_v11 }
 0x1e9   :  { %v5816_v4 = vcombine.high %v835_v60, %v839_v61  ;;  %v5815_v3 = vcombine.low %v835_v60, %v839_v61  ;;  %v692_v60 = vld [vmem:[%s8980_s3 + $0x198] sm:$0xff] }
 0x1ea   :  { %4063 = vmatpush1.bf16.msra.mxu1 %v6085_v41  ;;  %v656_v41 = vld [vmem:[%s8980_s3 + $0x78] sm:$0xff] }
 0x1eb   :  { %4129 = vmatpush1.bf16.msra.mxu0 %v5767_v6  ;;  %4064 = vmatprep.subr.bf16.mxu1 %v6094_v7  ;;  %v843_v6 = vld [vmem:[%s8980_s3 + $0x650] sm:$0xff]  ;;  %v5634_v16 = vcombine.high %v652_v5, %v656_v41  ;;  %v696_v61 = vld [vmem:[%s8980_s3 + $0x1b8] sm:$0xff] }
 0x1ec   :  { %4130 = vmatprep.subr.bf16.mxu0 %v5776_v13  ;;  %v847_v7 = vld [vmem:[%s8980_s3 + $0x670] sm:$0xff]  ;;  %v5625_v13 = vcombine.low %v644_v40, %v648_v59  ;;  %v5666_v40 = vcombine.high %v684_v50, %v688_v51 }
 0x1ed   :  { %v5824_v23 = vcombine.high %v843_v6, %v847_v7  ;;  %v5823_v36 = vcombine.low %v843_v6, %v847_v7  ;;  %v700_v6 = vld [vmem:[%s8980_s3 + $0x1d8] sm:$0xff] }
 0x1ee   :  { %4065 = vmatpush1.bf16.msra.mxu1 %v6093_v25  ;;  %v664_v25 = vld [vmem:[%s8980_s3 + $0xb8] sm:$0xff] }
 0x1ef   :  { %4131 = vmatpush1.bf16.msra.mxu0 %v5775_v29  ;;  %4066 = vmatprep.subr.bf16.mxu1 %v6102_v30  ;;  %v851_v29 = vld [vmem:[%s8980_s3 + $0x690] sm:$0xff]  ;;  %v5642_v37 = vcombine.high %v660_v24, %v664_v25  ;;  %v704_v7 = vld [vmem:[%s8980_s3 + $0x1f8] sm:$0xff] }
 0x1f0   :  { %4132 = vmatprep.subr.bf16.mxu0 %v5784_v35  ;;  %v855_v30 = vld [vmem:[%s8980_s3 + $0x6b0] sm:$0xff]  ;;  %v5633_v35 = vcombine.low %v652_v5, %v656_v41  ;;  %v5674_v5 = vcombine.high %v692_v60, %v696_v61 }
 0x1f1   :  { %v5832_v38 = vcombine.high %v851_v29, %v855_v30 }
 0x1f2   :  { %4067 = vmatpush1.bf16.msra.mxu1 %v6101_v0  ;;  %v672_v0 = vld [vmem:[%s8980_s3 + $0xf8] sm:$0xff] }
 0x1f3   :  { %4133 = vmatpush1.bf16.msra.mxu0 %v5783_v12  ;;  %4068 = vmatprep.subr.bf16.mxu1 %v6110_v14  ;;  %v859_v12 = vld [vmem:[%s8980_s3 + $0x6d0] sm:$0xff]  ;;  %v5641_v14 = vcombine.low %v660_v24, %v664_v25  ;;  %v5650_v44 = vcombine.high %v668_v42, %v672_v0  ;;  %v5682_v24 = vcombine.high %v700_v6, %v704_v7 }
 0x1f4   :  { %4134 = vmatprep.subr.bf16.mxu0 %v5792_v19  ;;  %v5831_v19 = vcombine.low %v851_v29, %v855_v30  ;;  %v708_v29 = vld [vmem:[%s8980_s3 + $0x218] sm:$0xff] }
 0x1f5   :  { %v712_v30 = vld [vmem:[%s8980_s3 + $0x238] sm:$0xff] }
 0x1f6   :  { %4069 = vmatpush1.bf16.msra.mxu1 %v6109_v15  ;;  %v867_v15 = vld [vmem:[%s8980_s3 + $0x710] sm:$0xff] }
 0x1f7   :  { %4135 = vmatpush1.bf16.msra.mxu0 %v5791_v46  ;;  %4070 = vmatprep.subr.bf16.mxu1 %v6118_v47  ;;  %v871_v46 = vld [vmem:[%s8980_s3 + $0x730] sm:$0xff]  ;;  %v5649_v47 = vcombine.low %v668_v42, %v672_v0  ;;  %v5690_v42 = vcombine.high %v708_v29, %v712_v30 }
 0x1f8   :  { %4136 = vmatprep.subr.bf16.mxu0 %v5800_v48  ;;  %v5848_v49 = vcombine.high %v867_v15, %v871_v46 }
 0x1fa   :  { %4071 = vmatpush1.bf16.msra.mxu1 %v6117_v52  ;;  %v875_v52 = vld [vmem:[%s8980_s3 + $0x750] sm:$0xff] }
 0x1fb   :  { %4137 = vmatpush1.bf16.msra.mxu0 %v5799_v53  ;;  %4072 = vmatprep.subr.bf16.mxu1 %v6126_v56  ;;  %v879_v53 = vld [vmem:[%s8980_s3 + $0x770] sm:$0xff]  ;;  %v5657_v56 = vcombine.low %v676_v10, %v680_v11  ;;  %v724_v11 = vld [vmem:[%s8980_s3 + $0x298] sm:$0xff] }
 0x1fc   :  { %4138 = vmatprep.subr.bf16.mxu0 %v5808_v58  ;;  %v5847_v58 = vcombine.low %v867_v15, %v871_v46  ;;  %v5856_v59 = vcombine.high %v875_v52, %v879_v53  ;;  %v915_v10 = vld [vmem:[%s8980_s3 + $0x890] sm:$0xff] }
 0x1fe   :  { %4073 = vmatpush1.bf16.msra.mxu1 %v6125_v63  ;;  %v883_v63 = vld [vmem:[%s8980_s3 + $0x790] sm:$0xff] }
 0x1ff   :  { %4139 = vmatpush1.bf16.msra.mxu0 %v5807_v1  ;;  %4247 = vmatprep.subr.bf16.mxu1 %v5626_v2  ;;  %v887_v1 = vld [vmem:[%s8980_s3 + $0x7b0] sm:$0xff]  ;;  %v5665_v2 = vcombine.low %v684_v50, %v688_v51 }
 0x200   :  { %4140 = vmatprep.subr.bf16.mxu0 %v5816_v4  ;;  %v5855_v4 = vcombine.low %v875_v52, %v879_v53  ;;  %v5864_v41 = vcombine.high %v883_v63, %v887_v1  ;;  %v923_v51 = vld [vmem:[%s8980_s3 + $0x8d0] sm:$0xff] }
 0x201   :  { %4075 = vmatmul.mubr.bf16.vlgmr.msra.gmra.mrb[16].mxu1 %v7578_v62  ;;  %v927_v52 = vld [vmem:[%s8980_s3 + $0x8f0] sm:$0xff] }
 0x202   :  { %4248 = vmatpush1.bf16.msra.mxu1 %v5625_v13  ;;  %4279 = vmatprep.mubr.bf16.mxu1 %v7075_v33  ;;  %v863_v33 = vld [vmem:[%s8980_s3 + $0x6f0] sm:$0xff] }
 0x203   :  { %4141 = vmatpush1.bf16.msra.mxu0 %v5815_v3  ;;  %4249 = vmatprep.subr.bf16.mxu1 %v5634_v16  ;;  %v5840_v45 = vcombine.high %v859_v12, %v863_v33  ;;  %v5839_v48 = vcombine.low %v859_v12, %v863_v33  ;;  %v891_v13 = vld [vmem:[%s8980_s3 + $0x7d0] sm:$0xff]  ;;  %v5673_v16 = vcombine.low %v692_v60, %v696_v61 }
 0x204   :  { %4142 = vmatprep.subr.bf16.mxu0 %v5824_v23  ;;  %v895_v3 = vld [vmem:[%s8980_s3 + $0x7f0] sm:$0xff]  ;;  %v5863_v23 = vcombine.low %v883_v63, %v887_v1  ;;  %v740_v1 = vld [vmem:[%s8980_s3 + $0x318] sm:$0xff] }
 0x205   :  { %v5872_v25 = vcombine.high %v891_v13, %v895_v3  ;;  %v907_v12 = vld [vmem:[%s8980_s3 + $0x850] sm:$0xff] }
 0x206   :  { %4250 = vmatpush1.bf16.msra.mxu1 %v5633_v35  ;;  %v899_v35 = vld [vmem:[%s8980_s3 + $0x810] sm:$0xff] }
 0x207   :  { %4143 = vmatpush1.bf16.msra.mxu0 %v5823_v36  ;;  %4251 = vmatprep.subr.bf16.mxu1 %v5642_v37  ;;  %v903_v36 = vld [vmem:[%s8980_s3 + $0x830] sm:$0xff]  ;;  %v5681_v37 = vcombine.low %v700_v6, %v704_v7 }
 0x208   :  { %4144 = vmatprep.subr.bf16.mxu0 %v5832_v38  ;;  %v5871_v38 = vcombine.low %v891_v13, %v895_v3  ;;  %v5880_v0 = vcombine.high %v899_v35, %v903_v36  ;;  %v911_v33 = vld [vmem:[%s8980_s3 + $0x870] sm:$0xff]  ;;  %v748_v3 = vld [vmem:[%s8980_s3 + $0x358] sm:$0xff] }
 0x209   :  { %v5888_v15 = vcombine.high %v907_v12, %v911_v33  ;;  %v931_v61 = vld [vmem:[%s8980_s3 + $0x910] sm:$0xff] }
 0x20a   :  { %4252 = vmatpush1.bf16.msra.mxu1 %v5641_v14  ;;  %v716_v14 = vld [vmem:[%s8980_s3 + $0x258] sm:$0xff]  ;;  %v935_v63 = vld [vmem:[%s8980_s3 + $0x930] sm:$0xff] }
 0x20b   :  { %4145 = vmatpush1.bf16.msra.mxu0 %v5831_v19  ;;  %4253 = vmatprep.subr.bf16.mxu1 %v5650_v44  ;;  %v720_v19 = vld [vmem:[%s8980_s3 + $0x278] sm:$0xff]  ;;  %v5689_v44 = vcombine.low %v708_v29, %v712_v30  ;;  %v939_v7 = vld [vmem:[%s8980_s3 + $0x950] sm:$0xff] }
 0x20c   :  { %4146 = vmatprep.subr.bf16.mxu0 %v5840_v45  ;;  %v5879_v45 = vcombine.low %v899_v35, %v903_v36  ;;  %v5698_v46 = vcombine.high %v716_v14, %v720_v19  ;;  %v943_v13 = vld [vmem:[%s8980_s3 + $0x970] sm:$0xff]  ;;  %v756_v36 = vld [vmem:[%s8980_s3 + $0x398] sm:$0xff] }
 0x20d   :  { %v947_v30 = vld [vmem:[%s8980_s3 + $0x990] sm:$0xff] }
 0x20e   :  { %4254 = vmatpush1.bf16.msra.mxu1 %v5649_v47  ;;  %v728_v47 = vld [vmem:[%s8980_s3 + $0x2b8] sm:$0xff]  ;;  %v951_v35 = vld [vmem:[%s8980_s3 + $0x9b0] sm:$0xff] }
 0x20f   :  { %4147 = vmatpush1.bf16.msra.mxu0 %v5839_v48  ;;  %4255 = vmatprep.subr.bf16.mxu1 %v5658_v39  ;;  %v919_v48 = vld [vmem:[%s8980_s3 + $0x8b0] sm:$0xff]  ;;  %v5697_v39 = vcombine.low %v716_v14, %v720_v19  ;;  %v5706_v50 = vcombine.high %v724_v11, %v728_v47  ;;  %v764_v19 = vld [vmem:[%s8980_s3 + $0x3d8] sm:$0xff] }
 0x210   :  { %4148 = vmatprep.subr.bf16.mxu0 %v5848_v49  ;;  %v5887_v49 = vcombine.low %v907_v12, %v911_v33  ;;  %v5896_v53 = vcombine.high %v915_v10, %v919_v48  ;;  %v955_v33 = vld [vmem:[%s8980_s3 + $0x9d0] sm:$0xff] }
 0x211   :  { %v959_v14 = vld [vmem:[%s8980_s3 + $0x9f0] sm:$0xff] }
 0x212   :  { %4256 = vmatpush1.bf16.msra.mxu1 %v5657_v56  ;;  %v732_v56 = vld [vmem:[%s8980_s3 + $0x2d8] sm:$0xff] }
 0x213   :  { %4149 = vmatpush1.bf16.msra.mxu0 %v5847_v58  ;;  %4257 = vmatprep.subr.bf16.mxu1 %v5666_v40  ;;  %v736_v58 = vld [vmem:[%s8980_s3 + $0x2f8] sm:$0xff]  ;;  %v5705_v40 = vcombine.low %v724_v11, %v728_v47  ;;  %v5927_v11 = vcombine.low %v947_v30, %v951_v35  ;;  %v967_v47 = vld [vmem:[%s8980_s3 + $0xa30] sm:$0xff] }
 0x214   :  { %4150 = vmatprep.subr.bf16.mxu0 %v5856_v59  ;;  %v5895_v59 = vcombine.low %v915_v10, %v919_v48  ;;  %v5714_v60 = vcombine.high %v732_v56, %v736_v58  ;;  %v772_v48 = vld [vmem:[%s8980_s3 + $0x418] sm:$0xff] }
 0x216   :  { %4258 = vmatpush1.bf16.msra.mxu1 %v5665_v2  ;;  %v5904_v2 = vcombine.high %v923_v51, %v927_v52 }
 0x217   :  { %4151 = vmatpush1.bf16.msra.mxu0 %v5855_v4  ;;  %4259 = vmatprep.subr.bf16.mxu1 %v5674_v5  ;;  %v744_v4 = vld [vmem:[%s8980_s3 + $0x338] sm:$0xff]  ;;  %v5713_v5 = vcombine.low %v732_v56, %v736_v58  ;;  %v975_v56 = vld [vmem:[%s8980_s3 + $0xa70] sm:$0xff] }
 0x218   :  { %4152 = vmatprep.subr.bf16.mxu0 %v5864_v41  ;;  %v5903_v41 = vcombine.low %v923_v51, %v927_v52  ;;  %v5722_v6 = vcombine.high %v740_v1, %v744_v4  ;;  %v5935_v51 = vcombine.low %v955_v33, %v959_v14  ;;  %v780_v58 = vld [vmem:[%s8980_s3 + $0x458] sm:$0xff] }
 0x21a   :  { %4260 = vmatpush1.bf16.msra.mxu1 %v5673_v16  ;;  %v5912_v16 = vcombine.high %v931_v61, %v935_v63 }
 0x21b   :  { %4153 = vmatpush1.bf16.msra.mxu0 %v5863_v23  ;;  %4261 = vmatprep.subr.bf16.mxu1 %v5682_v24  ;;  %v752_v23 = vld [vmem:[%s8980_s3 + $0x378] sm:$0xff]  ;;  %v5721_v24 = vcombine.low %v740_v1, %v744_v4  ;;  %v979_v1 = vld [vmem:[%s8980_s3 + $0xa90] sm:$0xff] }
 0x21c   :  { %4154 = vmatprep.subr.bf16.mxu0 %v5872_v25  ;;  %v5911_v25 = vcombine.low %v931_v61, %v935_v63  ;;  %v5730_v29 = vcombine.high %v748_v3, %v752_v23 }
 0x21e   :  { %4262 = vmatpush1.bf16.msra.mxu1 %v5681_v37  ;;  %v5920_v37 = vcombine.high %v939_v7, %v943_v13 }
 0x21f   :  { %4155 = vmatpush1.bf16.msra.mxu0 %v5871_v38  ;;  %4263 = vmatprep.subr.bf16.mxu1 %v5690_v42  ;;  %v760_v38 = vld [vmem:[%s8980_s3 + $0x3b8] sm:$0xff]  ;;  %v5729_v42 = vcombine.low %v748_v3, %v752_v23  ;;  %v987_v3 = vld [vmem:[%s8980_s3 + $0xad0] sm:$0xff] }
 0x220   :  { %4165 = vmatprep.subr.bf16.mxu0 %v5880_v0  ;;  %v5919_v0 = vcombine.low %v939_v7, %v943_v13  ;;  %v5738_v12 = vcombine.high %v756_v36, %v760_v38  ;;  %v5737_v10 = vcombine.low %v756_v36, %v760_v38  ;;  %v804_v36 = vld [vmem:[%s8980_s3 + $0x518] sm:$0xff] }
 0x221   :  { %v808_v38 = vld [vmem:[%s8980_s3 + $0x538] sm:$0xff] }
 0x222   :  { %4157 = vmatmul.mubr.bf16.vlgmr.msra.gmra.mrb[8].mxu0 %v7153_v31  ;;  %4264 = vmatpush1.bf16.msra.mxu1 %v5689_v44  ;;  %v5928_v44 = vcombine.high %v947_v30, %v951_v35  ;;  %v995_v30 = vld [vmem:[%s8980_s3 + $0xb10] sm:$0xff] }
 0x223   :  { %4166 = vmatpush1.bf16.msra.mxu0 %v5879_v45  ;;  %4197 = vmatprep.mubr.bf16.mxu0 %v7170_v43  ;;  %v768_v45 = vld [vmem:[%s8980_s3 + $0x3f8] sm:$0xff]  ;;  %v999_v35 = vld [vmem:[%s8980_s3 + $0xb30] sm:$0xff] }
 0x224   :  { %4167 = vmatprep.subr.bf16.mxu0 %v5888_v15  ;;  %4265 = vmatprep.subr.bf16.mxu1 %v5698_v46  ;;  %v5746_v15 = vcombine.high %v764_v19, %v768_v45  ;;  %v963_v46 = vld [vmem:[%s8980_s3 + $0xa10] sm:$0xff] }
 0x225   :  { %v5943_v61 = vcombine.low %v963_v46, %v967_v47 }
 0x226   :  { %4266 = vmatpush1.bf16.msra.mxu1 %v5697_v39  ;;  %v5936_v39 = vcombine.high %v955_v33, %v959_v14  ;;  %v1003_v33 = vld [vmem:[%s8980_s3 + $0xb50] sm:$0xff] }
 0x227   :  { %4168 = vmatpush1.bf16.msra.mxu0 %v5887_v49  ;;  %4267 = vmatprep.subr.bf16.mxu1 %v5706_v50  ;;  %v776_v49 = vld [vmem:[%s8980_s3 + $0x438] sm:$0xff]  ;;  %v5745_v50 = vcombine.low %v764_v19, %v768_v45  ;;  %v1007_v14 = vld [vmem:[%s8980_s3 + $0xb70] sm:$0xff] }
 0x228   :  { %4169 = vmatprep.subr.bf16.mxu0 %v5896_v53  ;;  %v5754_v52 = vcombine.high %v772_v48, %v776_v49  ;;  %v971_v53 = vld [vmem:[%s8980_s3 + $0xa50] sm:$0xff]  ;;  %v812_v19 = vld [vmem:[%s8980_s3 + $0x558] sm:$0xff] }
 0x229   :  { %v5952_v4 = vcombine.high %v971_v53, %v975_v56  ;;  %v5951_v7 = vcombine.low %v971_v53, %v975_v56  ;;  %v816_v45 = vld [vmem:[%s8980_s3 + $0x578] sm:$0xff]  ;;  %v1019_v53 = vld [vmem:[%s8980_s3 + $0xbd0] sm:$0xff] }
 0x22a   :  { %4268 = vmatpush1.bf16.msra.mxu1 %v5705_v40  ;;  %v5944_v40 = vcombine.high %v963_v46, %v967_v47  ;;  %v1011_v46 = vld [vmem:[%s8980_s3 + $0xb90] sm:$0xff]  ;;  %v828_v56 = vld [vmem:[%s8980_s3 + $0x5d8] sm:$0xff] }
 0x22b   :  { %4170 = vmatpush1.bf16.msra.mxu0 %v5895_v59  ;;  %4269 = vmatprep.subr.bf16.mxu1 %v5714_v60  ;;  %v784_v59 = vld [vmem:[%s8980_s3 + $0x478] sm:$0xff]  ;;  %v5753_v60 = vcombine.low %v772_v48, %v776_v49  ;;  %v1015_v47 = vld [vmem:[%s8980_s3 + $0xbb0] sm:$0xff] }
 0x22c   :  { %4171 = vmatprep.subr.bf16.mxu0 %v5904_v2  ;;  %v5762_v63 = vcombine.high %v780_v58, %v784_v59  ;;  %v788_v2 = vld [vmem:[%s8980_s3 + $0x498] sm:$0xff] }
 0x22d   :  { %v820_v48 = vld [vmem:[%s8980_s3 + $0x598] sm:$0xff] }
 0x22e   :  { %4270 = vmatpush1.bf16.msra.mxu1 %v5713_v5  ;;  %v792_v5 = vld [vmem:[%s8980_s3 + $0x4b8] sm:$0xff] }
 0x22f   :  { %4172 = vmatpush1.bf16.msra.mxu0 %v5903_v41  ;;  %4271 = vmatprep.subr.bf16.mxu1 %v5722_v6  ;;  %v983_v41 = vld [vmem:[%s8980_s3 + $0xab0] sm:$0xff]  ;;  %v5761_v6 = vcombine.low %v780_v58, %v784_v59  ;;  %v5770_v13 = vcombine.high %v788_v2, %v792_v5  ;;  %v824_v49 = vld [vmem:[%s8980_s3 + $0x5b8] sm:$0xff]  ;;  %v5992_v58 = vcombine.high %v1011_v46, %v1015_v47 }
 0x230   :  { %4173 = vmatprep.subr.bf16.mxu0 %v5912_v16  ;;  %v796_v16 = vld [vmem:[%s8980_s3 + $0x4d8] sm:$0xff]  ;;  %v5960_v23 = vcombine.high %v979_v1, %v983_v41  ;;  %v1023_v59 = vld [vmem:[%s8980_s3 + $0xbf0] sm:$0xff] }
 0x232   :  { %4272 = vmatpush1.bf16.msra.mxu1 %v5721_v24  ;;  %v5769_v24 = vcombine.low %v788_v2, %v792_v5  ;;  %v836_v2 = vld [vmem:[%s8980_s3 + $0x618] sm:$0xff] }
 0x233   :  { %4174 = vmatpush1.bf16.msra.mxu0 %v5911_v25  ;;  %4273 = vmatprep.subr.bf16.mxu1 %v5730_v29  ;;  %v5959_v25 = vcombine.low %v979_v1, %v983_v41  ;;  %v1027_v1 = vld [vmem:[%s8980_s3 + $0xc10] sm:$0xff]  ;;  %v840_v5 = vld [vmem:[%s8980_s3 + $0x638] sm:$0xff] }
 0x234   :  { %4175 = vmatprep.subr.bf16.mxu0 %v5920_v37  ;;  %v1031_v41 = vld [vmem:[%s8980_s3 + $0xc30] sm:$0xff] }
 0x236   :  { %4274 = vmatpush1.bf16.msra.mxu1 %v5729_v42 }
 0x237   :  { %4176 = vmatpush1.bf16.msra.mxu0 %v5919_v0  ;;  %4275 = vmatprep.subr.bf16.mxu1 %v5738_v12  ;;  %v5786_v12 = vcombine.high %v804_v36, %v808_v38 }
 0x238   :  { %4177 = vmatprep.subr.bf16.mxu0 %v5928_v44  ;;  %v5976_v44 = vcombine.high %v995_v30, %v999_v35 }
 0x23a   :  { %4276 = vmatpush1.bf16.msra.mxu1 %v5737_v10  ;;  %v5785_v10 = vcombine.low %v804_v36, %v808_v38  ;;  %v856_v36 = vld [vmem:[%s8980_s3 + $0x6b8] sm:$0xff]  ;;  %v1047_v38 = vld [vmem:[%s8980_s3 + $0xcb0] sm:$0xff] }
 0x23b   :  { %4178 = vmatpush1.bf16.msra.mxu0 %v5927_v11  ;;  %4277 = vmatprep.subr.bf16.mxu1 %v5746_v15  ;;  %v5975_v11 = vcombine.low %v995_v30, %v999_v35  ;;  %v5794_v15 = vcombine.high %v812_v19, %v816_v45  ;;  %v852_v35 = vld [vmem:[%s8980_s3 + $0x698] sm:$0xff] }
 0x23c   :  { %4179 = vmatprep.subr.bf16.mxu0 %v5936_v39  ;;  %v5984_v39 = vcombine.high %v1003_v33, %v1007_v14 }
 0x23e   :  { %4278 = vmatpush1.bf16.msra.mxu1 %v5745_v50  ;;  %v5793_v50 = vcombine.low %v812_v19, %v816_v45  ;;  %v864_v19 = vld [vmem:[%s8980_s3 + $0x6f8] sm:$0xff]  ;;  %v1055_v45 = vld [vmem:[%s8980_s3 + $0xcf0] sm:$0xff] }
 0x23f   :  { %4180 = vmatpush1.bf16.msra.mxu0 %v5935_v51  ;;  %4288 = vmatprep.subr.bf16.mxu1 %v5754_v52  ;;  %v5983_v51 = vcombine.low %v1003_v33, %v1007_v14  ;;  %v5802_v52 = vcombine.high %v820_v48, %v824_v49  ;;  %v860_v14 = vld [vmem:[%s8980_s3 + $0x6d8] sm:$0xff] }
 0x240   :  { %4181 = vmatprep.subr.bf16.mxu0 %v5944_v40  ;;  %v832_v40 = vld [vmem:[%s8980_s3 + $0x5f8] sm:$0xff] }
 0x241   :  { %4280 = vmatmul.mubr.bf16.vlgmr.msra.gmra.mrb[20].mxu1 %v7077_v34  ;;  %v991_v34 = vld [vmem:[%s8980_s3 + $0xaf0] sm:$0xff] }
 0x242   :  { %4289 = vmatpush1.bf16.msra.mxu1 %v5753_v60  ;;  %4320 = vmatprep.mubr.bf16.mxu1 %v7155_v32  ;;  %v800_v32 = vld [vmem:[%s8980_s3 + $0x4f8] sm:$0xff]  ;;  %v5968_v37 = vcombine.high %v987_v3, %v991_v34  ;;  %v5967_v0 = vcombine.low %v987_v3, %v991_v34  ;;  %v5801_v60 = vcombine.low %v820_v48, %v824_v49  ;;  %v1035_v3 = vld [vmem:[%s8980_s3 + $0xc50] sm:$0xff] }
 0x243   :  { %4182 = vmatpush1.bf16.msra.mxu0 %v5943_v61  ;;  %4290 = vmatprep.subr.bf16.mxu1 %v5762_v63  ;;  %v5778_v29 = vcombine.high %v796_v16, %v800_v32  ;;  %v5777_v42 = vcombine.low %v796_v16, %v800_v32  ;;  %v5991_v61 = vcombine.low %v1011_v46, %v1015_v47  ;;  %v1039_v34 = vld [vmem:[%s8980_s3 + $0xc70] sm:$0xff]  ;;  %v844_v16 = vld [vmem:[%s8980_s3 + $0x658] sm:$0xff] }
 0x244   :  { %4183 = vmatprep.subr.bf16.mxu0 %v5952_v4  ;;  %v5810_v63 = vcombine.high %v828_v56, %v832_v40  ;;  %v6000_v4 = vcombine.high %v1019_v53, %v1023_v59  ;;  %v848_v32 = vld [vmem:[%s8980_s3 + $0x678] sm:$0xff]  ;;  %v1063_v49 = vld [vmem:[%s8980_s3 + $0xd30] sm:$0xff] }
 0x245   :  { %v5826_v30 = vcombine.high %v844_v16, %v848_v32  ;;  %v868_v47 = vld [vmem:[%s8980_s3 + $0x718] sm:$0xff] }
 0x246   :  { %4291 = vmatpush1.bf16.msra.mxu1 %v5761_v6  ;;  %v5809_v6 = vcombine.low %v828_v56, %v832_v40  ;;  %v872_v48 = vld [vmem:[%s8980_s3 + $0x738] sm:$0xff] }
 0x247   :  { %4184 = vmatpush1.bf16.msra.mxu0 %v5951_v7  ;;  %4292 = vmatprep.subr.bf16.mxu1 %v5770_v13  ;;  %v5999_v7 = vcombine.low %v1019_v53, %v1023_v59  ;;  %v5818_v13 = vcombine.high %v836_v2, %v840_v5  ;;  %v8213_v53 = vld [vmem:[%s8983_s4] sm:$0xff]  ;;  %v880_v40 = vld [vmem:[%s8980_s3 + $0x778] sm:$0xff]  ;;  %v1067_v59 = vld [vmem:[%s8980_s3 + $0xd50] sm:$0xff] }
 0x248   :  { %4185 = vmatprep.subr.bf16.mxu0 %v5960_v23  ;;  %v6008_v23 = vcombine.high %v1027_v1, %v1031_v41 }
 0x24a   :  { %4293 = vmatpush1.bf16.msra.mxu1 %v5769_v24  ;;  %v5817_v24 = vcombine.low %v836_v2, %v840_v5 }
 0x24b   :  { %4186 = vmatpush1.bf16.msra.mxu0 %v5959_v25  ;;  %4294 = vmatprep.subr.bf16.mxu1 %v5778_v29  ;;  %v6007_v25 = vcombine.low %v1027_v1, %v1031_v41  ;;  %v6016_v29 = vcombine.high %v1035_v3, %v1039_v34  ;;  %v884_v41 = vld [vmem:[%s8980_s3 + $0x798] sm:$0xff] }
 0x24c   :  { %4187 = vmatprep.subr.bf16.mxu0 %v5968_v37  ;;  %v1043_v37 = vld [vmem:[%s8980_s3 + $0xc90] sm:$0xff] }
 0x24d   :  { %v6024_v33 = vcombine.high %v1043_v37, %v1047_v38 }
 0x24e   :  { %4295 = vmatpush1.bf16.msra.mxu1 %v5777_v42  ;;  %v5825_v42 = vcombine.low %v844_v16, %v848_v32 }
 0x24f   :  { %4188 = vmatpush1.bf16.msra.mxu0 %v5967_v0  ;;  %4296 = vmatprep.subr.bf16.mxu1 %v5786_v12  ;;  %v6015_v0 = vcombine.low %v1035_v3, %v1039_v34  ;;  %v5834_v12 = vcombine.high %v852_v35, %v856_v36 }
 0x250   :  { %4189 = vmatprep.subr.bf16.mxu0 %v5976_v44  ;;  %v1051_v44 = vld [vmem:[%s8980_s3 + $0xcd0] sm:$0xff] }
 0x251   :  { %v6032_v46 = vcombine.high %v1051_v44, %v1055_v45 }
 0x252   :  { %4297 = vmatpush1.bf16.msra.mxu1 %v5785_v10  ;;  %v5833_v10 = vcombine.low %v852_v35, %v856_v36  ;;  %v1083_v36 = vld [vmem:[%s8980_s3 + $0xdd0] sm:$0xff] }
 0x253   :  { %4190 = vmatpush1.bf16.msra.mxu0 %v5975_v11  ;;  %4298 = vmatprep.subr.bf16.mxu1 %v5794_v15  ;;  %v6023_v11 = vcombine.low %v1043_v37, %v1047_v38  ;;  %v5842_v15 = vcombine.high %v860_v14, %v864_v19 }
 0x254   :  { %4191 = vmatprep.subr.bf16.mxu0 %v5984_v39  ;;  %v1059_v39 = vld [vmem:[%s8980_s3 + $0xd10] sm:$0xff] }
 0x255   :  { %v6040_v56 = vcombine.high %v1059_v39, %v1063_v49  ;;  %v6039_v1 = vcombine.low %v1059_v39, %v1063_v49  ;;  %v912_v39 = vld [vmem:[%s8980_s3 + $0x878] sm:$0xff]  ;;  %v1099_v49 = vld [vmem:[%s8980_s3 + $0xe50] sm:$0xff] }
 0x256   :  { %4299 = vmatpush1.bf16.msra.mxu1 %v5793_v50  ;;  %v5841_v50 = vcombine.low %v860_v14, %v864_v19  ;;  %v900_v19 = vld [vmem:[%s8980_s3 + $0x818] sm:$0xff] }
 0x257   :  { %4192 = vmatpush1.bf16.msra.mxu0 %v5983_v51  ;;  %4300 = vmatprep.subr.bf16.mxu1 %v5802_v52  ;;  %v6031_v51 = vcombine.low %v1051_v44, %v1055_v45  ;;  %v5850_v52 = vcombine.high %v868_v47, %v872_v48  ;;  %v904_v44 = vld [vmem:[%s8980_s3 + $0x838] sm:$0xff]  ;;  %v1091_v45 = vld [vmem:[%s8980_s3 + $0xe10] sm:$0xff] }
 0x258   :  { %4193 = vmatprep.subr.bf16.mxu0 %v5992_v58  ;;  %v876_v58 = vld [vmem:[%s8980_s3 + $0x758] sm:$0xff] }
 0x259   :  { %v5858_v2 = vcombine.high %v876_v58, %v880_v40  ;;  %v5857_v3 = vcombine.low %v876_v58, %v880_v40  ;;  %v916_v40 = vld [vmem:[%s8980_s3 + $0x898] sm:$0xff] }
 0x25a   :  { %4301 = vmatpush1.bf16.msra.mxu1 %v5801_v60  ;;  %v1071_v60 = vld [vmem:[%s8980_s3 + $0xd70] sm:$0xff] }
 0x25b   :  { %4194 = vmatpush1.bf16.msra.mxu0 %v5991_v61  ;;  %4302 = vmatprep.subr.bf16.mxu1 %v5810_v63  ;;  %v5849_v61 = vcombine.low %v868_v47, %v872_v48  ;;  %v1158_v63 = vrot.slane %v8213_v53, %v7055_v18  ;;  %v6048_v5 = vcombine.high %v1067_v59, %v1071_v60  ;;  %v908_v48 = vld [vmem:[%s8980_s3 + $0x858] sm:$0xff] }
 0x25c   :  { %4195 = vmatprep.subr.bf16.mxu0 %v6000_v4  ;;  %v1162_v4 = vrot.slane %v8213_v53, %v7063_v20  ;;  %v6047_v16 = vcombine.low %v1067_v59, %v1071_v60  ;;  %v920_v59 = vld [vmem:[%s8980_s3 + $0x8b8] sm:$0xff]  ;;  %v1107_v60 = vld [vmem:[%s8980_s3 + $0xe90] sm:$0xff] }
 0x25d   :  { %v3790_v34 = vadd.f32 %v7740_v21, %v1158_v63  ;;  %v5889_v63 = vcombine.low %v908_v48, %v912_v39 }
 0x25e   :  { %4303 = vmatpush1.bf16.msra.mxu1 %v5809_v6  ;;  %v888_v6 = vld [vmem:[%s8980_s3 + $0x7b8] sm:$0xff]  ;;  %v3792_v32 = vadd.f32 %v7748_v27, %v1162_v4  ;;  %v1087_v27 = vld [vmem:[%s8980_s3 + $0xdf0] sm:$0xff] }
 0x25f   :  { %4196 = vmatpush1.bf16.msra.mxu0 %v5999_v7  ;;  %4304 = vmatprep.subr.bf16.mxu1 %v5818_v13  ;;  %v1075_v7 = vld [vmem:[%s8980_s3 + $0xd90] sm:$0xff]  ;;  %v6064_v14 = vcombine.high %v1083_v36, %v1087_v27 }
 0x260   :  { %4206 = vmatprep.subr.bf16.mxu0 %v6008_v23  ;;  %v1079_v13 = vld [vmem:[%s8980_s3 + $0xdb0] sm:$0xff]  ;;  %v5866_v23 = vcombine.high %v884_v41, %v888_v6 }
 0x262   :  { %4198 = vmatmul.mubr.bf16.vlgmr.msra.gmra.mrb[8].mxu0 %v7373_v8  ;;  %4305 = vmatpush1.bf16.msra.mxu1 %v5817_v24 }
 0x263   :  { %4207 = vmatpush1.bf16.msra.mxu0 %v6007_v25  ;;  %4238 = vmatprep.mubr.bf16.mxu0 %v7387_v26  ;;  %v6056_v25 = vcombine.high %v1075_v7, %v1079_v13 }
 0x264   :  { %4208 = vmatprep.subr.bf16.mxu0 %v6016_v29  ;;  %4306 = vmatprep.subr.bf16.mxu1 %v5826_v30  ;;  %v892_v29 = vld [vmem:[%s8980_s3 + $0x7d8] sm:$0xff] }
 0x265   :  { %v896_v30 = vld [vmem:[%s8980_s3 + $0x7f8] sm:$0xff] }
 0x266   :  { %4307 = vmatpush1.bf16.msra.mxu1 %v5825_v42  ;;  %v5865_v42 = vcombine.low %v884_v41, %v888_v6  ;;  %v1115_v41 = vld [vmem:[%s8980_s3 + $0xed0] sm:$0xff]  ;;  %v5897_v6 = vcombine.low %v916_v40, %v920_v59 }
 0x267   :  { %4209 = vmatpush1.bf16.msra.mxu0 %v6015_v0  ;;  %4308 = vmatprep.subr.bf16.mxu1 %v5834_v12  ;;  %v6055_v12 = vcombine.low %v1075_v7, %v1079_v13 }
 0x268   :  { %4210 = vmatprep.subr.bf16.mxu0 %v6024_v33  ;;  %v5874_v33 = vcombine.high %v892_v29, %v896_v30 }
 0x26a   :  { %4309 = vmatpush1.bf16.msra.mxu1 %v5833_v10  ;;  %v1095_v10 = vld [vmem:[%s8980_s3 + $0xe30] sm:$0xff] }
 0x26b   :  { %4211 = vmatpush1.bf16.msra.mxu0 %v6023_v11  ;;  %4310 = vmatprep.subr.bf16.mxu1 %v5842_v15  ;;  %v5873_v11 = vcombine.low %v892_v29, %v896_v30  ;;  %v6063_v15 = vcombine.low %v1083_v36, %v1087_v27  ;;  %v6072_v47 = vcombine.high %v1091_v45, %v1095_v10  ;;  %v944_v36 = vld [vmem:[%s8980_s3 + $0x978] sm:$0xff]  ;;  %v1131_v27 = vld [vmem:[%s8980_s3 + $0xf50] sm:$0xff] }
 0x26c   :  { %4212 = vmatprep.subr.bf16.mxu0 %v6032_v46  ;;  %v5882_v46 = vcombine.high %v900_v19, %v904_v44 }
 0x26e   :  { %4311 = vmatpush1.bf16.msra.mxu1 %v5841_v50  ;;  %v1103_v50 = vld [vmem:[%s8980_s3 + $0xe70] sm:$0xff] }
 0x26f   :  { %4213 = vmatpush1.bf16.msra.mxu0 %v6031_v51  ;;  %4312 = vmatprep.subr.bf16.mxu1 %v5850_v52  ;;  %v5881_v51 = vcombine.low %v900_v19, %v904_v44  ;;  %v6071_v52 = vcombine.low %v1091_v45, %v1095_v10  ;;  %v6080_v58 = vcombine.high %v1099_v49, %v1103_v50  ;;  %v952_v19 = vld [vmem:[%s8980_s3 + $0x9b8] sm:$0xff]  ;;  %v1139_v44 = vld [vmem:[%s8980_s3 + $0xf90] sm:$0xff] }
 0x270   :  { %4214 = vmatprep.subr.bf16.mxu0 %v6040_v56  ;;  %v5890_v56 = vcombine.high %v908_v48, %v912_v39  ;;  %v1143_v45 = vld [vmem:[%s8980_s3 + $0xfb0] sm:$0xff]  ;;  %v960_v48 = vld [vmem:[%s8980_s3 + $0x9f8] sm:$0xff] }
 0x271   :  { %v1147_v39 = vld [vmem:[%s8980_s3 + $0xfd0] sm:$0xff] }
 0x272   :  { %4313 = vmatpush1.bf16.msra.mxu1 %v5849_v61  ;;  %v1111_v61 = vld [vmem:[%s8980_s3 + $0xeb0] sm:$0xff] }
 0x273   :  { %4215 = vmatpush1.bf16.msra.mxu0 %v6039_v1  ;;  %4314 = vmatprep.subr.bf16.mxu1 %v5858_v2  ;;  %v6079_v1 = vcombine.low %v1099_v49, %v1103_v50  ;;  %v5898_v2 = vcombine.high %v916_v40, %v920_v59  ;;  %v6088_v4 = vcombine.high %v1107_v60, %v1111_v61  ;;  %v1151_v49 = vld [vmem:[%s8980_s3 + $0xff0] sm:$0xff]  ;;  %v968_v40 = vld [vmem:[%s8980_s3 + $0xa38] sm:$0xff] }
 0x274   :  { %v3912_v24 = vpop.f32.mrb[4].mxu0  ;;  %4216 = vmatprep.subr.bf16.mxu0 %v6048_v5  ;;  %v928_v5 = vld [vmem:[%s8980_s3 + $0x8f8] sm:$0xff]  ;;  %v6087_v7 = vcombine.low %v1107_v60, %v1111_v61  ;;  %v6127_v60 = vcombine.low %v1147_v39, %v1151_v49 }
 0x275   :  { %v8251_v35 = vadd.f32 %v3912_v24, %v3790_v34  ;;  %v3914_v21 = vpop.f32.mrb[5].mxu0  ;;  %v932_v34 = vld [vmem:[%s8980_s3 + $0x918] sm:$0xff] }
 0x276   :  { %v8259_v37 = vadd.f32 %v3914_v21, %v3792_v32  ;;  %v3916_v38 = vpop.f32.mrb[6].mxu0  ;;  %4315 = vmatpush1.bf16.msra.mxu1 %v5857_v3  ;;  %v1127_v32 = vld [vmem:[%s8980_s3 + $0xf30] sm:$0xff]  ;;  %v940_v21 = vld [vmem:[%s8980_s3 + $0x958] sm:$0xff] }
 0x277   :  { %4217 = vmatpush1.bf16.msra.mxu0 %v6047_v16  ;;  %v3917_v0 = vpop.f32.mrb[7].mxu0  ;;  %4316 = vmatprep.subr.bf16.mxu1 %v5866_v23  ;;  %v936_v16 = vld [vmem:[%s8980_s3 + $0x938] sm:$0xff]  ;;  %v1123_v23 = vld [vmem:[%s8980_s3 + $0xf10] sm:$0xff]  ;;  %v5921_v10 = vcombine.low %v940_v21, %v944_v36 }
 0x278   :  { %4218 = vmatprep.subr.bf16.mxu0 %v6056_v25  ;;  %v5914_v29 = vcombine.high %v932_v34, %v936_v16  ;;  %v6104_v30 = vcombine.high %v1123_v23, %v1127_v32  ;;  %v1135_v38 = vld [vmem:[%s8980_s3 + $0xf70] sm:$0xff]  ;;  %v6103_v0 = vcombine.low %v1123_v23, %v1127_v32  ;;  %v988_v23 = vld [vmem:[%s8980_s3 + $0xad8] sm:$0xff] }
 0x279   :  { %v992_v32 = vld [vmem:[%s8980_s3 + $0xaf8] sm:$0xff] }
 0x27a   :  { %4317 = vmatpush1.bf16.msra.mxu1 %v5865_v42  ;;  %v5913_v42 = vcombine.low %v932_v34, %v936_v16  ;;  %v6375_v16 = vld [vmem:[%s8982_s5 + $0x24] ss:$8 sps:$4 sm:$0xff]  }
 0x27b   :  { %4219 = vmatpush1.bf16.msra.mxu0 %v6055_v12  ;;  %4318 = vmatprep.subr.bf16.mxu1 %v5874_v33  ;;  %v5922_v12 = vcombine.high %v940_v21, %v944_v36  ;;  %v6112_v33 = vcombine.high %v1131_v27, %v1135_v38  ;;  %v996_v21 = vld [vmem:[%s8980_s3 + $0xb18] sm:$0xff] }
 0x27c   :  { %4220 = vmatprep.subr.bf16.mxu0 %v6064_v14  ;;  %v948_v14 = vld [vmem:[%s8980_s3 + $0x998] sm:$0xff] }
 0x27d   :  { %v5929_v50 = vcombine.low %v948_v14, %v952_v19  ;;  %v1000_v36 = vld [vmem:[%s8980_s3 + $0xb38] sm:$0xff] }
 0x27e   :  { %4319 = vmatpush1.bf16.msra.mxu1 %v5873_v11  ;;  %v6111_v11 = vcombine.low %v1131_v27, %v1135_v38  ;;  %v5969_v27 = vcombine.low %v988_v23, %v992_v32  ;;  %v6376_v38 = vld [vmem:[%s8982_s5 + $0x30] ss:$8 sps:$4 sm:$0xff]  }
 0x27f   :  { %4221 = vmatpush1.bf16.msra.mxu0 %v6063_v15  ;;  %4329 = vmatprep.subr.bf16.mxu1 %v5882_v46  ;;  %v5930_v15 = vcombine.high %v948_v14, %v952_v19  ;;  %v6120_v46 = vcombine.high %v1139_v44, %v1143_v45  ;;  %v5977_v14 = vcombine.low %v996_v21, %v1000_v36  ;;  %v6379_v19 = vld [vmem:[%s8982_s5 + $0x40] ss:$8 sps:$4 sm:$0xff]  }
 0x280   :  { %4222 = vmatprep.subr.bf16.mxu0 %v6072_v47  ;;  %v956_v47 = vld [vmem:[%s8980_s3 + $0x9d8] sm:$0xff] }
 0x281   :  { %4321 = vmatmul.mubr.bf16.vlgmr.msra.gmra.mrb[20].mxu1 %v7153_v31  ;;  %v924_v31 = vld [vmem:[%s8980_s3 + $0x8d8] sm:$0xff]  ;;  %v5937_v59 = vcombine.low %v956_v47, %v960_v48 }
 0x282   :  { %4330 = vmatpush1.bf16.msra.mxu1 %v5881_v51  ;;  %4361 = vmatprep.mubr.bf16.mxu1 %v7170_v43  ;;  %v1119_v43 = vld [vmem:[%s8980_s3 + $0xef0] sm:$0xff]  ;;  %v5906_v13 = vcombine.high %v924_v31, %v928_v5  ;;  %v5905_v24 = vcombine.low %v924_v31, %v928_v5  ;;  %v6119_v51 = vcombine.low %v1139_v44, %v1143_v45  ;;  %v6367_v5 = vld [vmem:[%s8982_s5] ss:$8 sps:$4 sm:$0xff]  }
 0x283   :  { %4223 = vmatpush1.bf16.msra.mxu0 %v6071_v52  ;;  %4331 = vmatprep.subr.bf16.mxu1 %v5890_v56  ;;  %v6096_v3 = vcombine.high %v1115_v41, %v1119_v43  ;;  %v6095_v25 = vcombine.low %v1115_v41, %v1119_v43  ;;  %v5938_v52 = vcombine.high %v956_v47, %v960_v48  ;;  %v980_v43 = vld [vmem:[%s8980_s3 + $0xa98] sm:$0xff]  ;;  %v6387_v48 = vld [vmem:[%s8982_s5 + $0x64] ss:$8 sps:$4 sm:$0xff]  }
 0x284   :  { %4224 = vmatprep.subr.bf16.mxu0 %v6080_v58  ;;  %v6128_v56 = vcombine.high %v1147_v39, %v1151_v49  ;;  %v964_v58 = vld [vmem:[%s8980_s3 + $0xa18] sm:$0xff] }
 0x285   :  { %v5946_v61 = vcombine.high %v964_v58, %v968_v40  ;;  %v5945_v31 = vcombine.low %v964_v58, %v968_v40  ;;  %v6384_v45 = vld [vmem:[%s8982_s5 + $0x54] ss:$8 sps:$4 sm:$0xff]  }
 0x286   :  { %4332 = vmatpush1.bf16.msra.mxu1 %v5889_v63  ;;  %v6369_v63 = vld [vmem:[%s8982_s5 + $0x4] ss:$8 sps:$4 sm:$0xff]   ;;  %v1020_v39 = vld [vmem:[%s8980_s3 + $0xbd8] sm:$0xff] }
 0x287   :  { %4225 = vmatpush1.bf16.msra.mxu0 %v6079_v1  ;;  %4333 = vmatprep.subr.bf16.mxu1 %v5898_v2  ;;  %v4412_v1 = vmax.f32 %v8259_v37, 0.0  ;;  %v972_v2 = vld [vmem:[%s8980_s3 + $0xa58] sm:$0xff] }
 0x288   :  { %4226 = vmatprep.subr.bf16.mxu0 %v6088_v4  ;;  %v976_v4 = vld [vmem:[%s8980_s3 + $0xa78] sm:$0xff] }
 0x289   :  { %v5954_v41 = vcombine.high %v972_v2, %v976_v4  ;;  %v6372_v37 = vld [vmem:[%s8982_s5 + $0x14] ss:$8 sps:$4 sm:$0xff]  }
 0x28a   :  { %4334 = vmatpush1.bf16.msra.mxu1 %v5897_v6  ;;  %v984_v6 = vld [vmem:[%s8980_s3 + $0xab8] sm:$0xff] }
 0x28b   :  { %4227 = vmatpush1.bf16.msra.mxu0 %v6087_v7  ;;  %4335 = vmatprep.subr.bf16.mxu1 %v5906_v13  ;;  %v4420_v7 = vpack.c.bf16 %v4412_v1, %v4412_v1  ;;  %v5953_v13 = vcombine.low %v972_v2, %v976_v4  ;;  %v5962_v34 = vcombine.high %v980_v43, %v984_v6  ;;  %v1024_v49 = vld [vmem:[%s8980_s3 + $0xbf8] sm:$0xff] }
 0x28c   :  { %4228 = vmatprep.subr.bf16.mxu0 %v6096_v3  ;;  %v6370_v3 = vld [vmem:[%s8982_s5 + $0x10] ss:$8 sps:$4 sm:$0xff]  }
 0x28d   :  { %v1028_v58 = vld [vmem:[%s8980_s3 + $0xc18] sm:$0xff] }
 0x28e   :  { %4336 = vmatpush1.bf16.msra.mxu1 %v5905_v24  ;;  %v5961_v24 = vcombine.low %v980_v43, %v984_v6  ;;  %v1032_v40 = vld [vmem:[%s8980_s3 + $0xc38] sm:$0xff] }
 0x28f   :  { %4229 = vmatpush1.bf16.msra.mxu0 %v6095_v25  ;;  %4337 = vmatprep.subr.bf16.mxu1 %v5914_v29  ;;  %v6373_v25 = vld [vmem:[%s8982_s5 + $0x20] ss:$8 sps:$4 sm:$0xff]   ;;  %v5970_v29 = vcombine.high %v988_v23, %v992_v32  ;;  %v1036_v1 = vld [vmem:[%s8980_s3 + $0xc58] sm:$0xff]  ;;  %v6009_v4 = vcombine.low %v1028_v58, %v1032_v40 }
 0x290   :  { %4230 = vmatprep.subr.bf16.mxu0 %v6104_v30  ;;  %v6378_v30 = vld [vmem:[%s8982_s5 + $0x34] ss:$8 sps:$4 sm:$0xff]  }
 0x291   :  { %v1040_v2 = vld [vmem:[%s8980_s3 + $0xc78] sm:$0xff] }
 0x292   :  { %4338 = vmatpush1.bf16.msra.mxu1 %v5913_v42  ;;  %v5978_v42 = vcombine.high %v996_v21, %v1000_v36  ;;  %v1048_v43 = vld [vmem:[%s8980_s3 + $0xcb8] sm:$0xff]  ;;  %v6017_v6 = vcombine.low %v1036_v1, %v1040_v2  ;;  %v6405_v36 = vld [vmem:[%s8982_s5 + $0xc4] ss:$8 sps:$4 sm:$0xff]  }
 0x293   :  { %4231 = vmatpush1.bf16.msra.mxu0 %v6103_v0  ;;  %4339 = vmatprep.subr.bf16.mxu1 %v5922_v12  ;;  %v6381_v0 = vld [vmem:[%s8982_s5 + $0x44] ss:$8 sps:$4 sm:$0xff]   ;;  %v1004_v12 = vld [vmem:[%s8980_s3 + $0xb58] sm:$0xff] }
 0x294   :  { %4232 = vmatprep.subr.bf16.mxu0 %v6112_v33  ;;  %v1008_v33 = vld [vmem:[%s8980_s3 + $0xb78] sm:$0xff] }
 0x295   :  { %v5986_v44 = vcombine.high %v1004_v12, %v1008_v33  ;;  %v6402_v32 = vld [vmem:[%s8982_s5 + $0xb4] ss:$8 sps:$4 sm:$0xff]  }
 0x296   :  { %4340 = vmatpush1.bf16.msra.mxu1 %v5921_v10  ;;  %v1012_v10 = vld [vmem:[%s8980_s3 + $0xb98] sm:$0xff] }
 0x297   :  { %4233 = vmatpush1.bf16.msra.mxu0 %v6111_v11  ;;  %4341 = vmatprep.subr.bf16.mxu1 %v5930_v15  ;;  %v1016_v11 = vld [vmem:[%s8980_s3 + $0xbb8] sm:$0xff]  ;;  %v5985_v15 = vcombine.low %v1004_v12, %v1008_v33 }
 0x298   :  { %4234 = vmatprep.subr.bf16.mxu0 %v6120_v46  ;;  %v6382_v46 = vld [vmem:[%s8982_s5 + $0x50] ss:$8 sps:$4 sm:$0xff]   ;;  %v5994_v47 = vcombine.high %v1012_v10, %v1016_v11  ;;  %v6408_v33 = vld [vmem:[%s8982_s5 + $0xd4] ss:$8 sps:$4 sm:$0xff]  }
 0x29a   :  { %4342 = vmatpush1.bf16.msra.mxu1 %v5929_v50  ;;  %v5993_v50 = vcombine.low %v1012_v10, %v1016_v11 }
 0x29b   :  { %4235 = vmatpush1.bf16.msra.mxu0 %v6119_v51  ;;  %4343 = vmatprep.subr.bf16.mxu1 %v5938_v52  ;;  %v6385_v51 = vld [vmem:[%s8982_s5 + $0x60] ss:$8 sps:$4 sm:$0xff]   ;;  %v6002_v52 = vcombine.high %v1020_v39, %v1024_v49 }
 0x29c   :  { %4236 = vmatprep.subr.bf16.mxu0 %v6128_v56  ;;  %v6390_v56 = vld [vmem:[%s8982_s5 + $0x74] ss:$8 sps:$4 sm:$0xff]  }
 0x29e   :  { %4344 = vmatpush1.bf16.msra.mxu1 %v5937_v59  ;;  %v6001_v59 = vcombine.low %v1020_v39, %v1024_v49 }
 0x29f   :  { %4237 = vmatpush1.bf16.msra.mxu0 %v6127_v60  ;;  %4345 = vmatprep.subr.bf16.mxu1 %v5946_v61  ;;  %v6388_v60 = vld [vmem:[%s8982_s5 + $0x70] ss:$8 sps:$4 sm:$0xff]   ;;  %v6010_v61 = vcombine.high %v1028_v58, %v1032_v40  ;;  %v6414_v58 = vld [vmem:[%s8982_s5 + $0xf4] ss:$8 sps:$4 sm:$0xff]  }
 0x2a0   :  { %5207 = vmatprep.subr.bf16.mxu0 %v6369_v63  ;;  %v6393_v63 = vld [vmem:[%s8982_s5 + $0x84] ss:$8 sps:$4 sm:$0xff]   ;;  %v1096_v40 = vld [vmem:[%s8980_s3 + $0xe38] sm:$0xff] }
 0x2a2   :  { %4239 = vmatmul.mubr.bf16.vlgmr.msra.gmra.mrb[8].mxu0 %v7578_v62  ;;  %4346 = vmatpush1.bf16.msra.mxu1 %v5945_v31  ;;  %v6391_v31 = vld [vmem:[%s8982_s5 + $0x80] ss:$8 sps:$4 sm:$0xff]  }
 0x2a3   :  { %5208 = vmatpush1.bf16.msra.mxu0 %v6367_v5  ;;  %5239 = vmatprep.mubr.bf16.mxu0 %v4420_v7  ;;  %v6018_v5 = vcombine.high %v1036_v1, %v1040_v2  ;;  %v6394_v7 = vld [vmem:[%s8982_s5 + $0x90] ss:$8 sps:$4 sm:$0xff]   ;;  %v4411_v1 = vmax.f32 %v8251_v35, 0.0  ;;  %v6417_v2 = vld [vmem:[%s8982_s5 + $0x104] ss:$8 sps:$4 sm:$0xff]  }
 0x2a4   :  { %4347 = vmatprep.subr.bf16.mxu1 %v5954_v41  ;;  %5209 = vmatprep.subr.bf16.mxu0 %v6372_v37  ;;  %v6396_v41 = vld [vmem:[%s8982_s5 + $0x94] ss:$8 sps:$4 sm:$0xff]   ;;  %v6415_v35 = vld [vmem:[%s8982_s5 + $0x100] ss:$8 sps:$4 sm:$0xff]  }
 0x2a5   :  { %v1044_v37 = vld [vmem:[%s8980_s3 + $0xc98] sm:$0xff] }
 0x2a6   :  { %4348 = vmatpush1.bf16.msra.mxu1 %v5953_v13  ;;  %v6026_v13 = vcombine.high %v1044_v37, %v1048_v43 }
 0x2a7   :  { %5210 = vmatpush1.bf16.msra.mxu0 %v6370_v3  ;;  %4349 = vmatprep.subr.bf16.mxu1 %v5962_v34  ;;  %v6399_v3 = vld [vmem:[%s8982_s5 + $0xa4] ss:$8 sps:$4 sm:$0xff]   ;;  %v6025_v34 = vcombine.low %v1044_v37, %v1048_v43  ;;  %v4419_v37 = vpack.c.bf16 %v4411_v1, %v4411_v1 }
 0x2a8   :  { %5211 = vmatprep.subr.bf16.mxu0 %v6375_v16  ;;  %v6397_v16 = vld [vmem:[%s8982_s5 + $0xa0] ss:$8 sps:$4 sm:$0xff]   ;;  %v6447_v1 = vld [vmem:[%s8982_s5 + $0x1a4] ss:$8 sps:$4 sm:$0xff]  }
 0x2aa   :  { %4350 = vmatpush1.bf16.msra.mxu1 %v5961_v24  ;;  %v1060_v24 = vld [vmem:[%s8980_s3 + $0xd18] sm:$0xff] }
 0x2ab   :  { %5212 = vmatpush1.bf16.msra.mxu0 %v6373_v25  ;;  %4351 = vmatprep.subr.bf16.mxu1 %v5970_v29  ;;  %v1064_v25 = vld [vmem:[%s8980_s3 + $0xd38] sm:$0xff] }
 0x2ac   :  { %5213 = vmatprep.subr.bf16.mxu0 %v6378_v30  ;;  %v6400_v30 = vld [vmem:[%s8982_s5 + $0xb0] ss:$8 sps:$4 sm:$0xff]   ;;  %v6042_v21 = vcombine.high %v1060_v24, %v1064_v25 }
 0x2ae   :  { %4352 = vmatpush1.bf16.msra.mxu1 %v5969_v27  ;;  %v1068_v27 = vld [vmem:[%s8980_s3 + $0xd58] sm:$0xff] }
 0x2af   :  { %5214 = vmatpush1.bf16.msra.mxu0 %v6376_v38  ;;  %4353 = vmatprep.subr.bf16.mxu1 %v5978_v42  ;;  %v1072_v38 = vld [vmem:[%s8980_s3 + $0xd78] sm:$0xff]  ;;  %v6041_v42 = vcombine.low %v1060_v24, %v1064_v25  ;;  %v6421_v25 = vld [vmem:[%s8982_s5 + $0x120] ss:$8 sps:$4 sm:$0xff]  }
 0x2b0   :  { %5215 = vmatprep.subr.bf16.mxu0 %v6381_v0  ;;  %v6403_v0 = vld [vmem:[%s8982_s5 + $0xc0] ss:$8 sps:$4 sm:$0xff]   ;;  %v6050_v12 = vcombine.high %v1068_v27, %v1072_v38 }
 0x2b2   :  { %4354 = vmatpush1.bf16.msra.mxu1 %v5977_v14  ;;  %v1076_v14 = vld [vmem:[%s8980_s3 + $0xd98] sm:$0xff] }
 0x2b3   :  { %5216 = vmatpush1.bf16.msra.mxu0 %v6379_v19  ;;  %4355 = vmatprep.subr.bf16.mxu1 %v5986_v44  ;;  %v1080_v19 = vld [vmem:[%s8980_s3 + $0xdb8] sm:$0xff]  ;;  %v6049_v44 = vcombine.low %v1068_v27, %v1072_v38 }
 0x2b4   :  { %5217 = vmatprep.subr.bf16.mxu0 %v6384_v45  ;;  %v6406_v45 = vld [vmem:[%s8982_s5 + $0xd0] ss:$8 sps:$4 sm:$0xff]   ;;  %v6058_v10 = vcombine.high %v1076_v14, %v1080_v19 }
 0x2b5   :  { %v6424_v38 = vld [vmem:[%s8982_s5 + $0x130] ss:$8 sps:$4 sm:$0xff]  }
 0x2b6   :  { %4356 = vmatpush1.bf16.msra.mxu1 %v5985_v15  ;;  %v6411_v15 = vld [vmem:[%s8982_s5 + $0xe4] ss:$8 sps:$4 sm:$0xff]  }
 0x2b7   :  { %5218 = vmatpush1.bf16.msra.mxu0 %v6382_v46  ;;  %4357 = vmatprep.subr.bf16.mxu1 %v5994_v47  ;;  %v1084_v46 = vld [vmem:[%s8980_s3 + $0xdd8] sm:$0xff] }
 0x2b8   :  { %5219 = vmatprep.subr.bf16.mxu0 %v6387_v48  ;;  %v1088_v47 = vld [vmem:[%s8980_s3 + $0xdf8] sm:$0xff]  ;;  %v1170_v48 = vrot.slane %v8213_v53, %v115_v57 }
 0x2b9   :  { %v1092_v57 = vld [vmem:[%s8980_s3 + $0xe18] sm:$0xff] }
 0x2ba   :  { %4358 = vmatpush1.bf16.msra.mxu1 %v5993_v50  ;;  %v6057_v50 = vcombine.low %v1076_v14, %v1080_v19  ;;  %v6427_v19 = vld [vmem:[%s8982_s5 + $0x140] ss:$8 sps:$4 sm:$0xff]  }
 0x2bb   :  { %5220 = vmatpush1.bf16.msra.mxu0 %v6385_v51  ;;  %4359 = vmatprep.subr.bf16.mxu1 %v6002_v52  ;;  %v6409_v52 = vld [vmem:[%s8982_s5 + $0xe0] ss:$8 sps:$4 sm:$0xff]  }
 0x2bc   :  { %5221 = vmatprep.subr.bf16.mxu0 %v6390_v56  ;;  %v6066_v56 = vcombine.high %v1084_v46, %v1088_v47 }
 0x2be   :  { %4360 = vmatpush1.bf16.msra.mxu1 %v6001_v59 }
 0x2bf   :  { %5222 = vmatpush1.bf16.msra.mxu0 %v6388_v60  ;;  %4370 = vmatprep.subr.bf16.mxu1 %v6010_v61  ;;  %v6065_v60 = vcombine.low %v1084_v46, %v1088_v47  ;;  %v6412_v61 = vld [vmem:[%s8982_s5 + $0xf0] ss:$8 sps:$4 sm:$0xff]  }
 0x2c0   :  { %5223 = vmatprep.subr.bf16.mxu0 %v6393_v63  ;;  %v6074_v63 = vcombine.high %v1092_v57, %v1096_v40  ;;  %v6430_v47 = vld [vmem:[%s8982_s5 + $0x150] ss:$8 sps:$4 sm:$0xff]  }
 0x2c1   :  { %4362 = vmatmul.mubr.bf16.vlgmr.msra.gmra.mrb[20].mxu1 %v7373_v8  ;;  %v1052_v8 = vld [vmem:[%s8980_s3 + $0xcd8] sm:$0xff] }
 0x2c2   :  { %4371 = vmatpush1.bf16.msra.mxu1 %v6009_v4  ;;  %4402 = vmatprep.mubr.bf16.mxu1 %v7387_v26  ;;  %v1056_v26 = vld [vmem:[%s8980_s3 + $0xcf8] sm:$0xff] }
 0x2c3   :  { %5224 = vmatpush1.bf16.msra.mxu0 %v6391_v31  ;;  %4372 = vmatprep.subr.bf16.mxu1 %v6018_v5  ;;  %v6034_v23 = vcombine.high %v1052_v8, %v1056_v26  ;;  %v6033_v29 = vcombine.low %v1052_v8, %v1056_v26  ;;  %v1100_v31 = vld [vmem:[%s8980_s3 + $0xe58] sm:$0xff] }
 0x2c4   :  { %5225 = vmatprep.subr.bf16.mxu0 %v6396_v41  ;;  %v1104_v5 = vld [vmem:[%s8980_s3 + $0xe78] sm:$0xff]  ;;  %v6073_v41 = vcombine.low %v1092_v57, %v1096_v40 }
 0x2c5   :  { %v6082_v43 = vcombine.high %v1100_v31, %v1104_v5  ;;  %v6081_v8 = vcombine.low %v1100_v31, %v1104_v5  ;;  %v6418_v26 = vld [vmem:[%s8982_s5 + $0x110] ss:$8 sps:$4 sm:$0xff]   ;;  %v6453_v31 = vld [vmem:[%s8982_s5 + $0x1c4] ss:$8 sps:$4 sm:$0xff]   ;;  %v6451_v5 = vld [vmem:[%s8982_s5 + $0x1c0] ss:$8 sps:$4 sm:$0xff]  }
 0x2c6   :  { %4373 = vmatpush1.bf16.msra.mxu1 %v6017_v6  ;;  %v6420_v6 = vld [vmem:[%s8982_s5 + $0x114] ss:$8 sps:$4 sm:$0xff]   ;;  %v6436_v40 = vld [vmem:[%s8982_s5 + $0x170] ss:$8 sps:$4 sm:$0xff]  }
 0x2c7   :  { %5226 = vmatpush1.bf16.msra.mxu0 %v6394_v7  ;;  %4374 = vmatprep.subr.bf16.mxu1 %v6026_v13  ;;  %v1108_v7 = vld [vmem:[%s8980_s3 + $0xe98] sm:$0xff] }
 0x2c8   :  { %5227 = vmatprep.subr.bf16.mxu0 %v6399_v3  ;;  %v1112_v13 = vld [vmem:[%s8980_s3 + $0xeb8] sm:$0xff] }
 0x2c9   :  { %v6089_v24 = vcombine.low %v1108_v7, %v1112_v13 }
 0x2ca   :  { %4375 = vmatpush1.bf16.msra.mxu1 %v6025_v34  ;;  %v6090_v34 = vcombine.high %v1108_v7, %v1112_v13  ;;  %v6462_v13 = vld [vmem:[%s8982_s5 + $0x1f4] ss:$8 sps:$4 sm:$0xff]  }
 0x2cb   :  { %5228 = vmatpush1.bf16.msra.mxu0 %v6397_v16  ;;  %4376 = vmatprep.subr.bf16.mxu1 %v6034_v23  ;;  %v6423_v16 = vld [vmem:[%s8982_s5 + $0x124] ss:$8 sps:$4 sm:$0xff]   ;;  %v1116_v23 = vld [vmem:[%s8980_s3 + $0xed8] sm:$0xff] }
 0x2cc   :  { %5229 = vmatprep.subr.bf16.mxu0 %v6402_v32  ;;  %v1120_v32 = vld [vmem:[%s8980_s3 + $0xef8] sm:$0xff] }
 0x2cd   :  { %v6097_v27 = vcombine.low %v1116_v23, %v1120_v32 }
 0x2ce   :  { %4377 = vmatpush1.bf16.msra.mxu1 %v6033_v29  ;;  %v6098_v29 = vcombine.high %v1116_v23, %v1120_v32  ;;  %v6469_v23 = vld [vmem:[%s8982_s5 + $0x220] ss:$8 sps:$4 sm:$0xff]   ;;  %v6474_v32 = vld [vmem:[%s8982_s5 + $0x234] ss:$8 sps:$4 sm:$0xff]  }
 0x2cf   :  { %5230 = vmatpush1.bf16.msra.mxu0 %v6400_v30  ;;  %4378 = vmatprep.subr.bf16.mxu1 %v6042_v21  ;;  %v6426_v30 = vld [vmem:[%s8982_s5 + $0x134] ss:$8 sps:$4 sm:$0xff]  }
 0x2d0   :  { %5231 = vmatprep.subr.bf16.mxu0 %v6405_v36  ;;  %v1124_v21 = vld [vmem:[%s8980_s3 + $0xf18] sm:$0xff] }
 0x2d1   :  { %v1128_v36 = vld [vmem:[%s8980_s3 + $0xf38] sm:$0xff] }
 0x2d2   :  { %4379 = vmatpush1.bf16.msra.mxu1 %v6041_v42  ;;  %v6106_v42 = vcombine.high %v1124_v21, %v1128_v36  ;;  %v6105_v14 = vcombine.low %v1124_v21, %v1128_v36  ;;  %v6478_v21 = vld [vmem:[%s8982_s5 + $0x250] ss:$8 sps:$4 sm:$0xff]   ;;  %v6483_v36 = vld [vmem:[%s8982_s5 + $0x264] ss:$8 sps:$4 sm:$0xff]  }
 0x2d3   :  { %5232 = vmatpush1.bf16.msra.mxu0 %v6403_v0  ;;  %4380 = vmatprep.subr.bf16.mxu1 %v6050_v12  ;;  %v6429_v0 = vld [vmem:[%s8982_s5 + $0x144] ss:$8 sps:$4 sm:$0xff]   ;;  %v1132_v12 = vld [vmem:[%s8980_s3 + $0xf58] sm:$0xff] }
 0x2d4   :  { %v8537_v11 = vpop.f32.mrb[16].mxu1  ;;  %5233 = vmatprep.subr.bf16.mxu0 %v6408_v33  ;;  %v1136_v33 = vld [vmem:[%s8980_s3 + $0xf78] sm:$0xff] }
 0x2d5   :  { %v4078_v39 = vpop.f32.mrb[17].mxu1  ;;  %v6113_v46 = vcombine.low %v1132_v12, %v1136_v33 }
 0x2d6   :  { %v4080_v49 = vpop.f32.mrb[18].mxu1  ;;  %4381 = vmatpush1.bf16.msra.mxu1 %v6049_v44  ;;  %v6303_v59 = vadd.f32 %v4078_v39, %v1170_v48  ;;  %v6114_v44 = vcombine.high %v1132_v12, %v1136_v33  ;;  %v6435_v39 = vld [vmem:[%s8982_s5 + $0x164] ss:$8 sps:$4 sm:$0xff]   ;;  %v6487_v12 = vld [vmem:[%s8982_s5 + $0x280] ss:$8 sps:$4 sm:$0xff]  }
 0x2d7   :  { %5234 = vmatpush1.bf16.msra.mxu0 %v6406_v45  ;;  %v4081_v51 = vpop.f32.mrb[19].mxu1  ;;  %4382 = vmatprep.subr.bf16.mxu1 %v6058_v10  ;;  %v6432_v45 = vld [vmem:[%s8982_s5 + $0x154] ss:$8 sps:$4 sm:$0xff]  }
 0x2d8   :  { %5235 = vmatprep.subr.bf16.mxu0 %v6411_v15  ;;  %v4414_v4 = vmax.f32 %v6303_v59, 0.0  ;;  %v1140_v10 = vld [vmem:[%s8980_s3 + $0xf98] sm:$0xff]  ;;  %v6441_v59 = vld [vmem:[%s8982_s5 + $0x184] ss:$8 sps:$4 sm:$0xff]  }
 0x2d9   :  { %v1144_v15 = vld [vmem:[%s8980_s3 + $0xfb8] sm:$0xff] }
 0x2da   :  { %4383 = vmatpush1.bf16.msra.mxu1 %v6057_v50  ;;  %v4422_v3 = vpack.c.bf16 %v4414_v4, %v4414_v4  ;;  %v6122_v48 = vcombine.high %v1140_v10, %v1144_v15  ;;  %v1148_v49 = vld [vmem:[%s8980_s3 + $0xfd8] sm:$0xff]  ;;  %v6121_v51 = vcombine.low %v1140_v10, %v1144_v15  ;;  %v6501_v15 = vld [vmem:[%s8982_s5 + $0x2c4] ss:$8 sps:$4 sm:$0xff]  }
 0x2db   :  { %5236 = vmatpush1.bf16.msra.mxu0 %v6409_v52  ;;  %4384 = vmatprep.subr.bf16.mxu1 %v6066_v56  ;;  %v1152_v50 = vld [vmem:[%s8980_s3 + $0xff8] sm:$0xff]  ;;  %v6433_v52 = vld [vmem:[%s8982_s5 + $0x160] ss:$8 sps:$4 sm:$0xff]  }
 0x2dc   :  { %5237 = vmatprep.subr.bf16.mxu0 %v6414_v58  ;;  %v6130_v56 = vcombine.high %v1148_v49, %v1152_v50  ;;  %v6438_v58 = vld [vmem:[%s8982_s5 + $0x174] ss:$8 sps:$4 sm:$0xff]   ;;  %v6129_v57 = vcombine.low %v1148_v49, %v1152_v50  ;;  %v6448_v4 = vld [vmem:[%s8982_s5 + $0x1b0] ss:$8 sps:$4 sm:$0xff]   ;;  %v6505_v49 = vld [vmem:[%s8982_s5 + $0x2e0] ss:$8 sps:$4 sm:$0xff]  }
 0x2dd   :  { %v6492_v33 = vld [vmem:[%s8982_s5 + $0x294] ss:$8 sps:$4 sm:$0xff]   ;;  %v6496_v10 = vld [vmem:[%s8982_s5 + $0x2b0] ss:$8 sps:$4 sm:$0xff]  }
 0x2de   :  { %4385 = vmatpush1.bf16.msra.mxu1 %v6065_v60  ;;  %v6439_v60 = vld [vmem:[%s8982_s5 + $0x180] ss:$8 sps:$4 sm:$0xff]   ;;  %v6510_v50 = vld [vmem:[%s8982_s5 + $0x2f4] ss:$8 sps:$4 sm:$0xff]  }
 0x2df   :  { %5238 = vmatpush1.bf16.msra.mxu0 %v6412_v61  ;;  %4386 = vmatprep.subr.bf16.mxu1 %v6074_v63  ;;  %v6444_v61 = vld [vmem:[%s8982_s5 + $0x194] ss:$8 sps:$4 sm:$0xff]   ;;  %v6442_v63 = vld [vmem:[%s8982_s5 + $0x190] ss:$8 sps:$4 sm:$0xff]  }
 0x2e0   :  { %5248 = vmatprep.subr.bf16.mxu0 %v6417_v2  ;;  %v6445_v2 = vld [vmem:[%s8982_s5 + $0x1a0] ss:$8 sps:$4 sm:$0xff]  }
 0x2e2   :  { %5240 = vmatmul.mubr.bf16.vlgmr.msra.gmra.mrb[12].mxu0 %v4419_v37  ;;  %4387 = vmatpush1.bf16.msra.mxu1 %v6073_v41  ;;  %v6456_v41 = vld [vmem:[%s8982_s5 + $0x1d4] ss:$8 sps:$4 sm:$0xff]   ;;  %v1166_v37 = vrot.slane %v8213_v53, %v111_v55  ;;  %v6460_v55 = vld [vmem:[%s8982_s5 + $0x1f0] ss:$8 sps:$4 sm:$0xff]  }
 0x2e3   :  { %5249 = vmatpush1.bf16.msra.mxu0 %v6415_v35  ;;  %5280 = vmatprep.mubr.bf16.mxu0 %v4422_v3  ;;  %v6454_v35 = vld [vmem:[%s8982_s5 + $0x1d0] ss:$8 sps:$4 sm:$0xff]   ;;  %v6465_v3 = vld [vmem:[%s8982_s5 + $0x204] ss:$8 sps:$4 sm:$0xff]  }
 0x2e4   :  { %4388 = vmatprep.subr.bf16.mxu1 %v6082_v43  ;;  %5250 = vmatprep.subr.bf16.mxu0 %v6420_v6  ;;  %v6459_v43 = vld [vmem:[%s8982_s5 + $0x1e4] ss:$8 sps:$4 sm:$0xff]   ;;  %v6457_v6 = vld [vmem:[%s8982_s5 + $0x1e0] ss:$8 sps:$4 sm:$0xff]   ;;  %v6302_v7 = vadd.f32 %v8537_v11, %v1166_v37 }
 0x2e5   :  { %v6463_v11 = vld [vmem:[%s8982_s5 + $0x200] ss:$8 sps:$4 sm:$0xff]  }
 0x2e6   :  { %4389 = vmatpush1.bf16.msra.mxu1 %v6081_v8  ;;  %v4413_v53 = vmax.f32 %v6302_v7, 0.0 }
 0x2e7   :  { %5251 = vmatpush1.bf16.msra.mxu0 %v6418_v26  ;;  %4390 = vmatprep.subr.bf16.mxu1 %v6090_v34  ;;  %v6468_v26 = vld [vmem:[%s8982_s5 + $0x214] ss:$8 sps:$4 sm:$0xff]   ;;  %v6466_v34 = vld [vmem:[%s8982_s5 + $0x210] ss:$8 sps:$4 sm:$0xff]  }
 0x2e8   :  { %5252 = vmatprep.subr.bf16.mxu0 %v6423_v16  ;;  %v4421_v8 = vpack.c.bf16 %v4413_v53, %v4413_v53  ;;  %v6471_v16 = vld [vmem:[%s8982_s5 + $0x224] ss:$8 sps:$4 sm:$0xff]  }
 0x2ea   :  { %4391 = vmatpush1.bf16.msra.mxu1 %v6089_v24  ;;  %v6472_v24 = vld [vmem:[%s8982_s5 + $0x230] ss:$8 sps:$4 sm:$0xff]  }
 0x2eb   :  { %5253 = vmatpush1.bf16.msra.mxu0 %v6421_v25  ;;  %4392 = vmatprep.subr.bf16.mxu1 %v6098_v29  ;;  %v6477_v25 = vld [vmem:[%s8982_s5 + $0x244] ss:$8 sps:$4 sm:$0xff]   ;;  %v6475_v29 = vld [vmem:[%s8982_s5 + $0x240] ss:$8 sps:$4 sm:$0xff]  }
 0x2ec   :  { %5254 = vmatprep.subr.bf16.mxu0 %v6426_v30  ;;  %v6480_v30 = vld [vmem:[%s8982_s5 + $0x254] ss:$8 sps:$4 sm:$0xff]  }
 0x2ee   :  { %4393 = vmatpush1.bf16.msra.mxu1 %v6097_v27  ;;  %v6481_v27 = vld [vmem:[%s8982_s5 + $0x260] ss:$8 sps:$4 sm:$0xff]  }
 0x2ef   :  { %5255 = vmatpush1.bf16.msra.mxu0 %v6424_v38  ;;  %4394 = vmatprep.subr.bf16.mxu1 %v6106_v42  ;;  %v6486_v38 = vld [vmem:[%s8982_s5 + $0x274] ss:$8 sps:$4 sm:$0xff]   ;;  %v6484_v42 = vld [vmem:[%s8982_s5 + $0x270] ss:$8 sps:$4 sm:$0xff]  }
 0x2f0   :  { %5256 = vmatprep.subr.bf16.mxu0 %v6429_v0  ;;  %v6489_v0 = vld [vmem:[%s8982_s5 + $0x284] ss:$8 sps:$4 sm:$0xff]  }
 0x2f2   :  { %4395 = vmatpush1.bf16.msra.mxu1 %v6105_v14  ;;  %v6490_v14 = vld [vmem:[%s8982_s5 + $0x290] ss:$8 sps:$4 sm:$0xff]  }
 0x2f3   :  { %5257 = vmatpush1.bf16.msra.mxu0 %v6427_v19  ;;  %4396 = vmatprep.subr.bf16.mxu1 %v6114_v44  ;;  %v6495_v19 = vld [vmem:[%s8982_s5 + $0x2a4] ss:$8 sps:$4 sm:$0xff]   ;;  %v6493_v44 = vld [vmem:[%s8982_s5 + $0x2a0] ss:$8 sps:$4 sm:$0xff]  }
 0x2f4   :  { %5258 = vmatprep.subr.bf16.mxu0 %v6432_v45  ;;  %v6498_v45 = vld [vmem:[%s8982_s5 + $0x2b4] ss:$8 sps:$4 sm:$0xff]  }
 0x2f6   :  { %4397 = vmatpush1.bf16.msra.mxu1 %v6113_v46  ;;  %v6499_v46 = vld [vmem:[%s8982_s5 + $0x2c0] ss:$8 sps:$4 sm:$0xff]  }
 0x2f7   :  { %5259 = vmatpush1.bf16.msra.mxu0 %v6430_v47  ;;  %4398 = vmatprep.subr.bf16.mxu1 %v6122_v48  ;;  %v6504_v47 = vld [vmem:[%s8982_s5 + $0x2d4] ss:$8 sps:$4 sm:$0xff]   ;;  %v6502_v48 = vld [vmem:[%s8982_s5 + $0x2d0] ss:$8 sps:$4 sm:$0xff]  }
 0x2f8   :  { %5260 = vmatprep.subr.bf16.mxu0 %v6435_v39  ;;  %v6507_v39 = vld [vmem:[%s8982_s5 + $0x2e4] ss:$8 sps:$4 sm:$0xff]  }
 0x2fa   :  { %4399 = vmatpush1.bf16.msra.mxu1 %v6121_v51  ;;  %v6508_v51 = vld [vmem:[%s8982_s5 + $0x2f0] ss:$8 sps:$4 sm:$0xff]  }
 0x2fb   :  { %5261 = vmatpush1.bf16.msra.mxu0 %v6433_v52  ;;  %4400 = vmatprep.subr.bf16.mxu1 %v6130_v56  ;;  %v6513_v52 = vld [vmem:[%s8982_s5 + $0x304] ss:$8 sps:$4 sm:$0xff]  }
 0x2fc   :  { %5262 = vmatprep.subr.bf16.mxu0 %v6438_v58  ;;  %v6559_v56 = vld [vmem:[%s8984_s7 + $0x40] sm:$0xff]  }
 0x2fd   :  { %v6560_v58 = vld [vmem:[%s8984_s7] sm:$0xff]  }
 0x2fe   :  { %4401 = vmatpush1.bf16.msra.mxu1 %v6129_v57  ;;  %v6561_v57 = vld [vmem:[%s8984_s7 + $0x48] sm:$0xff]  }
 0x2ff   :  { %5263 = vmatpush1.bf16.msra.mxu0 %v6436_v40  ;;  %6276 = vmatprep.subr.bf16.mxu1 %v6559_v56  ;;  %v6562_v40 = vld [vmem:[%s8984_s7 + $0x8] sm:$0xff]  }
 0x300   :  { %5264 = vmatprep.subr.bf16.mxu0 %v6441_v59  ;;  %v6563_v59 = vld [vmem:[%s8984_s7 + $0x50] sm:$0xff]  }
 0x301   :  { %4403 = vmatmul.mubr.bf16.vlgmr.msra.gmra.mrb[20].mxu1 %v7578_v62  ;;  %v6450_v62 = vld [vmem:[%s8982_s5 + $0x1b4] ss:$8 sps:$4 sm:$0xff]  }
 0x302   :  { %6277 = vmatpush3.bf16.msra.mxu1 %v6560_v58 }
 0x303   :  { %5265 = vmatpush1.bf16.msra.mxu0 %v6439_v60  ;;  %6278 = vmatprep.subr.bf16.mxu1 %v6561_v57  ;;  %v6564_v60 = vld [vmem:[%s8984_s7 + $0x10] sm:$0xff]  }
 0x304   :  { %5266 = vmatprep.subr.bf16.mxu0 %v6444_v61  ;;  %v6565_v61 = vld [vmem:[%s8984_s7 + $0x58] sm:$0xff]  }
 0x306   :  { %6279 = vmatpush3.bf16.msra.mxu1 %v6562_v40 }
 0x307   :  { %5267 = vmatpush1.bf16.msra.mxu0 %v6442_v63  ;;  %6280 = vmatprep.subr.bf16.mxu1 %v6563_v59  ;;  %v6566_v63 = vld [vmem:[%s8984_s7 + $0x18] sm:$0xff]  }
 0x308   :  { %5268 = vmatprep.subr.bf16.mxu0 %v6447_v1  ;;  %v6567_v1 = vld [vmem:[%s8984_s7 + $0x60] sm:$0xff]  }
 0x30a   :  { %6281 = vmatpush3.bf16.msra.mxu1 %v6564_v60 }
 0x30b   :  { %5269 = vmatpush1.bf16.msra.mxu0 %v6445_v2  ;;  %6282 = vmatprep.subr.bf16.mxu1 %v6565_v61  ;;  %v6568_v2 = vld [vmem:[%s8984_s7 + $0x20] sm:$0xff]  }
 0x30c   :  { %5270 = vmatprep.subr.bf16.mxu0 %v6450_v62  ;;  %v6569_v62 = vld [vmem:[%s8984_s7 + $0x68] sm:$0xff]  }
 0x30e   :  { %6283 = vmatpush3.bf16.msra.mxu1 %v6566_v63 }
 0x30f   :  { %5271 = vmatpush1.bf16.msra.mxu0 %v6448_v4  ;;  %6284 = vmatprep.subr.bf16.mxu1 %v6567_v1  ;;  %v6570_v4 = vld [vmem:[%s8984_s7 + $0x28] sm:$0xff]  }
 0x310   :  { %5272 = vmatprep.subr.bf16.mxu0 %v6453_v31  ;;  %v8848_v31 = vld [vmem:[%s8983_s4] sm:$0xff] }
 0x312   :  { %6285 = vmatpush3.bf16.msra.mxu1 %v6568_v2  ;;  %v6574_v2 = vld [vmem:[%s8984_s7 + $0x38] sm:$0xff]  }
 0x313   :  { %5273 = vmatpush1.bf16.msra.mxu0 %v6451_v5  ;;  %v1174_v5 = vrot.slane %v8848_v31, %v119_v28  ;;  %6286 = vmatprep.subr.bf16.mxu1 %v6569_v62  ;;  %v4555_v62 = vld [vmem:[%s8985_s6] sm:$0x3] }
 0x314   :  { %5274 = vmatprep.subr.bf16.mxu0 %v6456_v41  ;;  %v1178_v41 = vrot.slane %v8848_v31, %v123_v54  ;;  %v6514_v54 = vld [vmem:[%s8982_s5 + $0x310] ss:$8 sps:$4 sm:$0xff]  }
 0x316   :  { %6287 = vmatpush3.bf16.msra.mxu1 %v6570_v4  ;;  %v4560_v4 = vrot.slane %v4555_v62, %v7055_v18 }
 0x317   :  { %5275 = vmatpush1.bf16.msra.mxu0 %v6454_v35 }
 0x318   :  { %5276 = vmatprep.subr.bf16.mxu0 %v6459_v43 }
 0x31b   :  { %5277 = vmatpush1.bf16.msra.mxu0 %v6457_v6 }
 0x31c   :  { %5278 = vmatprep.subr.bf16.mxu0 %v6462_v13 }
 0x31f   :  { %5279 = vmatpush1.bf16.msra.mxu0 %v6460_v55 }
 0x320   :  { %5289 = vmatprep.subr.bf16.mxu0 %v6465_v3 }
 0x322   :  { %5281 = vmatmul.mubr.bf16.vlgmr.msra.gmra.mrb[12].mxu0 %v4421_v8  ;;  %v6516_v8 = vld [vmem:[%s8982_s5 + $0x314] ss:$8 sps:$4 sm:$0xff]  }
 0x323   :  { %5290 = vmatpush1.bf16.msra.mxu0 %v6463_v11  ;;  %v6511_v11 = vld [vmem:[%s8982_s5 + $0x300] ss:$8 sps:$4 sm:$0xff]  }
 0x324   :  { %5291 = vmatprep.subr.bf16.mxu0 %v6468_v26  ;;  %v6519_v26 = vld [vmem:[%s8982_s5 + $0x324] ss:$8 sps:$4 sm:$0xff]  }
 0x327   :  { %5292 = vmatpush1.bf16.msra.mxu0 %v6466_v34  ;;  %v6517_v34 = vld [vmem:[%s8982_s5 + $0x320] ss:$8 sps:$4 sm:$0xff]  }
 0x328   :  { %5293 = vmatprep.subr.bf16.mxu0 %v6471_v16  ;;  %v6522_v16 = vld [vmem:[%s8982_s5 + $0x334] ss:$8 sps:$4 sm:$0xff]  }
 0x32b   :  { %5294 = vmatpush1.bf16.msra.mxu0 %v6469_v23  ;;  %v6520_v23 = vld [vmem:[%s8982_s5 + $0x330] ss:$8 sps:$4 sm:$0xff]  }
 0x32c   :  { %5295 = vmatprep.subr.bf16.mxu0 %v6474_v32  ;;  %v6525_v32 = vld [vmem:[%s8982_s5 + $0x344] ss:$8 sps:$4 sm:$0xff]  }
 0x32f   :  { %5296 = vmatpush1.bf16.msra.mxu0 %v6472_v24  ;;  %v6523_v24 = vld [vmem:[%s8982_s5 + $0x340] ss:$8 sps:$4 sm:$0xff]  }
 0x330   :  { %5297 = vmatprep.subr.bf16.mxu0 %v6477_v25  ;;  %v6528_v25 = vld [vmem:[%s8982_s5 + $0x354] ss:$8 sps:$4 sm:$0xff]  }
 0x333   :  { %5298 = vmatpush1.bf16.msra.mxu0 %v6475_v29  ;;  %v6526_v29 = vld [vmem:[%s8982_s5 + $0x350] ss:$8 sps:$4 sm:$0xff]  }
 0x334   :  { %5299 = vmatprep.subr.bf16.mxu0 %v6480_v30  ;;  %v6531_v30 = vld [vmem:[%s8982_s5 + $0x364] ss:$8 sps:$4 sm:$0xff]  }
 0x337   :  { %5300 = vmatpush1.bf16.msra.mxu0 %v6478_v21  ;;  %v6529_v21 = vld [vmem:[%s8982_s5 + $0x360] ss:$8 sps:$4 sm:$0xff]  }
 0x338   :  { %5301 = vmatprep.subr.bf16.mxu0 %v6483_v36  ;;  %v6534_v36 = vld [vmem:[%s8982_s5 + $0x374] ss:$8 sps:$4 sm:$0xff]  }
 0x33b   :  { %5302 = vmatpush1.bf16.msra.mxu0 %v6481_v27  ;;  %v6532_v27 = vld [vmem:[%s8982_s5 + $0x370] ss:$8 sps:$4 sm:$0xff]  }
 0x33c   :  { %5303 = vmatprep.subr.bf16.mxu0 %v6486_v38  ;;  %v6537_v38 = vld [vmem:[%s8982_s5 + $0x384] ss:$8 sps:$4 sm:$0xff]  }
 0x33f   :  { %5304 = vmatpush1.bf16.msra.mxu0 %v6484_v42  ;;  %v6535_v42 = vld [vmem:[%s8982_s5 + $0x380] ss:$8 sps:$4 sm:$0xff]  }
 0x340   :  { %5305 = vmatprep.subr.bf16.mxu0 %v6489_v0  ;;  %v6540_v0 = vld [vmem:[%s8982_s5 + $0x394] ss:$8 sps:$4 sm:$0xff]  }
 0x343   :  { %5306 = vmatpush1.bf16.msra.mxu0 %v6487_v12  ;;  %v6538_v12 = vld [vmem:[%s8982_s5 + $0x390] ss:$8 sps:$4 sm:$0xff]  }
 0x344   :  { %5307 = vmatprep.subr.bf16.mxu0 %v6492_v33  ;;  %v6543_v33 = vld [vmem:[%s8982_s5 + $0x3a4] ss:$8 sps:$4 sm:$0xff]  }
 0x347   :  { %5308 = vmatpush1.bf16.msra.mxu0 %v6490_v14  ;;  %v6541_v14 = vld [vmem:[%s8982_s5 + $0x3a0] ss:$8 sps:$4 sm:$0xff]  }
 0x348   :  { %5309 = vmatprep.subr.bf16.mxu0 %v6495_v19  ;;  %v6546_v19 = vld [vmem:[%s8982_s5 + $0x3b4] ss:$8 sps:$4 sm:$0xff]  }
 0x34b   :  { %5310 = vmatpush1.bf16.msra.mxu0 %v6493_v44  ;;  %v6544_v44 = vld [vmem:[%s8982_s5 + $0x3b0] ss:$8 sps:$4 sm:$0xff]  }
 0x34c   :  { %5311 = vmatprep.subr.bf16.mxu0 %v6498_v45  ;;  %v6549_v45 = vld [vmem:[%s8982_s5 + $0x3c4] ss:$8 sps:$4 sm:$0xff]  }
 0x34f   :  { %5312 = vmatpush1.bf16.msra.mxu0 %v6496_v10  ;;  %v6547_v10 = vld [vmem:[%s8982_s5 + $0x3c0] ss:$8 sps:$4 sm:$0xff]  }
 0x350   :  { %5313 = vmatprep.subr.bf16.mxu0 %v6501_v15  ;;  %v6552_v15 = vld [vmem:[%s8982_s5 + $0x3d4] ss:$8 sps:$4 sm:$0xff]  }
 0x353   :  { %5314 = vmatpush1.bf16.msra.mxu0 %v6499_v46  ;;  %v6550_v46 = vld [vmem:[%s8982_s5 + $0x3d0] ss:$8 sps:$4 sm:$0xff]  }
 0x354   :  { %5315 = vmatprep.subr.bf16.mxu0 %v6504_v47  ;;  %v6555_v47 = vld [vmem:[%s8982_s5 + $0x3e4] ss:$8 sps:$4 sm:$0xff]  }
 0x357   :  { %5316 = vmatpush1.bf16.msra.mxu0 %v6502_v48  ;;  %v6553_v48 = vld [vmem:[%s8982_s5 + $0x3e0] ss:$8 sps:$4 sm:$0xff]  }
 0x358   :  { %5317 = vmatprep.subr.bf16.mxu0 %v6507_v39  ;;  %v6558_v39 = vld [vmem:[%s8982_s5 + $0x3f4] ss:$8 sps:$4 sm:$0xff]  }
 0x35b   :  { %5318 = vmatpush1.bf16.msra.mxu0 %v6505_v49  ;;  %v6556_v49 = vld [vmem:[%s8982_s5 + $0x3f0] ss:$8 sps:$4 sm:$0xff]  }
 0x35c   :  { %5319 = vmatprep.subr.bf16.mxu0 %v6510_v50  ;;  %v1182_v50 = vrot.slane %v8848_v31, %v127_v22  ;;  %v6571_v22 = vld [vmem:[%s8984_s7 + $0x70] sm:$0xff]  }
 0x35d   :  { %6288 = vmatprep.subr.bf16.mxu1 %v6571_v22 }
 0x35e   :  { %6289 = vmatpush3.bf16.msra.mxu1 %v6572_v17 }
 0x35f   :  { %5320 = vmatpush1.bf16.msra.mxu0 %v6508_v51  ;;  %v1186_v51 = vrot.slane %v8848_v31, %v131_v9  ;;  %v6573_v9 = vld [vmem:[%s8984_s7 + $0x78] sm:$0xff]   ;;  %v4564_v31 = vrot.slane %v4555_v62, %v7063_v20 }
 0x360   :  { %5330 = vmatprep.subr.bf16.mxu0 %v6513_v52  ;;  %6290 = vmatprep.subr.bf16.mxu1 %v6573_v9 }
 0x362   :  { %6291 = vmatpush3.bf16.msra.mxu1 %v6574_v2 }
 0x375   :  { %v4240_v35 = vpop.f32.mrb[8].mxu0 }
 0x376   :  { %v6304_v37 = vadd.f32 %v4240_v35, %v1174_v5  ;;  %v4242_v43 = vpop.f32.mrb[9].mxu0 }
 0x377   :  { %v6305_v6 = vadd.f32 %v4242_v43, %v1178_v41  ;;  %v4244_v7 = vpop.f32.mrb[10].mxu0 }
 0x378   :  { %v4415_v13 = vmax.f32 %v6304_v37, 0.0  ;;  %v4245_v55 = vpop.f32.mrb[11].mxu0 }
 0x379   :  { %v4416_v53 = vmax.f32 %v6305_v6, 0.0 }
 0x37a   :  { %v4423_v28 = vpack.c.bf16 %v4415_v13, %v4415_v13 }
 0x37b   :  { %v4424_v3 = vpack.c.bf16 %v4416_v53, %v4416_v53 }
 0x37d   :  { %5321 = vmatprep.mubr.bf16.mxu0 %v4424_v3 }
 0x37e   :  { %5322 = vmatmul.mubr.bf16.vlgmr.msra.gmra.mrb[12].mxu0 %v4423_v28 }
 0x37f   :  { %5331 = vmatpush1.bf16.msra.mxu0 %v6511_v11  ;;  %v6259_v11 = vld [vmem:[%s8986_s8] ss:$0 sm:$0xff] }
 0x380   :  { %5332 = vmatprep.subr.bf16.mxu0 %v6516_v8 }
 0x383   :  { %5333 = vmatpush1.bf16.msra.mxu0 %v6514_v54 }
 0x384   :  { %5334 = vmatprep.subr.bf16.mxu0 %v6519_v26 }
 0x387   :  { %5335 = vmatpush1.bf16.msra.mxu0 %v6517_v34 }
 0x388   :  { %5336 = vmatprep.subr.bf16.mxu0 %v6522_v16 }
 0x38b   :  { %5337 = vmatpush1.bf16.msra.mxu0 %v6520_v23 }
 0x38c   :  { %5338 = vmatprep.subr.bf16.mxu0 %v6525_v32 }
 0x38f   :  { %5339 = vmatpush1.bf16.msra.mxu0 %v6523_v24 }
 0x390   :  { %5340 = vmatprep.subr.bf16.mxu0 %v6528_v25 }
 0x393   :  { %5341 = vmatpush1.bf16.msra.mxu0 %v6526_v29 }
 0x394   :  { %5342 = vmatprep.subr.bf16.mxu0 %v6531_v30 }
 0x397   :  { %5343 = vmatpush1.bf16.msra.mxu0 %v6529_v21 }
 0x398   :  { %5344 = vmatprep.subr.bf16.mxu0 %v6534_v36 }
 0x39b   :  { %5345 = vmatpush1.bf16.msra.mxu0 %v6532_v27 }
 0x39c   :  { %5346 = vmatprep.subr.bf16.mxu0 %v6537_v38 }
 0x39f   :  { %5347 = vmatpush1.bf16.msra.mxu0 %v6535_v42 }
 0x3a0   :  { %5348 = vmatprep.subr.bf16.mxu0 %v6540_v0 }
 0x3a3   :  { %5349 = vmatpush1.bf16.msra.mxu0 %v6538_v12 }
 0x3a4   :  { %5350 = vmatprep.subr.bf16.mxu0 %v6543_v33 }
 0x3a7   :  { %5351 = vmatpush1.bf16.msra.mxu0 %v6541_v14 }
 0x3a8   :  { %5352 = vmatprep.subr.bf16.mxu0 %v6546_v19 }
 0x3ab   :  { %5353 = vmatpush1.bf16.msra.mxu0 %v6544_v44 }
 0x3ac   :  { %5354 = vmatprep.subr.bf16.mxu0 %v6549_v45 }
 0x3af   :  { %5355 = vmatpush1.bf16.msra.mxu0 %v6547_v10 }
 0x3b0   :  { %5356 = vmatprep.subr.bf16.mxu0 %v6552_v15 }
 0x3b3   :  { %5357 = vmatpush1.bf16.msra.mxu0 %v6550_v46 }
 0x3b4   :  { %5358 = vmatprep.subr.bf16.mxu0 %v6555_v47 }
 0x3b7   :  { %5359 = vmatpush1.bf16.msra.mxu0 %v6553_v48 }
 0x3b8   :  { %5360 = vmatprep.subr.bf16.mxu0 %v6558_v39 }
 0x3bb   :  { %5361 = vmatpush1.bf16.msra.mxu0 %v6556_v49 }
 0x3d4   :  { %v4404_v52 = vpop.f32.mrb[20].mxu1 }
 0x3d5   :  { %v6306_v56 = vadd.f32 %v4404_v52, %v1182_v50  ;;  %v4406_v58 = vpop.f32.mrb[21].mxu1 }
 0x3d6   :  { %v6307_v57 = vadd.f32 %v4406_v58, %v1186_v51  ;;  %v4408_v40 = vpop.f32.mrb[22].mxu1 }
 0x3d7   :  { %v4417_v59 = vmax.f32 %v6306_v56, 0.0  ;;  %v4409_v60 = vpop.f32.mrb[23].mxu1 }
 0x3d8   :  { %v4418_v61 = vmax.f32 %v6307_v57, 0.0 }
 0x3d9   :  { %v4425_v1 = vpack.c.bf16 %v4417_v59, %v4417_v59 }
 0x3da   :  { %v4426_v63 = vpack.c.bf16 %v4418_v61, %v4418_v61 }
 0x3dc   :  { %5362 = vmatprep.mubr.bf16.mxu0 %v4426_v63 }
 0x3dd   :  { %5363 = vmatmul.mubr.bf16.vlgmr.msra.gmra.mrb[12].mxu0 %v4425_v1 }
 0x4b0   :  { %v5364_v5 = vpop.f32.mrb[12].mxu0 }
 0x4b1   :  { %v6308_v41 = vadd.f32 %v5364_v5, %v4560_v4  ;;  %v5366_v35 = vpop.f32.mrb[13].mxu0 }
 0x4b2   :  { %v6309_v37 = vadd.f32 %v5366_v35, %v4564_v31  ;;  %v5368_v43 = vpop.f32.mrb[14].mxu0 }
 0x4b3   :  { %v5371_v6 = vmax.f32 %v6308_v41, 0.0  ;;  %v5369_v7 = vpop.f32.mrb[15].mxu0 }
 0x4b4   :  { %v5372_v13 = vmax.f32 %v6309_v37, 0.0 }
 0x4b5   :  { %v5373_v53 = vpack.c.bf16 %v5371_v6, %v5371_v6 }
 0x4b6   :  { %v5374_v55 = vpack.c.bf16 %v5372_v13, %v5372_v13 }
 0x4b8   :  { %5542 = vmatprep.mubr.bf16.mxu1 %v5374_v55 }
 0x4b9   :  { %5543 = vmatmul.mubr.bf16.vlgmr.msra.gmra.mrb[24].mxu1 %v5373_v53 }
 0x58c   :  { %v6292_v3 = vpop.f32.mrb[24].mxu1 }
 0x58d   :  { %v6293_v18 = vpop.f32.mrb[25].mxu1 }
 0x58e   :  { %v6294_v28 = vadd.f32 %v6293_v18, %v6292_v3  ;;  %v6295_v20 = vpop.f32.mrb[26].mxu1 }
 0x58f   :  { %v6296_v8 = vpop.f32.mrb[27].mxu1 }
 0x590   :  { %v5545_v54 = vadd.f32 %v6294_v28, %v6259_v11 }
 0x592   :  { %5550 = vst [vmem:[%s8987_s9] sm:$0xff] %v5545_v54 }

</bundles_post_ra>
